<compile_context>
chip_gen: v7x
topology: tpu7x:2x2x1
jax: 0.10.0
libtpu: 0.0.40
codegen_flags: <defaults>
</compile_context>

<pallas_src>
import math
import numpy as np
import jax
import jax.numpy as jnp
from jax.experimental import pallas as pl
from jax.experimental.pallas import tpu as pltpu

# ----------------------------------------------------------------------------
# Geometric algebra tables for PGA(3,0,1): 16-dim multivectors.
# ----------------------------------------------------------------------------
MV = 16
BLADES = [(), (0,), (1,), (2,), (3,),
          (0, 1), (0, 2), (0, 3), (1, 2), (1, 3), (2, 3),
          (0, 1, 2), (0, 1, 3), (0, 2, 3), (1, 2, 3), (0, 1, 2, 3)]
BLADE_IDX = {b: i for i, b in enumerate(BLADES)}
METRIC = {0: 0.0, 1: 1.0, 2: 1.0, 3: 1.0}   # e0^2 = 0 (degenerate), e1..e3^2 = 1


def _basis_product(a, b):
    """Geometric product of two basis blades. Returns (coeff, result_tuple)."""
    arr = list(a) + list(b)
    sign = 1
    for i in range(len(arr)):
        for j in range(len(arr) - 1 - i):
            if arr[j] > arr[j + 1]:
                arr[j], arr[j + 1] = arr[j + 1], arr[j]
                sign = -sign
    coeff = float(sign)
    res = []
    i = 0
    while i < len(arr):
        if i + 1 < len(arr) and arr[i] == arr[i + 1]:
            coeff *= METRIC[arr[i]]
            i += 2
        else:
            res.append(arr[i])
            i += 1
    return coeff, tuple(res)


# Cayley table of the geometric product: CAYLEY[i, j, k] = <e_i e_j>_k
CAYLEY = np.zeros((MV, MV, MV), np.float32)
for i, a in enumerate(BLADES):
    for j, b in enumerate(BLADES):
        c, r = _basis_product(a, b)
        if c != 0.0:
            CAYLEY[i, j, BLADE_IDX[r]] += c

# Poincare dual / join kernel: join(x, y) = undual(dual(x) ^ dual(y))
_dual = {}
for i, a in enumerate(BLADES):
    comp = tuple(sorted(set(range(4)) - set(a)))
    w, _ = _basis_product(a, comp)          # e_a ^ e_comp = w * e0123 (w = +-1)
    _dual[i] = (BLADE_IDX[comp], w)
_undual = {ci: (i, s) for i, (ci, s) in _dual.items()}

JOIN = np.zeros((MV, MV, MV), np.float32)
for i in range(MV):
    di, si = _dual[i]
    for j in range(MV):
        dj, sj = _dual[j]
        a, b = BLADES[di], BLADES[dj]
        if set(a) & set(b):
            continue                        # wedge vanishes
        w, r = _basis_product(a, b)
        ui, su = _undual[BLADE_IDX[r]]
        JOIN[i, j, ui] += si * sj * w * su

# Equivariant linear basis ("blade operator"): 5 grade projections + 4 e0-maps.
BLADE_LEN = 9
BLADE_OP = np.zeros((BLADE_LEN, MV, MV), np.float32)
for i, b in enumerate(BLADES):
    BLADE_OP[len(b), i, i] = 1.0
for g in range(4):
    for i, b in enumerate(BLADES):
        if len(b) == g and 0 not in b:
            BLADE_OP[5 + g, i, BLADE_IDX[tuple(sorted((0,) + b))]] = 1.0

# Components with non-degenerate inner product (blades not containing e0).
IP_IDX = [i for i, b in enumerate(BLADES) if 0 not in b]     # 8 components
N_IP = len(IP_IDX)

# ----------------------------------------------------------------------------
# Problem sizes (small, consistent with the module).
# ----------------------------------------------------------------------------
B = 2          # batch
ITEMS = 16     # sequence items
CIN = 4        # input multivector channels
H = 8          # hidden_dim
NH = 2         # n_heads
OUT_CH = 256   # final_equilinear output channels
SCALE = 1.0 / math.sqrt(H * N_IP)   # torch sdpa default scale (q.shape[-1] = H*8)
R = B * ITEMS                       # batch folded into rows (sublanes)
CH = H // 2                         # bilinear half channel count
HL = CH * MV                        # 64 lanes per bilinear half
QW = H * N_IP                       # 64 lanes per attention head (IP comps)
TILE_N = 2048                       # output lane tile (OUT_CH*16 = 4096 -> grid 2)


# ----------------------------------------------------------------------------
# Host-side glue: flattened / folded / stacked weight matrices for the kernel.
# ----------------------------------------------------------------------------
def equi_w2(w_raw):
    """(Cout, Cin, 9) EquiLinear weights -> (Cin*16, Cout*16) dense matmul."""
    blade = jnp.asarray(BLADE_OP)
    w_full = jnp.einsum('jib,bxy->ixjy', w_raw, blade)      # (Cin,16,Cout,16)
    cin, cout = w_raw.shape[1], w_raw.shape[0]
    return w_full.reshape(cin * MV, cout * MV).astype(jnp.float32)


def make_q_select(h, nh):
    """Per-head selection: q channel index c = hd*nh + head; keep IP comps."""
    s = np.zeros((nh, h * nh * MV, h * N_IP), np.float32)
    for head in range(nh):
        for hd in range(h):
            c = hd * nh + head
            for si, comp in enumerate(IP_IDX):
                s[head, c * MV + comp, hd * N_IP + si] = 1.0
    return s


def make_k_select(h):
    s = np.zeros((h * MV, h * N_IP), np.float32)
    for hd in range(h):
        for si, comp in enumerate(IP_IDX):
            s[hd * MV + comp, hd * N_IP + si] = 1.0
    return s


def make_estack(c):
    """Stacked broadcast operator, block i broadcasts mv component i of each
    channel across that channel's 16 lanes.  Shape (c*16, 16*c*16)."""
    e = np.zeros((c * MV, MV * c * MV), np.float32)
    for i in range(MV):
        for ch in range(c):
            e[ch * MV + i, i * c * MV + ch * MV: i * c * MV + (ch + 1) * MV] = 1.0
    return e


def make_mstack(table, c):
    """Stacked per-channel pair table, block i applies table[i] within each channel."""
    m = np.zeros((c * MV, MV * c * MV), np.float32)
    for i in range(MV):
        for ch in range(c):
            m[ch * MV:(ch + 1) * MV,
              i * c * MV + ch * MV: i * c * MV + (ch + 1) * MV] = table[i]
    return m


def make_ssum(c):
    """Block-identity sum matrix folding the 16 stacked blocks back down."""
    s = np.zeros((MV * c * MV, c * MV), np.float32)
    for i in range(MV):
        s[i * c * MV:(i + 1) * c * MV, :] = np.eye(c * MV, dtype=np.float32)
    return s


# ----------------------------------------------------------------------------
# The Pallas kernel: full GATrNet forward pass (batch folded into rows), with
# the final projection tiled over a 1-D "parallel" grid axis.
# ----------------------------------------------------------------------------
def gatr_kernel(x_ref, we_ref, wqk_ref, wv_ref, wo_ref, wgj_ref,
                es_ref, mgp_ref, mjn_ref, ssum_ref, wge_ref,
                maskh_ref, mask15_ref, bias_ref, bavg_ref,
                wfin_ref, o_ref):
    f32 = jnp.float32
    bf16 = jnp.bfloat16

    def mm(a, w):                       # bf16 x bf16 matmul, f32 accumulation
        return jnp.dot(a, w, preferred_element_type=f32)

    x = x_ref[...]                                    # (R, CIN*16) f32
    maskh = maskh_ref[...]                            # (1, H*16)

    # --- enter_equilinear -------------------------------------------------
    h0 = mm(x.astype(bf16), we_ref[...])              # (R, H*16)

    def equinorm(h):
        # NB: no eps (matches the reference); all-zero rows would give inf/NaN.
        sq = jnp.sum(h * h * maskh, axis=-1, keepdims=True) * (1.0 / H)
        return h * jax.lax.rsqrt(sq)

    # --- attention block ----------------------------------------------------
    n0b = equinorm(h0).astype(bf16)
    # q (both heads, SCALE folded) and k (IP selection folded) in one matmul.
    qk = mm(n0b, wqk_ref[...])                        # (R, (NH+1)*QW) = (R,192)
    v = mm(n0b, wv_ref[...])                          # (R, H*16)
    k_b = qk[:, NH * QW:].astype(bf16)
    v_b = v.astype(bf16)
    bias = bias_ref[...]                              # (R, R) block-diag mask

    head_outs = []
    for head in range(NH):                            # static unroll, NH = 2
        q_h = qk[:, head * QW:(head + 1) * QW].astype(bf16)
        s = jax.lax.dot_general(q_h, k_b, (((1,), (1,)), ((), ())),
                                preferred_element_type=f32) + bias
        s = s - jnp.max(s, axis=-1, keepdims=True)
        p = jnp.exp(s)
        p = p * pl.reciprocal(jnp.sum(p, axis=-1, keepdims=True), approx=True)
        head_outs.append(mm(p.astype(bf16), v_b))     # (R, H*16)
    ho = jnp.concatenate(head_outs, axis=-1)          # (R, NH*H*16), head-major
    attn_out = mm(ho.astype(bf16), wo_ref[...])       # single fused wo matmul

    r1 = attn_out + h0

    # --- geometric bilinear block -------------------------------------------
    n1b = equinorm(r1).astype(bf16)
    gj = mm(n1b, wgj_ref[...])                        # (R, 4*HL): [g1|g2|j1|j2]
    g1 = gj[:, 0 * HL:1 * HL]
    g2 = gj[:, 1 * HL:2 * HL]
    j1 = gj[:, 2 * HL:3 * HL]
    j2 = gj[:, 3 * HL:4 * HL]

    es = es_ref[...]                                  # (HL, 16*HL) bf16

    # Geometric product / join via stacked operators.  [g1;j1] (and the two
    # M-stack results) are row-stacked so these run at M=2R instead of M=R.
    lhs = mm(jnp.concatenate([g1, j1], axis=0).astype(bf16), es)       # (2R,16*HL)
    rhs = jnp.concatenate(
        [mm(g2.astype(bf16), mgp_ref[...]),           # Cayley * 1e-5 folded
         mm(j2.astype(bf16), mjn_ref[...])], axis=0)                    # (2R,16*HL)
    prod = (lhs * rhs).astype(bf16)
    gpjn = jnp.dot(prod, ssum_ref[...], preferred_element_type=f32)     # (2R, HL)

    # per-batch reference pseudoscalar (mean e0123 comp of x): reduce lanes
    # first, then the (R,R) block-average matmul on an (R,1) column.
    x15 = jnp.sum(x * mask15_ref[...], axis=-1, keepdims=True)          # (R, 1)
    refps = jnp.dot(bavg_ref[...], x15, preferred_element_type=f32)     # (R, 1)
    row_scale = jnp.concatenate([jnp.ones_like(refps), refps], axis=0)  # (2R, 1)
    gpjn = gpjn * row_scale                           # gp rows x1, jn rows x refps

    # gated ReLU on the row-stacked [gp;jn]; gate broadcast == comp-0 E block.
    gate_w = es[:, :HL]                               # (HL, HL) bf16
    gated = jnp.maximum(mm(gpjn.astype(bf16), gate_w), 0.0) * gpjn      # (2R, HL)

    # gelu_equilinear on concat([gp, jn], channels): lane-concat the halves and
    # apply the full (128,128) weight in a single K=128 matmul.
    gated_cat = jnp.concatenate([gated[:R, :], gated[R:, :]], axis=-1)  # (R, 2HL)
    proj = mm(gated_cat.astype(bf16), wge_ref[...])                     # (R, H*16)

    # residual 2 + final_equilinear, tiled over the grid axis (wfin tile).
    r2 = (proj + r1).astype(bf16)
    o_ref[...] = mm(r2, wfin_ref[...])                # (R, TILE_N) f32


def gatr_forward_pallas(x, consts):
    """x: (B, ITEMS, CIN, 16) -> (B, ITEMS, OUT_CH, 16)."""
    b = x.shape[0]
    rows = b * ITEMS
    x_flat = x.reshape(rows, CIN * MV).astype(jnp.float32)

    other, wfin = consts[:-1], consts[-1]

    def const_spec(a):
        nd = a.ndim
        return pl.BlockSpec(a.shape, lambda i, _nd=nd: (0,) * _nd)

    n_tiles = (OUT_CH * MV) // TILE_N
    in_specs = ([const_spec(x_flat)] + [const_spec(a) for a in other]
                + [pl.BlockSpec((H * MV, TILE_N), lambda i: (0, i))])
    out_specs = pl.BlockSpec((rows, TILE_N), lambda i: (0, i))

    # Grid only over output lane tiles: wfin tiles are double-buffered and the
    # output writeback overlaps compute; the cheap prefix is recomputed per
    # step so the axis can be "parallel" (v7x: one wfin half per TensorCore).
    out = pl.pallas_call(
        gatr_kernel,
        out_shape=jax.ShapeDtypeStruct((rows, OUT_CH * MV), jnp.float32),
        grid=(n_tiles,),
        in_specs=in_specs,
        out_specs=out_specs,
        compiler_params=pltpu.CompilerParams(
            dimension_semantics=("parallel",)),
    )(x_flat, *other, wfin)
    return out.reshape(b, ITEMS, OUT_CH, MV)


# ----------------------------------------------------------------------------
# Pure-JAX reference (mirrors the PyTorch module) for a correctness check.
# ----------------------------------------------------------------------------
def ref_forward(x, p):
    blade = jnp.asarray(BLADE_OP)
    cayley = jnp.asarray(CAYLEY)
    join_t = jnp.asarray(JOIN)
    ip_idx = jnp.asarray(IP_IDX)

    def equi(w, t):
        return jnp.einsum('jib,bxy,...ix->...jy', w, blade, t)

    def norm(t):
        ip = jnp.sum((t * t)[..., ip_idx], axis=-1, keepdims=True)
        return t / jnp.sqrt(jnp.mean(ip, axis=-2, keepdims=True))

    h0 = equi(p['w_enter'], x)
    n0 = norm(h0)

    q = equi(p['wq'], n0)
    k = equi(p['wk'], n0)
    v = equi(p['wv'], n0)
    bsz, t = x.shape[0], x.shape[1]
    qh = q.reshape(bsz, t, H, NH, MV).transpose(0, 3, 1, 2, 4)      # (B,NH,T,H,MV)
    kh = k.reshape(bsz, t, 1, H, MV).transpose(0, 2, 1, 3, 4)
    vh = v.reshape(bsz, t, 1, H, MV).transpose(0, 2, 1, 3, 4)
    qf = qh[..., ip_idx].reshape(bsz, NH, t, H * N_IP)
    kf = kh[..., ip_idx].reshape(bsz, 1, t, H * N_IP)
    vf = vh.reshape(bsz, 1, t, H * MV)
    scores = jnp.einsum('bhqd,bhkd->bhqk', qf,
                        jnp.broadcast_to(kf, (bsz, NH, t, H * N_IP))) * SCALE
    probs = jax.nn.softmax(scores, axis=-1)
    attn = jnp.einsum('bhqk,bhkd->bhqd', probs,
                      jnp.broadcast_to(vf, (bsz, NH, t, H * MV)))
    attn = attn.reshape(bsz, NH, t, H, MV).transpose(0, 2, 1, 3, 4).reshape(bsz, t, NH * H, MV)
    att_out = equi(p['wo'], attn)

    r1 = att_out + h0
    ref = jnp.mean(x, axis=(1, 2), keepdims=True)                   # (B,1,1,MV)
    n1 = norm(r1)

    g1 = equi(p['wg1'], n1)
    g2 = equi(p['wg2'], n1)
    gp = jnp.einsum('...i,ijk,...j->...k', g1, cayley, g2) * 1e-5
    j1 = equi(p['wj1'], n1)
    j2 = equi(p['wj2'], n1)
    jn = ref[..., 15:16] * jnp.einsum('...i,ijk,...j->...k', j1, join_t, j2)
    bl = jnp.concatenate([gp, jn], axis=-2)

    gated = jnp.maximum(bl[..., 0:1], 0.0) * bl
    proj = equi(p['wgelu'], gated)
    r2 = proj + r1
    return equi(p['wfinal'], r2)


# ----------------------------------------------------------------------------
# Main
# ----------------------------------------------------------------------------
if __name__ == "__main__":
    key = jax.random.PRNGKey(0)
    ks = jax.random.split(key, 12)
    unif = lambda kk, shape: jax.random.uniform(kk, shape, jnp.float32)

    params = dict(
        w_enter=unif(ks[0], (H, CIN, BLADE_LEN)),
        wq=unif(ks[1], (H * NH, H, BLADE_LEN)),
        wk=unif(ks[2], (H, H, BLADE_LEN)),
        wv=unif(ks[3], (H, H, BLADE_LEN)),
        wo=unif(ks[4], (H, H * NH, BLADE_LEN)),
        wg1=unif(ks[5], (CH, H, BLADE_LEN)),
        wg2=unif(ks[6], (CH, H, BLADE_LEN)),
        wj1=unif(ks[7], (CH, H, BLADE_LEN)),
        wj2=unif(ks[8], (CH, H, BLADE_LEN)),
        wgelu=unif(ks[9], (H, H, BLADE_LEN)),
        wfinal=unif(ks[10], (OUT_CH, H, BLADE_LEN)),
    )
    x = jax.random.normal(ks[11], (B, ITEMS, CIN, MV), jnp.float32)

    bf16 = jnp.bfloat16

    # q/k: fold the per-head selection, the attention SCALE, and the k IP
    # selection into one lane-dense (H*16, (NH+1)*QW) weight slab.
    wq_full = equi_w2(params['wq'])                               # (H*16, NH*H*16)
    sq = jnp.asarray(make_q_select(H, NH))                        # (NH, NH*H*16, QW)
    wq_heads = jnp.einsum('ij,hjk->hik', wq_full, sq) * SCALE     # (NH, H*16, QW)
    wk_sel = jnp.dot(equi_w2(params['wk']),
                     jnp.asarray(make_k_select(H)))               # (H*16, QW)
    wqk = jnp.concatenate([wq_heads[h] for h in range(NH)] + [wk_sel],
                          axis=-1).astype(bf16)                   # (H*16, 192)

    # bilinear projections fused into one lane-dense (H*16, 4*HL) weight.
    wgj = jnp.concatenate([equi_w2(params['wg1']), equi_w2(params['wg2']),
                           equi_w2(params['wj1']), equi_w2(params['wj2'])],
                          axis=-1).astype(bf16)                   # (H*16, 256)

    # masks / per-batch helper matrices (f32, flattened lane layout)
    mask_h = np.zeros((1, H * MV), np.float32)
    for c in range(H):
        for comp in IP_IDX:
            mask_h[0, c * MV + comp] = 1.0
    mask15 = np.zeros((1, CIN * MV), np.float32)
    for c in range(CIN):
        mask15[0, c * MV + 15] = 1.0
    attn_bias = np.full((R, R), -1e30, np.float32)     # block-diagonal attention
    batch_avg = np.zeros((R, R), np.float32)           # per-batch mean operator
    for bi in range(B):
        s0 = bi * ITEMS
        attn_bias[s0:s0 + ITEMS, s0:s0 + ITEMS] = 0.0
        batch_avg[s0:s0 + ITEMS, s0:s0 + ITEMS] = 1.0 / (ITEMS * CIN)

    consts = [
        equi_w2(params['w_enter']).astype(bf16),           # we   (CIN*16, H*16)
        wqk,                                               # wqk  (H*16, 192)
        equi_w2(params['wv']).astype(bf16),                # wv   (H*16, H*16)
        equi_w2(params['wo']).astype(bf16),                # wo   (NH*H*16, H*16)
        wgj,                                               # wgj  (H*16, 4*HL)
        jnp.asarray(make_estack(CH)).astype(bf16),         # E stack  (HL, 16*HL)
        jnp.asarray(make_mstack(CAYLEY * 1e-5, CH)).astype(bf16),  # Mgp (1e-5 folded)
        jnp.asarray(make_mstack(JOIN, CH)).astype(bf16),   # Mjn stack
        jnp.asarray(make_ssum(CH)).astype(bf16),           # S sum (16*HL, HL) bf16
        equi_w2(params['wgelu']).astype(bf16),             # wge  (H*16, H*16)
        jnp.asarray(mask_h),                               # (1, H*16) f32
        jnp.asarray(mask15),                               # (1, CIN*16) f32
        jnp.asarray(attn_bias),                            # (R, R) f32
        jnp.asarray(batch_avg),                            # (R, R) f32
        equi_w2(params['wfinal']).astype(bf16),            # wfin (H*16, OUT_CH*16)
    ]

    out_kernel = jax.block_until_ready(gatr_forward_pallas(x, consts))
    out_ref = jax.block_until_ready(ref_forward(x, params))

    rel_err = float(jnp.max(jnp.abs(out_kernel - out_ref))
                    / (jnp.max(jnp.abs(out_ref)) + 1e-6))
    assert out_kernel.shape == (B, ITEMS, OUT_CH, MV), out_kernel.shape
    # tolerance accounts for bf16 weights / matmul operands (f32 accumulation)
    assert rel_err < 3e-2, f"kernel/reference mismatch: rel_err={rel_err}"

    print("KERNEL_OK")
</pallas_src>

<mosaic_0001>
module attributes {stable_mosaic.version = 11 : i64} {
  func.func @gatr_kernel(%arg0: i32, %arg1: memref<32x64xf32, #tpu.memory_space<vmem>>, %arg2: memref<64x128xbf16, #tpu.memory_space<vmem>>, %arg3: memref<128x192xbf16, #tpu.memory_space<vmem>>, %arg4: memref<128x128xbf16, #tpu.memory_space<vmem>>, %arg5: memref<256x128xbf16, #tpu.memory_space<vmem>>, %arg6: memref<128x256xbf16, #tpu.memory_space<vmem>>, %arg7: memref<64x1024xbf16, #tpu.memory_space<vmem>>, %arg8: memref<64x1024xbf16, #tpu.memory_space<vmem>>, %arg9: memref<64x1024xbf16, #tpu.memory_space<vmem>>, %arg10: memref<1024x64xbf16, #tpu.memory_space<vmem>>, %arg11: memref<128x128xbf16, #tpu.memory_space<vmem>>, %arg12: memref<1x128xf32, #tpu.memory_space<vmem>>, %arg13: memref<1x64xf32, #tpu.memory_space<vmem>>, %arg14: memref<32x32xf32, #tpu.memory_space<vmem>>, %arg15: memref<32x32xf32, #tpu.memory_space<vmem>>, %arg16: memref<128x2048xbf16, #tpu.memory_space<vmem>>, %arg17: memref<32x2048xf32, #tpu.memory_space<vmem>>) attributes {dimension_semantics = [#tpu.dimension_semantics<parallel>], iteration_bounds = array<i64: 2>, scalar_prefetch = 0 : i64, scratch_operands = 0 : i64, tpu.core_type = #tpu.core_type<tc>, window_params = [{pipeline_mode = #tpu.pipeline_mode<synchronous>, transform_indices = @transform_0, window_bounds = array<i64: 32, 64>}, {pipeline_mode = #tpu.pipeline_mode<synchronous>, transform_indices = @transform_1, window_bounds = array<i64: 64, 128>}, {pipeline_mode = #tpu.pipeline_mode<synchronous>, transform_indices = @transform_2, window_bounds = array<i64: 128, 192>}, {pipeline_mode = #tpu.pipeline_mode<synchronous>, transform_indices = @transform_3, window_bounds = array<i64: 128, 128>}, {pipeline_mode = #tpu.pipeline_mode<synchronous>, transform_indices = @transform_4, window_bounds = array<i64: 256, 128>}, {pipeline_mode = #tpu.pipeline_mode<synchronous>, transform_indices = @transform_5, window_bounds = array<i64: 128, 256>}, {pipeline_mode = #tpu.pipeline_mode<synchronous>, transform_indices = @transform_6, window_bounds = array<i64: 64, 1024>}, {pipeline_mode = #tpu.pipeline_mode<synchronous>, transform_indices = @transform_7, window_bounds = array<i64: 64, 1024>}, {pipeline_mode = #tpu.pipeline_mode<synchronous>, transform_indices = @transform_8, window_bounds = array<i64: 64, 1024>}, {pipeline_mode = #tpu.pipeline_mode<synchronous>, transform_indices = @transform_9, window_bounds = array<i64: 1024, 64>}, {pipeline_mode = #tpu.pipeline_mode<synchronous>, transform_indices = @transform_10, window_bounds = array<i64: 128, 128>}, {pipeline_mode = #tpu.pipeline_mode<synchronous>, transform_indices = @transform_11, window_bounds = array<i64: 1, 128>}, {pipeline_mode = #tpu.pipeline_mode<synchronous>, transform_indices = @transform_12, window_bounds = array<i64: 1, 64>}, {pipeline_mode = #tpu.pipeline_mode<synchronous>, transform_indices = @transform_13, window_bounds = array<i64: 32, 32>}, {pipeline_mode = #tpu.pipeline_mode<synchronous>, transform_indices = @transform_14, window_bounds = array<i64: 32, 32>}, {transform_indices = @transform_15, window_bounds = array<i64: 128, 2048>}, {transform_indices = @transform_16, window_bounds = array<i64: 32, 2048>}]} {
    %c0 = arith.constant 0 : index
    %c0_0 = arith.constant 0 : index
    %0 = vector.load %arg1[%c0, %c0_0] : memref<32x64xf32, #tpu.memory_space<vmem>>, vector<32x64xf32>
    %c0_1 = arith.constant 0 : index
    %c0_2 = arith.constant 0 : index
    %1 = vector.load %arg12[%c0_1, %c0_2] : memref<1x128xf32, #tpu.memory_space<vmem>>, vector<1x128xf32>
    %2 = arith.truncf %0 : vector<32x64xf32> to vector<32x64xbf16>
    %c0_3 = arith.constant 0 : index
    %c0_4 = arith.constant 0 : index
    %3 = vector.load %arg2[%c0_3, %c0_4] : memref<64x128xbf16, #tpu.memory_space<vmem>>, vector<64x128xbf16>
    %cst = arith.constant dense<0.000000e+00> : vector<32x128xf32>
    %4 = tpu.matmul %2, %3, %cst {dimension_numbers = #tpu.dot_dimension_numbers<[1], [0], [0], [1], [0, 0, 1, 1], [], []>} : vector<32x64xbf16>, vector<64x128xbf16>, vector<32x128xf32> -> vector<32x128xf32>
    %5 = arith.mulf %4, %4 : vector<32x128xf32>
    %6 = vector.broadcast %1 : vector<1x128xf32> to vector<32x128xf32>
    %7 = arith.mulf %5, %6 : vector<32x128xf32>
    %cst_5 = arith.constant dense<0.000000e+00> : vector<32xf32>
    %8 = vector.multi_reduction <add>, %7, %cst_5 [1] : vector<32x128xf32> to vector<32xf32>
    %9 = vector.shape_cast %8 : vector<32xf32> to vector<32x1xf32>
    %cst_6 = arith.constant 1.250000e-01 : f32
    %10 = vector.broadcast %cst_6 : f32 to vector<32x1xf32>
    %11 = arith.mulf %9, %10 : vector<32x1xf32>
    %12 = math.rsqrt %11 : vector<32x1xf32>
    %13 = vector.broadcast %12 : vector<32x1xf32> to vector<32x128xf32>
    %14 = arith.mulf %4, %13 : vector<32x128xf32>
    %15 = arith.truncf %14 : vector<32x128xf32> to vector<32x128xbf16>
    %c0_7 = arith.constant 0 : index
    %c0_8 = arith.constant 0 : index
    %16 = vector.load %arg3[%c0_7, %c0_8] : memref<128x192xbf16, #tpu.memory_space<vmem>>, vector<128x192xbf16>
    %cst_9 = arith.constant dense<0.000000e+00> : vector<32x192xf32>
    %17 = tpu.matmul %15, %16, %cst_9 {dimension_numbers = #tpu.dot_dimension_numbers<[1], [0], [0], [1], [0, 0, 1, 1], [], []>} : vector<32x128xbf16>, vector<128x192xbf16>, vector<32x192xf32> -> vector<32x192xf32>
    %c0_10 = arith.constant 0 : index
    %c0_11 = arith.constant 0 : index
    %18 = vector.load %arg4[%c0_10, %c0_11] : memref<128x128xbf16, #tpu.memory_space<vmem>>, vector<128x128xbf16>
    %cst_12 = arith.constant dense<0.000000e+00> : vector<32x128xf32>
    %19 = tpu.matmul %15, %18, %cst_12 {dimension_numbers = #tpu.dot_dimension_numbers<[1], [0], [0], [1], [0, 0, 1, 1], [], []>} : vector<32x128xbf16>, vector<128x128xbf16>, vector<32x128xf32> -> vector<32x128xf32>
    %20 = vector.extract_strided_slice %17 {offsets = [0, 128], sizes = [32, 64], strides = [1, 1]} : vector<32x192xf32> to vector<32x64xf32>
    %21 = arith.truncf %20 : vector<32x64xf32> to vector<32x64xbf16>
    %22 = arith.truncf %19 : vector<32x128xf32> to vector<32x128xbf16>
    %c0_13 = arith.constant 0 : index
    %c0_14 = arith.constant 0 : index
    %23 = vector.load %arg14[%c0_13, %c0_14] : memref<32x32xf32, #tpu.memory_space<vmem>>, vector<32x32xf32>
    %24 = vector.extract_strided_slice %17 {offsets = [0, 0], sizes = [32, 64], strides = [1, 1]} : vector<32x192xf32> to vector<32x64xf32>
    %25 = arith.truncf %24 : vector<32x64xf32> to vector<32x64xbf16>
    %cst_15 = arith.constant dense<0.000000e+00> : vector<32x32xf32>
    %26 = tpu.matmul %25, %21, %cst_15 {dimension_numbers = #tpu.dot_dimension_numbers<[1], [1], [0], [0], [0, 0, 1, 0], [], []>} : vector<32x64xbf16>, vector<32x64xbf16>, vector<32x32xf32> -> vector<32x32xf32>
    %27 = arith.addf %26, %23 : vector<32x32xf32>
    %cst_16 = arith.constant dense<0xFF800000> : vector<32xf32>
    %28 = vector.multi_reduction <maximumf>, %27, %cst_16 [1] : vector<32x32xf32> to vector<32xf32>
    %29 = vector.shape_cast %28 : vector<32xf32> to vector<32x1xf32>
    %30 = vector.broadcast %29 : vector<32x1xf32> to vector<32x32xf32>
    %31 = arith.subf %27, %30 : vector<32x32xf32>
    %32 = math.exp %31 : vector<32x32xf32>
    %cst_17 = arith.constant dense<0.000000e+00> : vector<32xf32>
    %33 = vector.multi_reduction <add>, %32, %cst_17 [1] : vector<32x32xf32> to vector<32xf32>
    %34 = vector.shape_cast %33 : vector<32xf32> to vector<32x1xf32>
    %35 = tpu.reciprocal %34 {approx = true} : vector<32x1xf32> -> vector<32x1xf32>
    %36 = vector.broadcast %35 : vector<32x1xf32> to vector<32x32xf32>
    %37 = arith.mulf %32, %36 : vector<32x32xf32>
    %38 = arith.truncf %37 : vector<32x32xf32> to vector<32x32xbf16>
    %cst_18 = arith.constant dense<0.000000e+00> : vector<32x128xf32>
    %39 = tpu.matmul %38, %22, %cst_18 {dimension_numbers = #tpu.dot_dimension_numbers<[1], [0], [0], [1], [0, 0, 1, 1], [], []>} : vector<32x32xbf16>, vector<32x128xbf16>, vector<32x128xf32> -> vector<32x128xf32>
    %40 = vector.extract_strided_slice %17 {offsets = [0, 64], sizes = [32, 64], strides = [1, 1]} : vector<32x192xf32> to vector<32x64xf32>
    %41 = arith.truncf %40 : vector<32x64xf32> to vector<32x64xbf16>
    %cst_19 = arith.constant dense<0.000000e+00> : vector<32x32xf32>
    %42 = tpu.matmul %41, %21, %cst_19 {dimension_numbers = #tpu.dot_dimension_numbers<[1], [1], [0], [0], [0, 0, 1, 0], [], []>} : vector<32x64xbf16>, vector<32x64xbf16>, vector<32x32xf32> -> vector<32x32xf32>
    %43 = arith.addf %42, %23 : vector<32x32xf32>
    %cst_20 = arith.constant dense<0xFF800000> : vector<32xf32>
    %44 = vector.multi_reduction <maximumf>, %43, %cst_20 [1] : vector<32x32xf32> to vector<32xf32>
    %45 = vector.shape_cast %44 : vector<32xf32> to vector<32x1xf32>
    %46 = vector.broadcast %45 : vector<32x1xf32> to vector<32x32xf32>
    %47 = arith.subf %43, %46 : vector<32x32xf32>
    %48 = math.exp %47 : vector<32x32xf32>
    %cst_21 = arith.constant dense<0.000000e+00> : vector<32xf32>
    %49 = vector.multi_reduction <add>, %48, %cst_21 [1] : vector<32x32xf32> to vector<32xf32>
    %50 = vector.shape_cast %49 : vector<32xf32> to vector<32x1xf32>
    %51 = tpu.reciprocal %50 {approx = true} : vector<32x1xf32> -> vector<32x1xf32>
    %52 = vector.broadcast %51 : vector<32x1xf32> to vector<32x32xf32>
    %53 = arith.mulf %48, %52 : vector<32x32xf32>
    %54 = arith.truncf %53 : vector<32x32xf32> to vector<32x32xbf16>
    %cst_22 = arith.constant dense<0.000000e+00> : vector<32x128xf32>
    %55 = tpu.matmul %54, %22, %cst_22 {dimension_numbers = #tpu.dot_dimension_numbers<[1], [0], [0], [1], [0, 0, 1, 1], [], []>} : vector<32x32xbf16>, vector<32x128xbf16>, vector<32x128xf32> -> vector<32x128xf32>
    %56 = tpu.concatenate %39, %55 in 1 : vector<32x128xf32>, vector<32x128xf32> -> vector<32x256xf32>
    %57 = arith.truncf %56 : vector<32x256xf32> to vector<32x256xbf16>
    %c0_23 = arith.constant 0 : index
    %c0_24 = arith.constant 0 : index
    %58 = vector.load %arg5[%c0_23, %c0_24] : memref<256x128xbf16, #tpu.memory_space<vmem>>, vector<256x128xbf16>
    %cst_25 = arith.constant dense<0.000000e+00> : vector<32x128xf32>
    %59 = tpu.matmul %57, %58, %cst_25 {dimension_numbers = #tpu.dot_dimension_numbers<[1], [0], [0], [1], [0, 0, 1, 1], [], []>} : vector<32x256xbf16>, vector<256x128xbf16>, vector<32x128xf32> -> vector<32x128xf32>
    %60 = arith.addf %59, %4 : vector<32x128xf32>
    %61 = arith.mulf %60, %60 : vector<32x128xf32>
    %62 = vector.broadcast %1 : vector<1x128xf32> to vector<32x128xf32>
    %63 = arith.mulf %61, %62 : vector<32x128xf32>
    %cst_26 = arith.constant dense<0.000000e+00> : vector<32xf32>
    %64 = vector.multi_reduction <add>, %63, %cst_26 [1] : vector<32x128xf32> to vector<32xf32>
    %65 = vector.shape_cast %64 : vector<32xf32> to vector<32x1xf32>
    %cst_27 = arith.constant 1.250000e-01 : f32
    %66 = vector.broadcast %cst_27 : f32 to vector<32x1xf32>
    %67 = arith.mulf %65, %66 : vector<32x1xf32>
    %68 = math.rsqrt %67 : vector<32x1xf32>
    %69 = vector.broadcast %68 : vector<32x1xf32> to vector<32x128xf32>
    %70 = arith.mulf %60, %69 : vector<32x128xf32>
    %71 = arith.truncf %70 : vector<32x128xf32> to vector<32x128xbf16>
    %c0_28 = arith.constant 0 : index
    %c0_29 = arith.constant 0 : index
    %72 = vector.load %arg6[%c0_28, %c0_29] : memref<128x256xbf16, #tpu.memory_space<vmem>>, vector<128x256xbf16>
    %cst_30 = arith.constant dense<0.000000e+00> : vector<32x256xf32>
    %73 = tpu.matmul %71, %72, %cst_30 {dimension_numbers = #tpu.dot_dimension_numbers<[1], [0], [0], [1], [0, 0, 1, 1], [], []>} : vector<32x128xbf16>, vector<128x256xbf16>, vector<32x256xf32> -> vector<32x256xf32>
    %74 = vector.extract_strided_slice %73 {offsets = [0, 0], sizes = [32, 64], strides = [1, 1]} : vector<32x256xf32> to vector<32x64xf32>
    %75 = vector.extract_strided_slice %73 {offsets = [0, 64], sizes = [32, 64], strides = [1, 1]} : vector<32x256xf32> to vector<32x64xf32>
    %76 = vector.extract_strided_slice %73 {offsets = [0, 128], sizes = [32, 64], strides = [1, 1]} : vector<32x256xf32> to vector<32x64xf32>
    %77 = vector.extract_strided_slice %73 {offsets = [0, 192], sizes = [32, 64], strides = [1, 1]} : vector<32x256xf32> to vector<32x64xf32>
    %c0_31 = arith.constant 0 : index
    %c0_32 = arith.constant 0 : index
    %78 = vector.load %arg7[%c0_31, %c0_32] : memref<64x1024xbf16, #tpu.memory_space<vmem>>, vector<64x1024xbf16>
    %79 = tpu.concatenate %74, %76 in 0 : vector<32x64xf32>, vector<32x64xf32> -> vector<64x64xf32>
    %80 = arith.truncf %79 : vector<64x64xf32> to vector<64x64xbf16>
    %cst_33 = arith.constant dense<0.000000e+00> : vector<64x1024xf32>
    %81 = tpu.matmul %80, %78, %cst_33 {dimension_numbers = #tpu.dot_dimension_numbers<[1], [0], [0], [1], [0, 0, 1, 1], [], []>} : vector<64x64xbf16>, vector<64x1024xbf16>, vector<64x1024xf32> -> vector<64x1024xf32>
    %82 = arith.truncf %75 : vector<32x64xf32> to vector<32x64xbf16>
    %c0_34 = arith.constant 0 : index
    %c0_35 = arith.constant 0 : index
    %83 = vector.load %arg8[%c0_34, %c0_35] : memref<64x1024xbf16, #tpu.memory_space<vmem>>, vector<64x1024xbf16>
    %cst_36 = arith.constant dense<0.000000e+00> : vector<32x1024xf32>
    %84 = tpu.matmul %82, %83, %cst_36 {dimension_numbers = #tpu.dot_dimension_numbers<[1], [0], [0], [1], [0, 0, 1, 1], [], []>} : vector<32x64xbf16>, vector<64x1024xbf16>, vector<32x1024xf32> -> vector<32x1024xf32>
    %85 = arith.truncf %77 : vector<32x64xf32> to vector<32x64xbf16>
    %c0_37 = arith.constant 0 : index
    %c0_38 = arith.constant 0 : index
    %86 = vector.load %arg9[%c0_37, %c0_38] : memref<64x1024xbf16, #tpu.memory_space<vmem>>, vector<64x1024xbf16>
    %cst_39 = arith.constant dense<0.000000e+00> : vector<32x1024xf32>
    %87 = tpu.matmul %85, %86, %cst_39 {dimension_numbers = #tpu.dot_dimension_numbers<[1], [0], [0], [1], [0, 0, 1, 1], [], []>} : vector<32x64xbf16>, vector<64x1024xbf16>, vector<32x1024xf32> -> vector<32x1024xf32>
    %88 = tpu.concatenate %84, %87 in 0 : vector<32x1024xf32>, vector<32x1024xf32> -> vector<64x1024xf32>
    %89 = arith.mulf %81, %88 : vector<64x1024xf32>
    %90 = arith.truncf %89 : vector<64x1024xf32> to vector<64x1024xbf16>
    %c0_40 = arith.constant 0 : index
    %c0_41 = arith.constant 0 : index
    %91 = vector.load %arg10[%c0_40, %c0_41] : memref<1024x64xbf16, #tpu.memory_space<vmem>>, vector<1024x64xbf16>
    %cst_42 = arith.constant dense<0.000000e+00> : vector<64x64xf32>
    %92 = tpu.matmul %90, %91, %cst_42 {dimension_numbers = #tpu.dot_dimension_numbers<[1], [0], [0], [1], [0, 0, 1, 1], [], []>} : vector<64x1024xbf16>, vector<1024x64xbf16>, vector<64x64xf32> -> vector<64x64xf32>
    %c0_43 = arith.constant 0 : index
    %c0_44 = arith.constant 0 : index
    %93 = vector.load %arg13[%c0_43, %c0_44] : memref<1x64xf32, #tpu.memory_space<vmem>>, vector<1x64xf32>
    %94 = vector.broadcast %93 : vector<1x64xf32> to vector<32x64xf32>
    %95 = arith.mulf %0, %94 : vector<32x64xf32>
    %cst_45 = arith.constant dense<0.000000e+00> : vector<32xf32>
    %96 = vector.multi_reduction <add>, %95, %cst_45 [1] : vector<32x64xf32> to vector<32xf32>
    %97 = vector.shape_cast %96 : vector<32xf32> to vector<32x1xf32>
    %c0_46 = arith.constant 0 : index
    %c0_47 = arith.constant 0 : index
    %98 = vector.load %arg15[%c0_46, %c0_47] : memref<32x32xf32, #tpu.memory_space<vmem>>, vector<32x32xf32>
    %cst_48 = arith.constant dense<0.000000e+00> : vector<32x1xf32>
    %99 = tpu.matmul %98, %97, %cst_48 {dimension_numbers = #tpu.dot_dimension_numbers<[1], [0], [0], [1], [0, 0, 1, 1], [], []>} : vector<32x32xf32>, vector<32x1xf32>, vector<32x1xf32> -> vector<32x1xf32>
    %cst_49 = arith.constant 1.000000e+00 : f32
    %100 = vector.broadcast %cst_49 : f32 to vector<32x1xf32>
    %101 = tpu.concatenate %100, %99 in 0 : vector<32x1xf32>, vector<32x1xf32> -> vector<64x1xf32>
    %102 = vector.broadcast %101 : vector<64x1xf32> to vector<64x64xf32>
    %103 = arith.mulf %92, %102 : vector<64x64xf32>
    %104 = vector.extract_strided_slice %78 {offsets = [0, 0], sizes = [64, 64], strides = [1, 1]} : vector<64x1024xbf16> to vector<64x64xbf16>
    %105 = arith.truncf %103 : vector<64x64xf32> to vector<64x64xbf16>
    %cst_50 = arith.constant dense<0.000000e+00> : vector<64x64xf32>
    %106 = tpu.matmul %105, %104, %cst_50 {dimension_numbers = #tpu.dot_dimension_numbers<[1], [0], [0], [1], [0, 0, 1, 1], [], []>} : vector<64x64xbf16>, vector<64x64xbf16>, vector<64x64xf32> -> vector<64x64xf32>
    %cst_51 = arith.constant 0.000000e+00 : f32
    %107 = vector.broadcast %cst_51 : f32 to vector<64x64xf32>
    %108 = arith.maximumf %106, %107 : vector<64x64xf32>
    %109 = arith.mulf %108, %103 : vector<64x64xf32>
    %110 = vector.extract_strided_slice %109 {offsets = [0, 0], sizes = [32, 64], strides = [1, 1]} : vector<64x64xf32> to vector<32x64xf32>
    %111 = vector.extract_strided_slice %109 {offsets = [32, 0], sizes = [32, 64], strides = [1, 1]} : vector<64x64xf32> to vector<32x64xf32>
    %112 = tpu.concatenate %110, %111 in 1 : vector<32x64xf32>, vector<32x64xf32> -> vector<32x128xf32>
    %113 = arith.truncf %112 : vector<32x128xf32> to vector<32x128xbf16>
    %c0_52 = arith.constant 0 : index
    %c0_53 = arith.constant 0 : index
    %114 = vector.load %arg11[%c0_52, %c0_53] : memref<128x128xbf16, #tpu.memory_space<vmem>>, vector<128x128xbf16>
    %cst_54 = arith.constant dense<0.000000e+00> : vector<32x128xf32>
    %115 = tpu.matmul %113, %114, %cst_54 {dimension_numbers = #tpu.dot_dimension_numbers<[1], [0], [0], [1], [0, 0, 1, 1], [], []>} : vector<32x128xbf16>, vector<128x128xbf16>, vector<32x128xf32> -> vector<32x128xf32>
    %116 = arith.addf %115, %60 : vector<32x128xf32>
    %117 = arith.truncf %116 : vector<32x128xf32> to vector<32x128xbf16>
    %c0_55 = arith.constant 0 : index
    %c0_56 = arith.constant 0 : index
    %118 = vector.load %arg16[%c0_55, %c0_56] : memref<128x2048xbf16, #tpu.memory_space<vmem>>, vector<128x2048xbf16>
    %cst_57 = arith.constant dense<0.000000e+00> : vector<32x2048xf32>
    %119 = tpu.matmul %117, %118, %cst_57 {dimension_numbers = #tpu.dot_dimension_numbers<[1], [0], [0], [1], [0, 0, 1, 1], [], []>} : vector<32x128xbf16>, vector<128x2048xbf16>, vector<32x2048xf32> -> vector<32x2048xf32>
    %c0_58 = arith.constant 0 : index
    %c0_59 = arith.constant 0 : index
    %120 = vector.load %arg17[%c0_58, %c0_59] : memref<32x2048xf32, #tpu.memory_space<vmem>>, vector<32x2048xf32>
    tpu.vector_store %arg17[%c0_58, %c0_59], %119 {strides = array<i32>} : memref<32x2048xf32, #tpu.memory_space<vmem>>, vector<32x2048xf32>,
    return
  }
  func.func @transform_0(%arg0: i32) -> (i32, i32) {
    %c0_i32 = arith.constant 0 : i32
    %c0_i32_0 = arith.constant 0 : i32
    %c0_i32_1 = arith.constant 0 : i32
    return %c0_i32, %c0_i32_0 : i32, i32
  }
  func.func @transform_1(%arg0: i32) -> (i32, i32) {
    %c0_i32 = arith.constant 0 : i32
    %c0_i32_0 = arith.constant 0 : i32
    %c0_i32_1 = arith.constant 0 : i32
    return %c0_i32, %c0_i32_0 : i32, i32
  }
  func.func @transform_2(%arg0: i32) -> (i32, i32) {
    %c0_i32 = arith.constant 0 : i32
    %c0_i32_0 = arith.constant 0 : i32
    %c0_i32_1 = arith.constant 0 : i32
    return %c0_i32, %c0_i32_0 : i32, i32
  }
  func.func @transform_3(%arg0: i32) -> (i32, i32) {
    %c0_i32 = arith.constant 0 : i32
    %c0_i32_0 = arith.constant 0 : i32
    %c0_i32_1 = arith.constant 0 : i32
    return %c0_i32, %c0_i32_0 : i32, i32
  }
  func.func @transform_4(%arg0: i32) -> (i32, i32) {
    %c0_i32 = arith.constant 0 : i32
    %c0_i32_0 = arith.constant 0 : i32
    %c0_i32_1 = arith.constant 0 : i32
    return %c0_i32, %c0_i32_0 : i32, i32
  }
  func.func @transform_5(%arg0: i32) -> (i32, i32) {
    %c0_i32 = arith.constant 0 : i32
    %c0_i32_0 = arith.constant 0 : i32
    %c0_i32_1 = arith.constant 0 : i32
    return %c0_i32, %c0_i32_0 : i32, i32
  }
  func.func @transform_6(%arg0: i32) -> (i32, i32) {
    %c0_i32 = arith.constant 0 : i32
    %c0_i32_0 = arith.constant 0 : i32
    %c0_i32_1 = arith.constant 0 : i32
    return %c0_i32, %c0_i32_0 : i32, i32
  }
  func.func @transform_7(%arg0: i32) -> (i32, i32) {
    %c0_i32 = arith.constant 0 : i32
    %c0_i32_0 = arith.constant 0 : i32
    %c0_i32_1 = arith.constant 0 : i32
    return %c0_i32, %c0_i32_0 : i32, i32
  }
  func.func @transform_8(%arg0: i32) -> (i32, i32) {
    %c0_i32 = arith.constant 0 : i32
    %c0_i32_0 = arith.constant 0 : i32
    %c0_i32_1 = arith.constant 0 : i32
    return %c0_i32, %c0_i32_0 : i32, i32
  }
  func.func @transform_9(%arg0: i32) -> (i32, i32) {
    %c0_i32 = arith.constant 0 : i32
    %c0_i32_0 = arith.constant 0 : i32
    %c0_i32_1 = arith.constant 0 : i32
    return %c0_i32, %c0_i32_0 : i32, i32
  }
  func.func @transform_10(%arg0: i32) -> (i32, i32) {
    %c0_i32 = arith.constant 0 : i32
    %c0_i32_0 = arith.constant 0 : i32
    %c0_i32_1 = arith.constant 0 : i32
    return %c0_i32, %c0_i32_0 : i32, i32
  }
  func.func @transform_11(%arg0: i32) -> (i32, i32) {
    %c0_i32 = arith.constant 0 : i32
    %c0_i32_0 = arith.constant 0 : i32
    %c0_i32_1 = arith.constant 0 : i32
    return %c0_i32, %c0_i32_0 : i32, i32
  }
  func.func @transform_12(%arg0: i32) -> (i32, i32) {
    %c0_i32 = arith.constant 0 : i32
    %c0_i32_0 = arith.constant 0 : i32
    %c0_i32_1 = arith.constant 0 : i32
    return %c0_i32, %c0_i32_0 : i32, i32
  }
  func.func @transform_13(%arg0: i32) -> (i32, i32) {
    %c0_i32 = arith.constant 0 : i32
    %c0_i32_0 = arith.constant 0 : i32
    %c0_i32_1 = arith.constant 0 : i32
    return %c0_i32, %c0_i32_0 : i32, i32
  }
  func.func @transform_14(%arg0: i32) -> (i32, i32) {
    %c0_i32 = arith.constant 0 : i32
    %c0_i32_0 = arith.constant 0 : i32
    %c0_i32_1 = arith.constant 0 : i32
    return %c0_i32, %c0_i32_0 : i32, i32
  }
  func.func @transform_15(%arg0: i32) -> (i32, i32) {
    %c0_i32 = arith.constant 0 : i32
    %c0_i32_0 = arith.constant 0 : i32
    return %c0_i32, %arg0 : i32, i32
  }
  func.func @transform_16(%arg0: i32) -> (i32, i32) {
    %c0_i32 = arith.constant 0 : i32
    %c0_i32_0 = arith.constant 0 : i32
    return %c0_i32, %arg0 : i32, i32
  }
}

</mosaic_0001>

<bundles_post_ra>
// kernel: tpu_custom_call.1
= control target key start
LH: loop header
LB: loop body
LE: loop exit
PB: predicated region body
PF: predicated region fallthrough
CT: control target
= control target key end

     0   :  { %s9121_s0 = inlined_call_operand.hbm [shape: f32[32,64], index: 0, kind: input, shape index: {}]   ;;  %s9122_s1 = inlined_call_operand.hbm [shape: bf16[64,128], index: 1, kind: input, shape index: {}]   ;;  %s9123_s2 = inlined_call_operand.vmem [shape: bf16[128,192], index: 2, kind: input, shape index: {}]   ;;  %s9124_s3 = inlined_call_operand.hbm [shape: bf16[128,128], index: 3, kind: input, shape index: {}]   ;;  %s9125_s4 = inlined_call_operand.hbm [shape: bf16[256,128], index: 4, kind: input, shape index: {}]   ;;  %s9126_s5 = inlined_call_operand.hbm [shape: bf16[128,256], index: 5, kind: input, shape index: {}]   ;;  %s9127_s6 = inlined_call_operand.vmem [shape: bf16[64,1024], index: 6, kind: input, shape index: {}]   ;;  %s9128_s7 = inlined_call_operand.vmem [shape: bf16[64,1024], index: 7, kind: input, shape index: {}]   ;;  %s9129_s8 = inlined_call_operand.vmem [shape: bf16[64,1024], index: 8, kind: input, shape index: {}]   ;;  %s9130_s9 = inlined_call_operand.vmem [shape: bf16[1024,64], index: 9, kind: input, shape index: {}]   ;;  %s9131_s10 = inlined_call_operand.hbm [shape: bf16[128,128], index: 10, kind: input, shape index: {}]   ;;  %s9132_s11 = inlined_call_operand.vmem [shape: f32[1,128], index: 11, kind: input, shape index: {}]   ;;  %s9133_s12 = inlined_call_operand.vmem [shape: f32[1,64], index: 12, kind: input, shape index: {}]   ;;  %s9134_s13 = inlined_call_operand.hbm [shape: f32[32,32], index: 13, kind: input, shape index: {}]   ;;  %s9135_s14 = inlined_call_operand.hbm [shape: f32[32,32], index: 14, kind: input, shape index: {}]   ;;  %s9136_s15 = inlined_call_operand.hbm [shape: bf16[128,4096], index: 15, kind: input, shape index: {}]   ;;  %s9137_s16 = inlined_call_operand.hbm [shape: f32[32,4096], index: 16, kind: output, shape index: {}]  }
   0x1   :  { %9167 = sst [smem:[#allocation49_spill]] %s9121_s0 }
   0x2   :  { %9168 = sst [smem:[#allocation50_spill]] %s9122_s1 }
   0x3   :  { %9169 = sst [smem:[#allocation51_spill]] %s9123_s2 }
   0x4   :  { %9170 = sst [smem:[#allocation52_spill]] %s9124_s3 }
   0x5   :  { %9171 = sst [smem:[#allocation53_spill]] %s9125_s4 }
   0x6   :  { %9172 = sst [smem:[#allocation54_spill]] %s9126_s5 }
   0x7   :  { %9173 = sst [smem:[#allocation55_spill]] %s9127_s6 }
   0x8   :  { %9174 = sst [smem:[#allocation56_spill]] %s9128_s7 }
   0x9   :  { %9175 = sst [smem:[#allocation57_spill]] %s9129_s8 }
   0xa   :  { %9176 = sst [smem:[#allocation58_spill]] %s9130_s9 }
   0xb   :  { %9177 = sst [smem:[#allocation59_spill]] %s9132_s11 }
   0xc   :  { %9178 = sst [smem:[#allocation60_spill]] %s9133_s12 }
   0xd   :  { %9179 = sst [smem:[#allocation61_spill]] %s9137_s16 }
   0xe   :  { %21 = vsyncpa [#allocation3], 0 }
   0xf   :  { %22 = vsyncpa [#allocation6], 0 }
  0x10   :  { %23 = vsyncpa [#allocation9], 0 }
  0x11   :  { %24 = vsyncpa [#allocation12], 0 }
  0x12   :  { %25 = vsyncpa [#allocation15], 0 }
  0x13   :  { %26 = vsyncpa [#allocation4], 0 }
  0x14   :  { %28 = vsyncpa [#allocation4 + $0x1], 0  ;;  %s7365_s21 = smov 0   ;;  %s7367_s22 = smov 0  }
  0x15   :  { %s7369_s23 = smov 0   ;;  %s7371_s24 = smov 0  }
  0x16 LB: > { %s7259_s25 = smov [#allocation2]   ;;  %s7386_s27 = sadd.s32 4294967295, %s7257_s24   ;;  %s7257_s24 = sphi %s7371_s24, %s9271_s24   ;;  %s7253_s23 = sphi %s7369_s23, %s9270_s23   ;;  %s7249_s22 = sphi %s7367_s22, %s9269_s22   ;;  %s7245_s21 = sphi %s7365_s21, %s9268_s21  }
  0x17   : > { %s418_s26 = sshll.u32 %s7259_s25, 4  ;;  %p5756_p0 = scmp.ge.s32.totalorder %s7257_s24, 1  ;;  %s7391_s26 = int_to_ptr.vmem [resolvable:$true] %s418_s26 }
  0x18   : > { %p9147_p1 = scmp.eq.s32.totalorder %s7386_s27, 0  ;;  %p406_p2 = scmp.lt.s32.totalorder %s7257_s24, 3 }
  0x19   : > { %s7260_s29 = smov [#allocation5]   ;;  %s7261_s17 = smov [#allocation8]  }
  0x1a   : > { %p7393_p3 = pnand %p5756_p0, %p406_p2  ;;  %s431_s30 = sshll.u32 %s7260_s29, 4  ;;  %s7406_s30 = int_to_ptr.vmem [resolvable:$true] %s431_s30 }
  0x1b   : > { %s7408_s18 = sshll.u32 %s7261_s17, 4  ;;  %s9182_s25 = sld [smem:[#allocation49_spill]]  ;;  %s461_s18 = int_to_ptr.vmem [resolvable:$true] %s7408_s18 }
  0x1c   : > { %s9180_s28 = scalar_select %p7393_p3, 1, 0 }
  0x1d   : > { %p6603_p5 = pneg %p7393_p3 }
  0x1f   : > { %p7402_p6 = pnand %p6603_p5, %p9147_p1 }
  0x21   : > { %s6917_s16 = scalar_lea.hbm %s9182_s25, 512  ;;  %p7418_p8 = pneg %p7402_p6 }
  0x22   : > { %p6918_p7 = scmp.ne.s32.totalorder %s9182_s25, %s6917_s16  ;;  %p6924_p11 = scmp.lt.u32.totalorder %s6917_s16, %s9182_s25 }
  0x24   : > { %p6920_p9 = pnand %p7418_p8, %p6918_p7 }
  0x26   : > { %p6921_p10 = pneg %p6920_p9 }
  0x28   : > { %p6926_p12 = pnand %p6924_p11, %p6921_p10 }
  0x2a   : > { %6929 = shalt.err (!%p6926_p12)
}
  0x2b   : > { %s6930_s8 = scalar_lea.vmem %s7391_s26, 512  ;;  %p6938_p5 = scmp.lt.s32.totalorder %s7391_s26, %s7391_s26 }
  0x2c   : > { %p6931_p13 = scmp.ne.s32.totalorder %s7391_s26, %s6930_s8  ;;  %p6939_p4 = scmp.lt.s32.totalorder %s6930_s8, %s6930_s8 }
  0x2e   : > { %p6933_p0 = pnand %p6931_p13, %p7418_p8  ;;  %p6940_p7 = por %p6939_p4, %p6938_p5 }
  0x30   : > { %p6934_p2 = pneg %p6933_p0 }
  0x32   : > { %p6941_p9 = pnand %p6940_p7, %p6934_p2 }
  0x34   : > { %6944 = shalt.err (!%p6941_p9)
}
  0x35   : > { %s9145_s9 = smov 128   ;;  %s9149_s12 = smov 8  }
  0x36   : > { %6606 = dma.hbm_to_vmem [thread:$0]  (!%p7402_p6), %s9182_s25, 512, %s7391_s26, [#allocation3], %s9145_s9, %s9145_s9, %s9149_s12  }
  0x37   : > { %s9184_s1 = sld [smem:[#allocation50_spill]] }
  0x3d   : > { %s6945_s8 = scalar_lea.hbm %s9184_s1, 512 }
  0x3e   : > { %p6946_p4 = scmp.ne.s32.totalorder %s9184_s1, %s6945_s8  ;;  %p6952_p12 = scmp.lt.u32.totalorder %s6945_s8, %s9184_s1 }
  0x40   : > { %p6948_p10 = pnand %p6946_p4, %p7418_p8 }
  0x42   : > { %p6949_p11 = pneg %p6948_p10 }
  0x44   : > { %p6954_p13 = pnand %p6952_p12, %p6949_p11 }
  0x46   : > { %6957 = shalt.err (!%p6954_p13)
}
  0x47   : > { %s6958_s26 = scalar_lea.vmem %s7406_s30, 512  ;;  %p6966_p7 = scmp.lt.s32.totalorder %s7406_s30, %s7406_s30 }
  0x48   : > { %p6959_p0 = scmp.ne.s32.totalorder %s7406_s30, %s6958_s26  ;;  %p6967_p9 = scmp.lt.s32.totalorder %s6958_s26, %s6958_s26 }
  0x4a   : > { %p6961_p2 = pnand %p6959_p0, %p7418_p8  ;;  %p6968_p4 = por %p6967_p9, %p6966_p7 }
  0x4c   : > { %p6962_p5 = pneg %p6961_p2 }
  0x4e   : > { %p6969_p10 = pnand %p6968_p4, %p6962_p5 }
  0x50   : > { %6972 = shalt.err (!%p6969_p10)
}
  0x51   : > { %s7264_s6 = smov 64   ;;  %s7265_s2 = smov 4  }
  0x52   : > { %6609 = dma.hbm_to_vmem [thread:$0]  (!%p7402_p6), %s9184_s1, 512, %s7406_s30, [#allocation6], %s7264_s6, %s7264_s6, %s7265_s2  }
  0x53   : > { %s9185_s4 = sld [smem:[#allocation53_spill]] }
  0x59   : > { %s6973_s20 = scalar_lea.hbm %s9185_s4, 2048 }
  0x5a   : > { %p6974_p11 = scmp.ne.s32.totalorder %s9185_s4, %s6973_s20  ;;  %p6980_p0 = scmp.lt.u32.totalorder %s6973_s20, %s9185_s4 }
  0x5c   : > { %p6976_p12 = pnand %p6974_p11, %p7418_p8 }
  0x5e   : > { %p6977_p13 = pneg %p6976_p12 }
  0x60   : > { %p6982_p2 = pnand %p6980_p0, %p6977_p13 }
  0x62   : > { %6985 = shalt.err (!%p6982_p2)
}
  0x63   : > { %s6986_s7 = scalar_lea.vmem %s461_s18, 2048  ;;  %p6994_p4 = scmp.lt.s32.totalorder %s461_s18, %s461_s18 }
  0x64   : > { %p6987_p5 = scmp.ne.s32.totalorder %s461_s18, %s6986_s7  ;;  %p6995_p10 = scmp.lt.s32.totalorder %s6986_s7, %s6986_s7 }
  0x66   : > { %p6989_p7 = pnand %p6987_p5, %p7418_p8  ;;  %p6996_p1 = por %p6995_p10, %p6994_p4 }
  0x68   : > { %p6990_p9 = pneg %p6989_p7 }
  0x6a   : > { %p6997_p3 = pnand %p6996_p1, %p6990_p9 }
  0x6c   : > { %7000 = shalt.err (!%p6997_p3)
}
  0x6d   : > { %6615 = dma.hbm_to_vmem [thread:$0]  (!%p7402_p6), %s9185_s4, 2048, %s461_s18, [#allocation9], %s7264_s6, %s7264_s6, %s7265_s2  }
  0x6e   : > { %s7266_s11 = smov [#allocation11]   ;;  %s7267_s19 = smov [#allocation7]  }
  0x6f   : > { %s498_s16 = sshll.u32 %s7266_s11, 4  ;;  %s447_s20 = sshll.u32 %s7267_s19, 4  ;;  %s499_s16 = int_to_ptr.vmem [resolvable:$true] %s498_s16  ;;  %s448_s20 = int_to_ptr.vmem [resolvable:$true] %s447_s20 }
  0x70   : > { %s7001_s26 = scalar_lea.hbm %s9131_s10, 1024 }
  0x71   : > { %p7002_p1 = scmp.ne.s32.totalorder %s9131_s10, %s7001_s26  ;;  %p7008_p12 = scmp.lt.u32.totalorder %s7001_s26, %s9131_s10 }
  0x73   : > { %p7004_p3 = pnand %p7002_p1, %p7418_p8 }
  0x75   : > { %p7005_p11 = pneg %p7004_p3 }
  0x77   : > { %p7010_p13 = pnand %p7008_p12, %p7005_p11 }
  0x79   : > { %7013 = shalt.err (!%p7010_p13)
}
  0x7a   : > { %s7014_s18 = scalar_lea.vmem %s499_s16, 1024  ;;  %p7022_p7 = scmp.lt.s32.totalorder %s499_s16, %s499_s16 }
  0x7b   : > { %p7015_p0 = scmp.ne.s32.totalorder %s499_s16, %s7014_s18  ;;  %p7023_p9 = scmp.lt.s32.totalorder %s7014_s18, %s7014_s18 }
  0x7d   : > { %p7017_p2 = pnand %p7015_p0, %p7418_p8  ;;  %p7024_p4 = por %p7023_p9, %p7022_p7 }
  0x7f   : > { %p7018_p5 = pneg %p7017_p2 }
  0x81   : > { %p7025_p10 = pnand %p7024_p4, %p7018_p5 }
  0x83   : > { %7028 = shalt.err (!%p7025_p10)
}
  0x84   : > { %6621 = dma.hbm_to_vmem [thread:$0]  (!%p7402_p6), %s9131_s10, 1024, %s499_s16, [#allocation12], %s7264_s6, %s7264_s6, %s7265_s2  }
  0x85   : > { %s9186_s3 = sld [smem:[#allocation52_spill]] }
  0x8b   : > { %s7029_s19 = scalar_lea.hbm %s9186_s3, 1024 }
  0x8c   : > { %p7030_p1 = scmp.ne.s32.totalorder %s9186_s3, %s7029_s19  ;;  %p7036_p12 = scmp.lt.u32.totalorder %s7029_s19, %s9186_s3 }
  0x8e   : > { %p7032_p3 = pnand %p7030_p1, %p7418_p8 }
  0x90   : > { %p7033_p11 = pneg %p7032_p3 }
  0x92   : > { %p7038_p13 = pnand %p7036_p12, %p7033_p11 }
  0x94   : > { %7041 = shalt.err (!%p7038_p13)
}
  0x95   : > { %s7042_s30 = scalar_lea.vmem %s448_s20, 1024  ;;  %p7050_p7 = scmp.lt.s32.totalorder %s448_s20, %s448_s20 }
  0x96   : > { %p7043_p0 = scmp.ne.s32.totalorder %s448_s20, %s7042_s30  ;;  %p7051_p9 = scmp.lt.s32.totalorder %s7042_s30, %s7042_s30 }
  0x98   : > { %p7045_p2 = pnand %p7043_p0, %p7418_p8  ;;  %p7052_p4 = por %p7051_p9, %p7050_p7 }
  0x9a   : > { %p7046_p5 = pneg %p7045_p2 }
  0x9c   : > { %p7053_p10 = pnand %p7052_p4, %p7046_p5 }
  0x9e   : > { %7056 = shalt.err (!%p7053_p10)
}
  0x9f   : > { %6612 = dma.hbm_to_vmem [thread:$0]  (!%p7402_p6), %s9186_s3, 1024, %s448_s20, [#allocation6], %s7264_s6, %s7264_s6, %s7265_s2  }
  0xa0   : > { %s7268_s1 = smov [#allocation10]   ;;  %s7269_s9 = smov [#allocation13]  }
  0xa1   : > { %s473_s12 = sshll.u32 %s7268_s1, 4  ;;  %s517_s11 = sshll.u32 %s7269_s9, 4  ;;  %s474_s12 = int_to_ptr.vmem [resolvable:$true] %s473_s12  ;;  %s518_s11 = int_to_ptr.vmem [resolvable:$true] %s517_s11 }
  0xa2   : > { %s9187_s5 = sld [smem:[#allocation54_spill]] }
  0xa8   : > { %s7057_s8 = scalar_lea.hbm %s9187_s5, 2048 }
  0xa9   : > { %p7058_p1 = scmp.ne.s32.totalorder %s9187_s5, %s7057_s8  ;;  %p7064_p12 = scmp.lt.u32.totalorder %s7057_s8, %s9187_s5 }
  0xab   : > { %p7060_p3 = pnand %p7058_p1, %p7418_p8 }
  0xad   : > { %p7061_p11 = pneg %p7060_p3 }
  0xaf   : > { %p7066_p13 = pnand %p7064_p12, %p7061_p11 }
  0xb1   : > { %7069 = shalt.err (!%p7066_p13)
}
  0xb2   : > { %s7070_s2 = scalar_lea.vmem %s474_s12, 2048  ;;  %p7078_p7 = scmp.lt.s32.totalorder %s474_s12, %s474_s12 }
  0xb3   : > { %p7071_p0 = scmp.ne.s32.totalorder %s474_s12, %s7070_s2  ;;  %p7079_p9 = scmp.lt.s32.totalorder %s7070_s2, %s7070_s2 }
  0xb5   : > { %p7073_p2 = pnand %p7071_p0, %p7418_p8  ;;  %p7080_p4 = por %p7079_p9, %p7078_p7 }
  0xb7   : > { %p7074_p5 = pneg %p7073_p2 }
  0xb9   : > { %p7081_p10 = pnand %p7080_p4, %p7074_p5 }
  0xbb   : > { %7084 = shalt.err (!%p7081_p10)
}
  0xbc   : > { %s9188_s20 = smov 8   ;;  %s9189_s18 = smov 128  }
  0xbd   : > { %6618 = dma.hbm_to_vmem [thread:$0]  (!%p7402_p6), %s9187_s5, 2048, %s474_s12, [#allocation9], %s9189_s18, %s9189_s18, %s9188_s20  }
  0xbe   : > { %s7085_s8 = scalar_lea.hbm %s9134_s13, 512 }
  0xbf   : > { %p7086_p1 = scmp.ne.s32.totalorder %s9134_s13, %s7085_s8  ;;  %p7092_p12 = scmp.lt.u32.totalorder %s7085_s8, %s9134_s13 }
  0xc1   : > { %p7088_p3 = pnand %p7086_p1, %p7418_p8 }
  0xc3   : > { %p7089_p11 = pneg %p7088_p3 }
  0xc5   : > { %p7094_p13 = pnand %p7092_p12, %p7089_p11 }
  0xc7   : > { %7097 = shalt.err (!%p7094_p13)
}
  0xc8   : > { %s7098_s2 = scalar_lea.vmem %s518_s11, 512  ;;  %p7106_p7 = scmp.lt.s32.totalorder %s518_s11, %s518_s11 }
  0xc9   : > { %p7099_p0 = scmp.ne.s32.totalorder %s518_s11, %s7098_s2  ;;  %p7107_p9 = scmp.lt.s32.totalorder %s7098_s2, %s7098_s2 }
  0xcb   : > { %p7101_p2 = pnand %p7099_p0, %p7418_p8  ;;  %p7108_p4 = por %p7107_p9, %p7106_p7 }
  0xcd   : > { %p7102_p5 = pneg %p7101_p2 }
  0xcf   : > { %p7109_p10 = pnand %p7108_p4, %p7102_p5 }
  0xd1   : > { %7112 = shalt.err (!%p7109_p10)
}
  0xd2   : > { %6624 = dma.hbm_to_vmem [thread:$0]  (!%p7402_p6), %s9134_s13, 512, %s518_s11, [#allocation12], %s9189_s18, %s9189_s18, %s9188_s20  }
  0xd3   : > { %s7270_s9 = smov [#allocation14]   ;;  %s7113_s26 = scalar_lea.hbm %s9135_s14, 512 }
  0xd4   : > { %s530_s19 = sshll.u32 %s7270_s9, 4  ;;  %p7114_p1 = scmp.ne.s32.totalorder %s9135_s14, %s7113_s26  ;;  %s531_s19 = int_to_ptr.vmem [resolvable:$true] %s530_s19 }
  0xd5   : > { %p7120_p12 = scmp.lt.u32.totalorder %s7113_s26, %s9135_s14 }
  0xd6   : > { %p7116_p3 = pnand %p7114_p1, %p7418_p8 }
  0xd8   : > { %p7117_p11 = pneg %p7116_p3 }
  0xda   : > { %p7122_p13 = pnand %p7120_p12, %p7117_p11 }
  0xdc   : > { %7125 = shalt.err (!%p7122_p13)
}
  0xdd   : > { %s7126_s11 = scalar_lea.vmem %s531_s19, 512  ;;  %p7134_p7 = scmp.lt.s32.totalorder %s531_s19, %s531_s19 }
  0xde   : > { %p7127_p0 = scmp.ne.s32.totalorder %s531_s19, %s7126_s11  ;;  %p7135_p9 = scmp.lt.s32.totalorder %s7126_s11, %s7126_s11 }
  0xe0   : > { %p7129_p2 = pnand %p7127_p0, %p7418_p8  ;;  %p7136_p4 = por %p7135_p9, %p7134_p7 }
  0xe2   : > { %p7130_p5 = pneg %p7129_p2 }
  0xe4   : > { %p7137_p10 = pnand %p7136_p4, %p7130_p5 }
  0xe6   : > { %7140 = shalt.err (!%p7137_p10)
}
  0xe7   : > { %6627 = dma.hbm_to_vmem [thread:$0]  (!%p7402_p6), %s9135_s14, 512, %s531_s19, [#allocation15], %s9189_s18, %s9189_s18, %s9188_s20  }
  0xe8   : > { %s5755_s0 = sadd.s32 4294967294, %s7257_s24   ;;  %s7597_s29 = sadd.s32 1, %s7257_s24  }
  0xe9   : > { %s353_s9 = ssub.s32 %s7257_s24, %s7597_s29  ;;  %s356_s17 = sadd.s32 1, %s7253_s23 }
  0xea   : > { %p354_p8 = scmp.eq.s32.totalorder %s353_s9, 0  ;;  %p363_p1 = scmp.ne.s32.totalorder %s7253_s23, %s7249_s22 }
  0xeb   : > { %p364_p3 = scmp.eq.s32.totalorder %s7257_s24, 0  ;;  %p369_p11 = scmp.ne.s32.totalorder %s7249_s22, %s7245_s21 }
  0xec   : > { %s7608_s8 = scalar_select %p354_p8, %s7253_s23, %s356_s17  }
  0xed   : > { %p7610_p12 = por %p364_p3, %p363_p1  ;;  %p9191_p13 = scmp.eq.s32.totalorder %s7386_s27, 0 }
  0xee   : > { %p393_p0 = scmp.eq.s32.totalorder %s7386_s27, 1  ;;  %p399_p2 = scmp.eq.s32.totalorder %s5755_s0, 1 }
  0xef   : > { %p7616_p6 = por %p9191_p13, %p369_p11  ;;  %p6644_p5 = scmp.lt.s32.totalorder %s7257_s24, 2 }
  0xf0   : > { %s544_s18 = sand.u32 1, %s7257_s24   ;;  %p7623_p7 = por %p393_p0, %p363_p1 }
  0xf1   : > { %p7627_p9 = por %p399_p2, %p369_p11  ;;  %s546_s30 = sand.u32 1, %s7253_s23  }
  0xf2   : > { %s9193_s19 = scalar_select %p7623_p7, 1, 0 }
  0xf3   : > { %s9194_s7 = scalar_select %p7627_p9, 1, 0 }
  0xf4   : > { %s5766_s16 = sshll.u32 %s546_s30, 10  ;;  %s6193_s2 = sshll.u32 %s7257_s24, 10 }
  0xf5   : > { %s7636_s1 = scalar_lea.hbm %s9136_s15, %s6193_s2  ;;  %s548_s0 = scalar_lea.vmem [#allocation16], %s5766_s16 }
  0xf6   : > { %s555_s9 = sshll.u32 %s548_s0, 4  ;;  %p7640_p4 = pnand %p6644_p5, %p7610_p12  ;;  %s7644_s9 = int_to_ptr.vmem [resolvable:$true] %s555_s9 }
  0xf7   : > { %s7646_s30 = scalar_lea.sflag [#allocation3], %s544_s18  ;;  %s7141_s11 = scalar_lea.hbm %s7636_s1, 16384 }
  0xf8   : > { %p7142_p10 = scmp.ne.s32.totalorder %s7636_s1, %s7141_s11  ;;  %p7143_p8 = pneg %p7640_p4 }
  0xf9   : > { %s7146_s2 = scalar_lea.hbm %s9136_s15, 32768  ;;  %p7147_p11 = scmp.lt.u32.totalorder %s7636_s1, %s9136_s15 }
  0xfa   : > { %p7144_p1 = pnand %p7143_p8, %p7142_p10  ;;  %p7148_p12 = scmp.lt.u32.totalorder %s7146_s2, %s7141_s11 }
  0xfb   : > { %p7150_p0 = scmp.lt.u32.totalorder %s7141_s11, %s7636_s1 }
  0xfc   : > { %p7145_p3 = pneg %p7144_p1  ;;  %p7149_p13 = por %p7148_p12, %p7147_p11 }
  0xfe   : > { %p7151_p2 = por %p7150_p0, %p7149_p13 }
 0x100   : > { %p7152_p5 = pnand %p7151_p2, %p7145_p3 }
 0x102   : > { %7155 = shalt.err (!%p7152_p5)
}
 0x103   : > { %s7156_s18 = scalar_lea.vmem %s7644_s9, 16384  ;;  %s7271_s16 = smov [#allocation16]  }
 0x104   : > { %p7157_p10 = scmp.ne.s32.totalorder %s7644_s9, %s7156_s18  ;;  %s7161_s26 = sshll.u32 %s7271_s16, 4  ;;  %s7162_s26 = int_to_ptr.vmem [resolvable:$false] %s7161_s26 }
 0x105   : > { %s7163_s12 = scalar_lea.vmem %s7162_s26, 32768  ;;  %p7164_p7 = scmp.lt.s32.totalorder %s7644_s9, %s7162_s26 }
 0x106   : > { %p7159_p1 = pnand %p7157_p10, %p7143_p8  ;;  %p7165_p11 = scmp.lt.s32.totalorder %s7163_s12, %s7156_s18 }
 0x108   : > { %p7160_p9 = pneg %p7159_p1  ;;  %p7166_p12 = por %p7165_p11, %p7164_p7 }
 0x10a   : > { %p7167_p13 = pnand %p7166_p12, %p7160_p9 }
 0x10c   : > { %7170 = shalt.err (!%p7167_p13)
}
 0x10d   : > { %s7272_s11 = smov 2048   ;;  %s7273_s2 = smov 1024  }
 0x10e   : > { %6631 = dma.hbm_to_vmem [thread:$0]  (!%p7640_p4), %s7636_s1, 16384, %s7644_s9, %s7646_s30, %s7272_s11, %s7273_s2, %s7264_s6  }
 0x10f   : > { %p9196_p8 = scmp.ne.s32.totalorder %s9180_s28, 0 }
 0x111   : > { %567 = sbr.rel (%p9196_p8) target bundleno = 4056 (0xfd8), region = 84 }
 0x118   : > { %p9197_p3 = scmp.eq.s32.totalorder %s7386_s27, 0 }
 0x11a   : > { %7216 = dma.done.wait (%p9197_p3), [#allocation3], 512   ;;  %p9198_p0 = pmov %p9197_p3 }
 0x11c   : > { %7218 = vsyncadd (%p9198_p0), [#allocation3], 4294966784  ;;  %p9199_p7 = pmov %p9198_p0 }
 0x11d   : > { %p9200_p9 = pmov %p9198_p0 }
 0x11e   : > { %7220 = dma.done.wait (%p9199_p7), [#allocation6], 1536  }
 0x11f   : > { %7222 = vsyncadd (%p9200_p9), [#allocation6], 4294965760  ;;  %p9201_p2 = pmov %p9198_p0 }
 0x120   : > { %p9202_p4 = pmov %p9198_p0 }
 0x121   : > { %7224 = dma.done.wait (%p9201_p2), [#allocation9], 4096  }
 0x122   : > { %7226 = vsyncadd (%p9202_p4), [#allocation9], 4294963200  ;;  %p9203_p5 = pmov %p9198_p0 }
 0x123   : > { %p9204_p10 = pmov %p9198_p0 }
 0x124   : > { %7228 = dma.done.wait (%p9203_p5), [#allocation12], 1536  }
 0x125   : > { %7230 = vsyncadd (%p9204_p10), [#allocation12], 4294965760  ;;  %p9205_p1 = pmov %p9198_p0 }
 0x126   : > { %p9206_p11 = pmov %p9198_p0 }
 0x127   : > { %7232 = dma.done.wait (%p9205_p1), [#allocation15], 512  }
 0x128   : > { %7234 = vsyncadd (%p9206_p11), [#allocation15], 4294966784  ;;  %s601_s28 = sand.u32 1, %s7386_s27   ;;  %s7699_s6 = sand.u32 1, %s7249_s22  }
 0x129   : > { %s5778_s1 = sshll.u32 %s7699_s6, 10  ;;  %s602_s9 = scalar_lea.sflag [#allocation3], %s601_s28 }
 0x12a   : > { %s7702_s17 = scalar_lea.vmem [#allocation16], %s5778_s1 }
 0x12b   : > { %7236 = dma.done.wait (%p7616_p6), %s602_s9, 16384  }
 0x12c   : > { %7238 = vsyncadd (%p7616_p6), %s602_s9, 4294950912  ;;  %v6717_v0 = vld [vmem:[#allocation5] sm:$0xff]   ;;  %v6718_v1 = vld [vmem:[#allocation5 + $0x8] sm:$0xff]   ;;  %vm696_vm0 = vcmask 523264   ;;  %s9207_s0 = sld [smem:[#allocation51_spill]]  ;;  %v9155_v42 = vmov 0  }
 0x12d   : > { %6441 = vmatprep.subr.bf16.mxu1 %v6717_v0  ;;  %v6719_v2 = vld [vmem:[#allocation5 + $0x10] sm:$0xff]   ;;  %v657_v3 = vld [vmem:[#allocation2] sm:$0xff]  ;;  %v658_v4 = vld [vmem:[#allocation2 + $0x8] sm:$0xff]  ;;  %s9208_s16 = sld [smem:[#allocation59_spill]]  ;;  %6706 = vset.pattern.permute.xlu1 %v9155_v42  ;;  %s9152_s18 = smov 64   ;;  %vm1121_vm1 = vcmask 261120  }
 0x12e   : > { %6442 = vmatpush3.bf16.msra.mxu1 %v6717_v0  ;;  %v662_v5 = vpack.c.bf16 %v658_v4, %v657_v3  ;;  %v6720_v6 = vld [vmem:[#allocation5 + $0x18] sm:$0xff]   ;;  %v659_v7 = vld [vmem:[#allocation2 + $0x10] sm:$0xff]  ;;  %v6724_v12 = vld [vmem:[#allocation7] sm:$0xff]   ;;  %6705 = vset.pattern.permute.xlu0 %v9155_v42  ;;  %s9213_s12 = sld [smem:[#allocation55_spill]]  ;;  %s9217_s11 = sld [smem:[#allocation56_spill]] }
 0x12f   : > { %6443 = vmatprep.subr.bf16.mxu1 %v6718_v1  ;;  %v660_v8 = vld [vmem:[#allocation2 + $0x18] sm:$0xff]  ;;  %v6728_v14 = vld [vmem:[#allocation7 + $0x8] sm:$0xff]   ;;  %6453 = vmatprep.subr.bf16.mxu0 %v6724_v12  ;;  %v6732_v17 = vld [vmem:[#allocation7 + $0x10] sm:$0xff]   ;;  %s9218_s20 = smov 64   ;;  %s9219_s4 = sld [smem:[#allocation60_spill]] }
 0x130   : > { %6449 = vmatprep.mubr.msk.bf16.mxu1 %vm696_vm0, %v662_v5  ;;  %v663_v9 = vpack.c.bf16 %v660_v8, %v659_v7  ;;  %6454 = vmatpush3.bf16.msra.mxu0 %v6724_v12  ;;  %v6736_v34 = vld [vmem:[#allocation7 + $0x18] sm:$0xff]   ;;  %v6740_v37 = vld [vmem:[#allocation7 + $0x20] sm:$0xff]   ;;  %v6744_v40 = vld [vmem:[#allocation7 + $0x28] sm:$0xff]   ;;  %s9220_s28 = sld [smem:[#allocation57_spill]]  ;;  %s6194_s5 = sshll.u32 %s7386_s27, 11 }
 0x131   : > { %6455 = vmatprep.subr.bf16.mxu0 %v6728_v14  ;;  %v6748_v43 = vld [vmem:[#allocation7 + $0x30] sm:$0xff]   ;;  %v6752_v46 = vld [vmem:[#allocation7 + $0x38] sm:$0xff]   ;;  %s9264_s2 = sld [smem:[#allocation61_spill]]  ;;  %s5593_s27 = scalar_lea.sflag [#allocation4], %s7699_s6 }
 0x132   : > { %6444 = vmatpush3.bf16.msra.mxu1 %v6718_v1  ;;  %v6721_v10 = vld [vmem:[%s9207_s0] ss:$8 sps:$4 sm:$0xff]   ;;  %v6723_v11 = vld [vmem:[%s9207_s0 + $0x4] ss:$8 sps:$4 sm:$0xff]   ;;  %v6727_v13 = vld [vmem:[%s9207_s0 + $0x14] ss:$8 sps:$4 sm:$0xff]  }
 0x133   : > { %6445 = vmatprep.subr.bf16.mxu1 %v6719_v2  ;;  %v6725_v15 = vld [vmem:[%s9207_s0 + $0x10] ss:$8 sps:$4 sm:$0xff]   ;;  %v6731_v16 = vld [vmem:[%s9207_s0 + $0x24] ss:$8 sps:$4 sm:$0xff]   ;;  %v6729_v18 = vld [vmem:[%s9207_s0 + $0x20] ss:$8 sps:$4 sm:$0xff]  }
 0x134   : > { %6456 = vmatpush3.bf16.msra.mxu0 %v6728_v14  ;;  %v7733_v20 = vld [vmem:[%s9208_s16] ss:$0 sm:$0xff]  ;;  %v6735_v32 = vld [vmem:[%s9207_s0 + $0x34] ss:$8 sps:$4 sm:$0xff]   ;;  %v6733_v33 = vld [vmem:[%s9207_s0 + $0x30] ss:$8 sps:$4 sm:$0xff]  }
 0x135   : > { %6457 = vmatprep.subr.bf16.mxu0 %v6732_v17  ;;  %v6739_v35 = vld [vmem:[%s9207_s0 + $0x44] ss:$8 sps:$4 sm:$0xff]   ;;  %v6737_v36 = vld [vmem:[%s9207_s0 + $0x40] ss:$8 sps:$4 sm:$0xff]   ;;  %v6741_v38 = vld [vmem:[%s9207_s0 + $0x50] ss:$8 sps:$4 sm:$0xff]  }
 0x136   : > { %6446 = vmatpush3.bf16.msra.mxu1 %v6719_v2  ;;  %v6743_v39 = vld [vmem:[%s9207_s0 + $0x54] ss:$8 sps:$4 sm:$0xff]   ;;  %v6747_v41 = vld [vmem:[%s9207_s0 + $0x64] ss:$8 sps:$4 sm:$0xff]   ;;  %v6745_v44 = vld [vmem:[%s9207_s0 + $0x60] ss:$8 sps:$4 sm:$0xff]  }
 0x137   : > { %6447 = vmatprep.subr.bf16.mxu1 %v6720_v6  ;;  %v6751_v45 = vld [vmem:[%s9207_s0 + $0x74] ss:$8 sps:$4 sm:$0xff]   ;;  %v6749_v47 = vld [vmem:[%s9207_s0 + $0x70] ss:$8 sps:$4 sm:$0xff]   ;;  %s9221_s16 = sld [smem:[#allocation58_spill]]  ;;  %s9067_s3 = scalar_lea.hbm %s9264_s2, %s6194_s5 }
 0x138   : > { %6458 = vmatpush3.bf16.msra.mxu0 %v6732_v17  ;;  %p9265_p12 = scmp.ne.s32.totalorder %s9193_s19, 0  ;;  %s7276_s0 = smov [#allocation17]  }
 0x139   : > { %6459 = vmatprep.subr.bf16.mxu0 %v6736_v34  ;;  %s7175_s1 = sshll.u32 %s7276_s0, 4  ;;  %s7176_s1 = int_to_ptr.vmem [resolvable:$false] %s7175_s1 }
 0x13a   : > { %6448 = vmatpush3.bf16.msra.mxu1 %v6720_v6 }
 0x13b   : > { %884 = vmatprep.subr.bf16.mxu1 %v6723_v11 }
 0x13c   : > { %6460 = vmatpush3.bf16.msra.mxu0 %v6736_v34 }
 0x13d   : > { %6450 = vmatmul.mubr.msk.bf16.vlgmr.msra.gmra.mrb[0].mxu1 %vm696_vm0, %v663_v9  ;;  %6461 = vmatprep.subr.bf16.mxu0 %v6740_v37 }
 0x13e   : > { %885 = vmatpush1.bf16.msra.mxu1 %v6721_v10  ;;  %916 = vmatprep.mubr.bf16.mxu1 %v9155_v42 }
 0x13f   : > { %886 = vmatprep.subr.bf16.mxu1 %v6727_v13 }
 0x140   : > { %6462 = vmatpush3.bf16.msra.mxu0 %v6740_v37 }
 0x141   : > { %6463 = vmatprep.subr.bf16.mxu0 %v6744_v40 }
 0x142   : > { %887 = vmatpush1.bf16.msra.mxu1 %v6725_v15 }
 0x143   : > { %888 = vmatprep.subr.bf16.mxu1 %v6731_v16 }
 0x144   : > { %6464 = vmatpush3.bf16.msra.mxu0 %v6744_v40 }
 0x145   : > { %6465 = vmatprep.subr.bf16.mxu0 %v6748_v43 }
 0x146   : > { %889 = vmatpush1.bf16.msra.mxu1 %v6729_v18 }
 0x147   : > { %890 = vmatprep.subr.bf16.mxu1 %v6735_v32  ;;  %v1057_v32 = vld [vmem:[#allocation13 + $0x18] sm:$0xff] }
 0x148   : > { %6466 = vmatpush3.bf16.msra.mxu0 %v6748_v43 }
 0x149   : > { %6467 = vmatprep.subr.bf16.mxu0 %v6752_v46 }
 0x14a   : > { %891 = vmatpush1.bf16.msra.mxu1 %v6733_v33  ;;  %v1055_v33 = vld [vmem:[#allocation13 + $0x8] sm:$0xff] }
 0x14b   : > { %892 = vmatprep.subr.bf16.mxu1 %v6739_v35 }
 0x14c   : > { %6468 = vmatpush3.bf16.msra.mxu0 %v6752_v46 }
 0x14e   : > { %893 = vmatpush1.bf16.msra.mxu1 %v6737_v36  ;;  %v1056_v36 = vld [vmem:[#allocation13 + $0x10] sm:$0xff] }
 0x14f   : > { %894 = vmatprep.subr.bf16.mxu1 %v6743_v39 }
 0x152   : > { %895 = vmatpush1.bf16.msra.mxu1 %v6741_v38 }
 0x153   : > { %896 = vmatprep.subr.bf16.mxu1 %v6747_v41 }
 0x156   : > { %897 = vmatpush1.bf16.msra.mxu1 %v6745_v44 }
 0x157   : > { %898 = vmatprep.subr.bf16.mxu1 %v6751_v45 }
 0x15a   : > { %899 = vmatpush1.bf16.msra.mxu1 %v6749_v47 }
 0x210   : > { %v7728_v19 = vpop.f32.mrb[0].mxu1 }
 0x211   : > { %v7735_v21 = vpop.f32.mrb[1].mxu1  ;;  %v754_v22 = vmul.f32 %v7728_v19, %v7728_v19 }
 0x212   : > { %v7739_v23 = vpop.f32.mrb[2].mxu1  ;;  %v752_v24 = vmul.f32 %v7735_v21, %v7735_v21 }
 0x213   : > { %v7743_v25 = vpop.f32.mrb[3].mxu1  ;;  %v764_v26 = vmul.f32 %v7733_v20, %v754_v22  ;;  %v755_v27 = vmul.f32 %v7739_v23, %v7739_v23 }
 0x214   : > { %v762_v28 = vmul.f32 %v7733_v20, %v752_v24  ;;  %v753_v29 = vmul.f32 %v7743_v25, %v7743_v25 }
 0x215   : > { %770 = vadd.xlane.f32.xlu1 %v764_v26  ;;  %v765_v30 = vmul.f32 %v7733_v20, %v755_v27 }
 0x216   : > { %766 = vadd.xlane.f32.xlu0 %v762_v28  ;;  %v763_v31 = vmul.f32 %v7733_v20, %v753_v29  ;;  %v1054_v29 = vld [vmem:[#allocation13] sm:$0xff] }
 0x219   : > { %772 = vadd.xlane.f32.xlu1 %v765_v30 }
 0x21a   : > { %768 = vadd.xlane.f32.xlu0 %v763_v31 }
 0x2a2   : > { %v771_v48 = vpop.xlane.xlu1 %770 }
 0x2a3   : > { %v776_v49 = vmul.f32 0.125, %v771_v48  ;;  %v767_v50 = vpop.xlane.xlu0 %766 }
 0x2a4   : > { %v774_v51 = vmul.f32 0.125, %v767_v50 }
 0x2a5   : > { %6865 = vrsqrt.f32 %v776_v49 }
 0x2a6   : > { %v773_v52 = vpop.xlane.xlu1 %772  ;;  %6867 = vrsqrt.f32 %v774_v51 }
 0x2a7   : > { %v777_v53 = vmul.f32 0.125, %v773_v52  ;;  %v769_v54 = vpop.xlane.xlu0 %768 }
 0x2a8   : > { %v775_v55 = vmul.f32 0.125, %v769_v54 }
 0x2a9   : > { %6869 = vrsqrt.f32 %v777_v53 }
 0x2aa   : > { %6871 = vrsqrt.f32 %v775_v55 }
 0x2af   : > { %v6866_v56 = vpop.eup %6865 }
 0x2b0   : > { %v6868_v57 = vpop.eup %6867  ;;  %v784_v60 = vmul.f32 %v6866_v56, %v7728_v19 }
 0x2b1   : > { %v782_v62 = vmul.f32 %v6868_v57, %v7735_v21 }
 0x2b3   : > { %v6870_v58 = vpop.eup %6869 }
 0x2b4   : > { %v6872_v59 = vpop.eup %6871  ;;  %v785_v61 = vmul.f32 %v6870_v58, %v7739_v23 }
 0x2b5   : > { %v783_v63 = vmul.f32 %v6872_v59, %v7743_v25 }
 0x2b6   : > { %v787_v0 = vpack.c.bf16 %v785_v61, %v784_v60 }
 0x2b7   : > { %v786_v1 = vpack.c.bf16 %v783_v63, %v782_v62 }
 0x2b9   : > { %917 = vmatmul.mubr.bf16.vlgmr.msra.gmra.mrb[4].mxu1 %v786_v1  ;;  %6469 = vmatprep.mubr.bf16.mxu0 %v786_v1 }
 0x2ba   : > { %6470 = vmatmul.mubr.bf16.vlgmr.msra.gmra.mrb[0].mxu0 %v787_v0  ;;  %926 = vmatprep.mubr.bf16.mxu1 %v9155_v42 }
 0x2c1   : > { %927 = vmatmul.mubr.bf16.gmra.mrb[8].mxu1 %v787_v0 }
 0x38c   : > { %v918_v2 = vpop.f32.mrb[4].mxu1 }
 0x38d   : > { %v920_v3 = vpop.f32.mrb[5].mxu1  ;;  %v6471_v4 = vpop.f32.mrb[0].mxu0 }
 0x38e   : > { %v922_v5 = vpop.f32.mrb[6].mxu1  ;;  %v1035_v6 = vpop.f32.mrb[1].mxu0 }
 0x38f   : > { %v1058_v7 = vpack.c.bf16 %v922_v5, %v918_v2  ;;  %v924_v8 = vpop.f32.mrb[7].mxu1  ;;  %v6472_v9 = vpop.f32.mrb[2].mxu0 }
 0x390   : > { %v1050_v10 = vpack.c.bf16 %v924_v8, %v920_v3  ;;  %v7791_v11 = vpack.c.bf16 %v6472_v9, %v6471_v4  ;;  %v1038_v12 = vpop.f32.mrb[3].mxu0 }
 0x391   : > { %v7793_v13 = vpack.c.bf16 %v1038_v12, %v1035_v6  ;;  %1225 = vrot.lane.b32.xlu0 %v1058_v7, %s9152_s18  ;;  %6477 = vmatprep.mubr.msk.bf16.mxu1 %vm696_vm0, %v1058_v7 }
 0x392   : > { %6563 = vmatprep.subr.msk.bf16.mxu1 %vm696_vm0, %v1050_v10  ;;  %v1067_v14 = vsel %vm696_vm0, %v1050_v10, 0 }
 0x393   : > { %6474 = vmatpush3.bf16.xpose.msra.mxu1 %v1067_v14  ;;  %6481 = vmatprep.subr.bf16.mxu0 %v7793_v13 }
 0x394   : > { %v928_v15 = vpop.f32.mrb[8].mxu1  ;;  %6482 = vmatpush3.bf16.msra.mxu0 %v7793_v13 }
 0x395   : > { %v930_v16 = vpop.f32.mrb[9].mxu1  ;;  %6483 = vmatprep.subr.bf16.mxu0 %v7791_v11 }
 0x396   : > { %v932_v17 = vpop.f32.mrb[10].mxu1 }
 0x397   : > { %v1059_v18 = vpack.c.bf16 %v932_v17, %v928_v15  ;;  %v934_v22 = vpop.f32.mrb[11].mxu1 }
 0x398   : > { %v1051_v24 = vpack.c.bf16 %v934_v22, %v930_v16  ;;  %6484 = vmatpush3.bf16.msra.mxu0 %v7791_v11 }
 0x399   : > { %6497 = vmatprep.subr.bf16.mxu0 %v7793_v13  ;;  %1227 = vrot.lane.b32.xlu1 %v1059_v18, %s9152_s18  ;;  %s7177_s18 = scalar_lea.vmem %s7176_s1, 16384 }
 0x39a   : > { %6564 = vmatprep.subr.msk.bf16.mxu1 %vm696_vm0, %v1051_v24  ;;  %v1070_v26 = vsel %vm696_vm0, %v1051_v24, 0 }
 0x39b   : > { %6476 = vmatpush3.bf16.xpose.msra.mxu1 %v1070_v26 }
 0x39c   : > { %6565 = vmatprep.subr.msk.bf16.mxu1 %vm696_vm0, %v1050_v10 }
 0x3a2   : > { %6478 = vmatmul.mubr.msk.bf16.vlgmr.msra.gmra.mrb[12].mxu1 %vm696_vm0, %v1059_v18 }
 0x3a3   : > { %6490 = vmatpush3.bf16.xpose.msra.mxu1 %v1067_v14 }
 0x3a4   : > { %6566 = vmatprep.subr.msk.bf16.mxu1 %vm696_vm0, %v1051_v24 }
 0x3ab   : > { %6492 = vmatpush3.bf16.xpose.msra.mxu1 %v1070_v26 }
 0x403   : > { %v1226_v27 = vpop.permute.xlu0 %1225 }
 0x404   : > { %6493 = vmatprep.mubr.msk.bf16.mxu1 %vm696_vm0, %v1226_v27 }
 0x40b   : > { %v1228_v28 = vpop.permute.xlu1 %1227 }
 0x40c   : > { %6494 = vmatmul.mubr.msk.bf16.vlgmr.msra.gmra.mrb[16].mxu1 %vm696_vm0, %v1228_v28 }
 0x40d   : > { %1724 = vmatprep.mubr.bf16.mxu1 %v9155_v42 }
 0x475   : > { %v6479_v30 = vpop.f32.mrb[12].mxu1 }
 0x476   : > { %v1106_v31 = vpop.f32.mrb[13].mxu1  ;;  %v1115_v41 = vadd.f32 %v6479_v30, %v1056_v36 }
 0x477   : > { %v1107_v34 = vadd.f32 %v1106_v31, %v1054_v29  ;;  %v6480_v35 = vpop.f32.mrb[14].mxu1 }
 0x478   : > { %v1109_v37 = vpop.f32.mrb[15].mxu1  ;;  %v1118_v38 = vadd.f32 %v6480_v35, %v1057_v32  ;;  %v1128_v45 = vsel %vm1121_vm1, %v1115_v41, -inf }
 0x479   : > { %v1110_v39 = vadd.f32 %v1109_v37, %v1055_v33  ;;  %v1122_v40 = vsel %vm1121_vm1, %v1107_v34, -inf }
 0x47a   : > { %1123 = vmax.xlane.f32.xlu1 %v1122_v40  ;;  %v1131_v44 = vsel %vm1121_vm1, %v1118_v38, -inf }
 0x47b   : > { %v1125_v43 = vsel %vm1121_vm1, %v1110_v39, -inf }
 0x47c   : > { %1126 = vmax.xlane.f32.xlu0 %v1125_v43 }
 0x47e   : > { %1132 = vmax.xlane.f32.xlu1 %v1131_v44 }
 0x480   : > { %1129 = vmax.xlane.f32.xlu0 %v1128_v45 }
 0x4df   : > { %v6495_v46 = vpop.f32.mrb[16].mxu1 }
 0x4e0   : > { %v1269_v47 = vpop.f32.mrb[17].mxu1  ;;  %v1278_v51 = vadd.f32 %v6495_v46, %v1056_v36 }
 0x4e1   : > { %v1270_v48 = vadd.f32 %v1269_v47, %v1054_v29  ;;  %v6496_v49 = vpop.f32.mrb[18].mxu1 }
 0x4e2   : > { %v1272_v50 = vpop.f32.mrb[19].mxu1  ;;  %v1281_v54 = vadd.f32 %v6496_v49, %v1057_v32  ;;  %v1290_v56 = vsel %vm1121_vm1, %v1278_v51, -inf }
 0x4e3   : > { %v1273_v52 = vadd.f32 %v1272_v50, %v1055_v33  ;;  %v1284_v53 = vsel %vm1121_vm1, %v1270_v48, -inf }
 0x4e4   : > { %1285 = vmax.xlane.f32.xlu0 %v1284_v53  ;;  %v1293_v57 = vsel %vm1121_vm1, %v1281_v54, -inf }
 0x4e5   : > { %v1287_v55 = vsel %vm1121_vm1, %v1273_v52, -inf }
 0x4e6   : > { %1288 = vmax.xlane.f32.xlu1 %v1287_v55 }
 0x4e8   : > { %1291 = vmax.xlane.f32.xlu0 %v1290_v56 }
 0x4ea   : > { %1294 = vmax.xlane.f32.xlu1 %v1293_v57 }
 0x507   : > { %v1124_v58 = vpop.xlane.xlu1 %1123 }
 0x508   : > { %v1134_v59 = vsub.f32 %v1107_v34, %v1124_v58 }
 0x509   : > { %v1127_v60 = vpop.xlane.xlu0 %1126 }
 0x50a   : > { %v1138_v61 = vmul.f32 1.442695, %v1134_v59  ;;  %v1135_v62 = vsub.f32 %v1110_v39, %v1127_v60  ;;  %v6753_v59 = vld [vmem:[#allocation8 + $0x40] sm:$0xff]  }
 0x50b   : > { %v1133_v63 = vpop.xlane.xlu1 %1132 }
 0x50c   : > { %6873 = vpow2.f32 %v1138_v61  ;;  %v1140_v0 = vmul.f32 1.442695, %v1135_v62  ;;  %v1137_v1 = vsub.f32 %v1118_v38, %v1133_v63 }
 0x50d   : > { %v1130_v2 = vpop.xlane.xlu0 %1129 }
 0x50e   : > { %6875 = vpow2.f32 %v1140_v0  ;;  %v1144_v3 = vmul.f32 1.442695, %v1137_v1  ;;  %v1136_v4 = vsub.f32 %v1115_v41, %v1130_v2 }
 0x510   : > { %6877 = vpow2.f32 %v1144_v3  ;;  %v1142_v5 = vmul.f32 1.442695, %v1136_v4 }
 0x512   : > { %6879 = vpow2.f32 %v1142_v5 }
 0x516   : > { %v6874_v6 = vpop.eup %6873 }
 0x517   : > { %v1146_v7 = vsel %vm1121_vm1, %v6874_v6, 0.0 }
 0x518   : > { %v6876_v8 = vpop.eup %6875  ;;  %1147 = vadd.xlane.f32.xlu0 %v1146_v7  ;;  %v6756_v7 = vld [vmem:[#allocation8 + $0x8] sm:$0xff]  }
 0x519   : > { %v1149_v9 = vsel %vm1121_vm1, %v6876_v8, 0.0 }
 0x51a   : > { %v6878_v10 = vpop.eup %6877  ;;  %1150 = vadd.xlane.f32.xlu1 %v1149_v9  ;;  %v6758_v9 = vld [vmem:[#allocation8 + $0x10] sm:$0xff]  }
 0x51b   : > { %v1155_v15 = vsel %vm1121_vm1, %v6878_v10, 0.0 }
 0x51c   : > { %v6880_v12 = vpop.eup %6879 }
 0x51d   : > { %v1152_v14 = vsel %vm1121_vm1, %v6880_v12, 0.0 }
 0x51e   : > { %1153 = vadd.xlane.f32.xlu0 %v1152_v14  ;;  %1156 = vadd.xlane.f32.xlu1 %v1155_v15  ;;  %v6761_v14 = vld [vmem:[#allocation8 + $0x60] sm:$0xff]  }
 0x51f   : > { %v6762_v15 = vld [vmem:[#allocation8 + $0x20] sm:$0xff]  }
 0x571   : > { %v1286_v16 = vpop.xlane.xlu0 %1285 }
 0x572   : > { %v1296_v17 = vsub.f32 %v1270_v48, %v1286_v16  ;;  %v6763_v16 = vld [vmem:[#allocation8 + $0x68] sm:$0xff]  }
 0x573   : > { %v1289_v18 = vpop.xlane.xlu1 %1288 }
 0x574   : > { %v1300_v22 = vmul.f32 1.442695, %v1296_v17  ;;  %v1297_v24 = vsub.f32 %v1273_v52, %v1289_v18  ;;  %v6764_v17 = vld [vmem:[#allocation8 + $0x28] sm:$0xff]   ;;  %v6765_v18 = vld [vmem:[#allocation8 + $0x70] sm:$0xff]  }
 0x575   : > { %v1292_v26 = vpop.xlane.xlu0 %1291 }
 0x576   : > { %6881 = vpow2.f32 %v1300_v22  ;;  %v1302_v27 = vmul.f32 1.442695, %v1297_v24  ;;  %v1298_v28 = vsub.f32 %v1278_v51, %v1292_v26  ;;  %v6766_v22 = vld [vmem:[#allocation8 + $0x30] sm:$0xff]   ;;  %v6767_v24 = vld [vmem:[#allocation8 + $0x78] sm:$0xff]  }
 0x577   : > { %v1295_v29 = vpop.xlane.xlu1 %1294  ;;  %v6768_v26 = vld [vmem:[#allocation8 + $0x38] sm:$0xff]  }
 0x578   : > { %6883 = vpow2.f32 %v1302_v27  ;;  %v1304_v30 = vmul.f32 1.442695, %v1298_v28  ;;  %v1299_v31 = vsub.f32 %v1281_v54, %v1295_v29 }
 0x57a   : > { %6885 = vpow2.f32 %v1304_v30  ;;  %v1306_v32 = vmul.f32 1.442695, %v1299_v31 }
 0x57c   : > { %6887 = vpow2.f32 %v1306_v32 }
 0x580   : > { %v6882_v33 = vpop.eup %6881 }
 0x581   : > { %v1308_v34 = vsel %vm1121_vm1, %v6882_v33, 0.0 }
 0x582   : > { %v6884_v35 = vpop.eup %6883  ;;  %1309 = vadd.xlane.f32.xlu0 %v1308_v34 }
 0x583   : > { %v1311_v36 = vsel %vm1121_vm1, %v6884_v35, 0.0 }
 0x584   : > { %v6886_v37 = vpop.eup %6885  ;;  %1312 = vadd.xlane.f32.xlu1 %v1311_v36 }
 0x585   : > { %v1314_v38 = vsel %vm1121_vm1, %v6886_v37, 0.0 }
 0x586   : > { %v6888_v39 = vpop.eup %6887  ;;  %1315 = vadd.xlane.f32.xlu0 %v1314_v38 }
 0x587   : > { %v1317_v40 = vsel %vm1121_vm1, %v6888_v39, 0.0 }
 0x588   : > { %1318 = vadd.xlane.f32.xlu1 %v1317_v40  ;;  %v6771_v40 = vld [vmem:[#allocation10 + $0x4] ss:$8 sps:$4 sm:$0xff]  }
 0x589   : > { %1692 = vmatprep.subr.bf16.mxu1 %v6771_v40 }
 0x5a5   : > { %v1148_v41 = vpop.xlane.xlu0 %1147 }
 0x5a6   : > { %6889 = vrcp.f32 %v1148_v41  ;;  %v6774_v41 = vld [vmem:[#allocation10 + $0x14] ss:$8 sps:$4 sm:$0xff]  }
 0x5a7   : > { %v1151_v43 = vpop.xlane.xlu1 %1150 }
 0x5a8   : > { %6891 = vrcp.f32 %v1151_v43  ;;  %v6772_v43 = vld [vmem:[#allocation10 + $0x10] ss:$8 sps:$4 sm:$0xff]  }
 0x5ab   : > { %v1154_v44 = vpop.xlane.xlu0 %1153  ;;  %v1157_v45 = vpop.xlane.xlu1 %1156 }
 0x5ac   : > { %6893 = vrcp.f32 %v1154_v44  ;;  %v6777_v44 = vld [vmem:[#allocation10 + $0x24] ss:$8 sps:$4 sm:$0xff]  }
 0x5ad   : > { %6895 = vrcp.f32 %v1157_v45  ;;  %v6775_v45 = vld [vmem:[#allocation10 + $0x20] ss:$8 sps:$4 sm:$0xff]  }
 0x5b0   : > { %v6890_v46 = vpop.eup %6889 }
 0x5b1   : > { %v1162_v48 = vmul.f32 %v6890_v46, %v6874_v6  ;;  %v6755_v6 = vld [vmem:[#allocation8 + $0x48] sm:$0xff]   ;;  %v6780_v46 = vld [vmem:[#allocation10 + $0x34] ss:$8 sps:$4 sm:$0xff]  }
 0x5b2   : > { %v6892_v47 = vpop.eup %6891 }
 0x5b3   : > { %v1163_v49 = vmul.f32 %v6892_v47, %v6876_v8  ;;  %v6757_v8 = vld [vmem:[#allocation8 + $0x50] sm:$0xff]  }
 0x5b4   : > { %v6778_v47 = vld [vmem:[#allocation10 + $0x30] ss:$8 sps:$4 sm:$0xff]  }
 0x5b5   : > { %v1166_v50 = vpack.c.bf16 %v1163_v49, %v1162_v48 }
 0x5b6   : > { %v6894_v51 = vpop.eup %6893 }
 0x5b7   : > { %v6896_v52 = vpop.eup %6895  ;;  %v1164_v53 = vmul.f32 %v6894_v51, %v6880_v12  ;;  %6485 = vmatprep.mubr.msk.bf16.mxu0 %vm1121_vm1, %v1166_v50  ;;  %v6760_v12 = vld [vmem:[#allocation8 + $0x18] sm:$0xff]  }
 0x5b8   : > { %v1165_v54 = vmul.f32 %v6896_v52, %v6878_v10  ;;  %v6759_v10 = vld [vmem:[#allocation8 + $0x58] sm:$0xff]  }
 0x5ba   : > { %v1167_v55 = vpack.c.bf16 %v1165_v54, %v1164_v53 }
 0x5bc   : > { %6486 = vmatmul.mubr.msk.bf16.vlgmr.msra.gmra.mrb[4].mxu0 %vm1121_vm1, %v1167_v55 }
 0x5bd   : > { %6498 = vmatpush3.bf16.msra.mxu0 %v7793_v13 }
 0x5be   : > { %6499 = vmatprep.subr.bf16.mxu0 %v7791_v11 }
 0x5c1   : > { %6500 = vmatpush3.bf16.msra.mxu0 %v7791_v11  ;;  %v6754_v11 = vld [vmem:[#allocation8] sm:$0xff]  }
 0x5c2   : > { %6227 = vmatprep.subr.bf16.mxu0 %v6753_v59 }
 0x60f   : > { %v1310_v56 = vpop.xlane.xlu0 %1309 }
 0x610   : > { %6897 = vrcp.f32 %v1310_v56 }
 0x611   : > { %v1313_v57 = vpop.xlane.xlu1 %1312 }
 0x612   : > { %6899 = vrcp.f32 %v1313_v57 }
 0x613   : > { %v1316_v58 = vpop.xlane.xlu0 %1315 }
 0x614   : > { %6901 = vrcp.f32 %v1316_v58 }
 0x615   : > { %v1319_v60 = vpop.xlane.xlu1 %1318 }
 0x616   : > { %6903 = vrcp.f32 %v1319_v60 }
 0x61a   : > { %v6898_v61 = vpop.eup %6897 }
 0x61b   : > { %v1324_v63 = vmul.f32 %v6898_v61, %v6882_v33 }
 0x61c   : > { %v6900_v62 = vpop.eup %6899 }
 0x61d   : > { %v1325_v0 = vmul.f32 %v6900_v62, %v6884_v35 }
 0x61e   : > { %v6902_v1 = vpop.eup %6901 }
 0x61f   : > { %v1328_v13 = vpack.c.bf16 %v1325_v0, %v1324_v63  ;;  %v1326_v3 = vmul.f32 %v6902_v1, %v6886_v37 }
 0x620   : > { %v6904_v2 = vpop.eup %6903 }
 0x621   : > { %v1327_v4 = vmul.f32 %v6904_v2, %v6888_v39  ;;  %6501 = vmatprep.mubr.msk.bf16.mxu0 %vm1121_vm1, %v1328_v13  ;;  %v6769_v39 = vld [vmem:[#allocation10] ss:$8 sps:$4 sm:$0xff]  }
 0x622   : > { %1693 = vmatpush1.bf16.msra.mxu1 %v6769_v39 }
 0x623   : > { %v1329_v5 = vpack.c.bf16 %v1327_v4, %v1326_v3  ;;  %1694 = vmatprep.subr.bf16.mxu1 %v6774_v41 }
 0x625   : > { %6502 = vmatmul.mubr.msk.bf16.vlgmr.msra.gmra.mrb[8].mxu0 %vm1121_vm1, %v1329_v5  ;;  %v6786_v5 = vld [vmem:[#allocation10 + $0x54] ss:$8 sps:$4 sm:$0xff]  }
 0x626   : > { %6228 = vmatpush3.bf16.msra.mxu0 %v6754_v11  ;;  %1695 = vmatpush1.bf16.msra.mxu1 %v6772_v43  ;;  %v6783_v11 = vld [vmem:[#allocation10 + $0x44] ss:$8 sps:$4 sm:$0xff]  }
 0x627   : > { %6229 = vmatprep.subr.bf16.mxu0 %v6755_v6  ;;  %1696 = vmatprep.subr.bf16.mxu1 %v6777_v44  ;;  %v6784_v6 = vld [vmem:[#allocation10 + $0x50] ss:$8 sps:$4 sm:$0xff]   ;;  %v1754_v43 = vld [vmem:[%s9213_s12 + $0x48] sm:$0xff] }
 0x628   : > { %v1758_v44 = vld [vmem:[%s9213_s12 + $0x68] sm:$0xff] }
 0x62a   : > { %6230 = vmatpush3.bf16.msra.mxu0 %v6756_v7  ;;  %1697 = vmatpush1.bf16.msra.mxu1 %v6775_v45  ;;  %v6787_v7 = vld [vmem:[#allocation10 + $0x60] ss:$8 sps:$4 sm:$0xff]  }
 0x62b   : > { %6231 = vmatprep.subr.bf16.mxu0 %v6757_v8  ;;  %1698 = vmatprep.subr.bf16.mxu1 %v6780_v46  ;;  %v6792_v8 = vld [vmem:[#allocation10 + $0x74] ss:$8 sps:$4 sm:$0xff]  }
 0x62e   : > { %6232 = vmatpush3.bf16.msra.mxu0 %v6758_v9  ;;  %1699 = vmatpush1.bf16.msra.mxu1 %v6778_v47  ;;  %v6790_v9 = vld [vmem:[#allocation10 + $0x70] ss:$8 sps:$4 sm:$0xff]  }
 0x62f   : > { %6233 = vmatprep.subr.bf16.mxu0 %v6759_v10  ;;  %1700 = vmatprep.subr.bf16.mxu1 %v6783_v11  ;;  %v1749_v10 = vld [vmem:[%s9213_s12 + $0x20] sm:$0xff]  ;;  %v1751_v11 = vld [vmem:[%s9213_s12 + $0x30] sm:$0xff] }
 0x632   : > { %6234 = vmatpush3.bf16.msra.mxu0 %v6760_v12  ;;  %v1746_v12 = vld [vmem:[%s9213_s12 + $0x8] sm:$0xff] }
 0x633   : > { %6235 = vmatprep.subr.bf16.mxu0 %v6761_v14 }
 0x636   : > { %6236 = vmatpush3.bf16.msra.mxu0 %v6762_v15 }
 0x637   : > { %6237 = vmatprep.subr.bf16.mxu0 %v6763_v16  ;;  %v1750_v16 = vld [vmem:[%s9213_s12 + $0x28] sm:$0xff] }
 0x63a   : > { %6238 = vmatpush3.bf16.msra.mxu0 %v6764_v17  ;;  %v1753_v17 = vld [vmem:[%s9213_s12 + $0x40] sm:$0xff] }
 0x63b   : > { %6239 = vmatprep.subr.bf16.mxu0 %v6765_v18  ;;  %v1757_v18 = vld [vmem:[%s9213_s12 + $0x60] sm:$0xff] }
 0x63e   : > { %6240 = vmatpush3.bf16.msra.mxu0 %v6766_v22  ;;  %v5853_v22 = vcombine.low %v1746_v12, %v1750_v16 }
 0x63f   : > { %6241 = vmatprep.subr.bf16.mxu0 %v6767_v24  ;;  %v5854_v24 = vcombine.high %v1746_v12, %v1750_v16  ;;  %v7954_v12 = vld [vmem:[%s9217_s11 + $0x18] sm:$0xff] }
 0x642   : > { %6242 = vmatpush3.bf16.msra.mxu0 %v6768_v26  ;;  %v5860_v26 = vcombine.high %v1753_v17, %v1757_v18 }
 0x68f   : > { %v6487_v27 = vpop.f32.mrb[4].mxu0 }
 0x690   : > { %v1208_v28 = vpop.f32.mrb[5].mxu0 }
 0x691   : > { %v6488_v29 = vpop.f32.mrb[6].mxu0 }
 0x692   : > { %v1387_v30 = vpack.c.bf16 %v6488_v29, %v6487_v27  ;;  %v1211_v31 = vpop.f32.mrb[7].mxu0  ;;  %v1761_v27 = vld [vmem:[%s9213_s12 + $0x80] sm:$0xff]  ;;  %v7888_v29 = vcombine.low %v1753_v17, %v1757_v18 }
 0x693   : > { %v1385_v32 = vpack.c.bf16 %v1211_v31, %v1208_v28  ;;  %v1765_v28 = vld [vmem:[%s9213_s12 + $0xa0] sm:$0xff] }
 0x694   : > { %9214 = vst [vmem:[#allocation29_spill] sm:$0xff] %v7888_v29  ;;  %v7891_v31 = vcombine.low %v1761_v27, %v1765_v28 }
 0x696   : > { %9215 = vst [vmem:[#allocation30_spill] sm:$0xff] %v7891_v31 }
 0x6f8   : > { %v6503_v33 = vpop.f32.mrb[8].mxu0 }
 0x6f9   : > { %v1370_v34 = vpop.f32.mrb[9].mxu0 }
 0x6fa   : > { %v6504_v35 = vpop.f32.mrb[10].mxu0 }
 0x6fb   : > { %v1388_v36 = vpack.c.bf16 %v6504_v35, %v6503_v33  ;;  %v1373_v37 = vpop.f32.mrb[11].mxu0 }
 0x6fc   : > { %v1386_v38 = vpack.c.bf16 %v1373_v37, %v1370_v34 }
 0x6fe   : > { %1549 = vmatprep.mubr.bf16.mxu0 %v1386_v38 }
 0x6ff   : > { %1550 = vmatmul.mubr.bf16.vlgmr.msra.gmra.mrb[12].mxu0 %v1385_v32 }
 0x700   : > { %1557 = vmatprep.mubr.bf16.mxu0 %v1388_v36 }
 0x707   : > { %1558 = vmatmul.mubr.bf16.gmra.mrb[16].mxu0 %v1387_v30  ;;  %v5868_v30 = vcombine.high %v1761_v27, %v1765_v28  ;;  %v1756_v27 = vld [vmem:[%s9213_s12 + $0x58] sm:$0xff] }
 0x708   : > { %1985 = vmatprep.mubr.bf16.mxu0 %v9155_v42  ;;  %v1760_v28 = vld [vmem:[%s9213_s12 + $0x78] sm:$0xff] }
 0x7d2   : > { %v6243_v48 = vpop.f32.mrb[12].mxu0 }
 0x7d3   : > { %v6244_v49 = vpop.f32.mrb[13].mxu0 }
 0x7d4   : > { %v6245_v50 = vadd.f32 %v6244_v49, %v6243_v48  ;;  %v6246_v51 = vpop.f32.mrb[14].mxu0  ;;  %v5862_v48 = vcombine.high %v1754_v43, %v1758_v44  ;;  %v1762_v49 = vld [vmem:[%s9213_s12 + $0x88] sm:$0xff] }
 0x7d5   : > { %v6247_v52 = vpop.f32.mrb[15].mxu0 }
 0x7d6   : > { %v7838_v53 = vadd.f32 %v6245_v50, %v7735_v21  ;;  %v6248_v54 = vadd.f32 %v6247_v52, %v6246_v51  ;;  %v1766_v50 = vld [vmem:[%s9213_s12 + $0xa8] sm:$0xff]  ;;  %v5861_v52 = vcombine.low %v1754_v43, %v1758_v44  ;;  %v1764_v43 = vld [vmem:[%s9213_s12 + $0x98] sm:$0xff] }
 0x7d7   : > { %v1768_v44 = vld [vmem:[%s9213_s12 + $0xb8] sm:$0xff] }
 0x7d8   : > { %9209 = vst [vmem:[#allocation25_spill] sm:$0xff] %v7838_v53  ;;  %v7841_v55 = vadd.f32 %v6248_v54, %v7743_v25  ;;  %v1566_v56 = vmul.f32 %v7838_v53, %v7838_v53  ;;  %v5870_v54 = vcombine.high %v1762_v49, %v1766_v50 }
 0x7da   : > { %9210 = vst [vmem:[#allocation26_spill] sm:$0xff] %v7841_v55  ;;  %v6249_v57 = vpop.f32.mrb[16].mxu0  ;;  %v1570_v58 = vmul.f32 %v7733_v20, %v1566_v56  ;;  %v1567_v59 = vmul.f32 %v7841_v55, %v7841_v55 }
 0x7db   : > { %v6250_v60 = vpop.f32.mrb[17].mxu0 }
 0x7dc   : > { %v6251_v61 = vadd.f32 %v6250_v60, %v6249_v57  ;;  %v6252_v62 = vpop.f32.mrb[18].mxu0  ;;  %1574 = vadd.xlane.f32.xlu0 %v1570_v58  ;;  %v1571_v21 = vmul.f32 %v7733_v20, %v1567_v59  ;;  %v5869_v59 = vcombine.low %v1762_v49, %v1766_v50 }
 0x7dd   : > { %v6253_v63 = vpop.f32.mrb[19].mxu0 }
 0x7de   : > { %v7850_v0 = vadd.f32 %v7728_v19, %v6251_v61  ;;  %v6254_v25 = vadd.f32 %v6253_v63, %v6252_v62  ;;  %1576 = vadd.xlane.f32.xlu1 %v1571_v21  ;;  %v6781_v19 = vld [vmem:[#allocation10 + $0x40] ss:$8 sps:$4 sm:$0xff]  }
 0x7df   : > { %1701 = vmatpush1.bf16.msra.mxu1 %v6781_v19  ;;  %v1769_v61 = vld [vmem:[%s9213_s12 + $0xc0] sm:$0xff]  ;;  %v1770_v21 = vld [vmem:[%s9213_s12 + $0xc8] sm:$0xff]  ;;  %v1748_v19 = vld [vmem:[%s9213_s12 + $0x18] sm:$0xff] }
 0x7e0   : > { %9211 = vst [vmem:[#allocation27_spill] sm:$0xff] %v7850_v0  ;;  %v7853_v1 = vadd.f32 %v7739_v23, %v6254_v25  ;;  %v1568_v13 = vmul.f32 %v7850_v0, %v7850_v0  ;;  %1702 = vmatprep.subr.bf16.mxu1 %v6786_v5  ;;  %v6789_v23 = vld [vmem:[#allocation10 + $0x64] ss:$8 sps:$4 sm:$0xff]  }
 0x7e1   : > { %v1773_v62 = vld [vmem:[%s9213_s12 + $0xe0] sm:$0xff] }
 0x7e2   : > { %9212 = vst [vmem:[#allocation28_spill] sm:$0xff] %v7853_v1  ;;  %v1572_v2 = vmul.f32 %v7733_v20, %v1568_v13  ;;  %v1569_v3 = vmul.f32 %v7853_v1, %v7853_v1  ;;  %v7921_v63 = vcombine.low %v1769_v61, %v1773_v62  ;;  %v5876_v25 = vcombine.high %v1769_v61, %v1773_v62  ;;  %v1774_v13 = vld [vmem:[%s9213_s12 + $0xe8] sm:$0xff] }
 0x7e3   : > { %1703 = vmatpush1.bf16.msra.mxu1 %v6784_v6  ;;  %v1752_v6 = vld [vmem:[%s9213_s12 + $0x38] sm:$0xff] }
 0x7e4   : > { %1578 = vadd.xlane.f32.xlu0 %v1572_v2  ;;  %v1573_v4 = vmul.f32 %v7733_v20, %v1569_v3  ;;  %1704 = vmatprep.subr.bf16.mxu1 %v6789_v23  ;;  %v1745_v20 = vld [vmem:[%s9213_s12] sm:$0xff]  ;;  %9216 = vst [vmem:[#allocation31_spill] sm:$0xff] %v7921_v63  ;;  %v5877_v2 = vcombine.low %v1770_v21, %v1774_v13 }
 0x7e5   : > { %v7870_v14 = vcombine.low %v1745_v20, %v1749_v10  ;;  %v5852_v15 = vcombine.high %v1745_v20, %v1749_v10  ;;  %v5878_v3 = vcombine.high %v1770_v21, %v1774_v13  ;;  %v7947_v20 = vld [vmem:[%s9217_s11 + $0x30] sm:$0xff]  ;;  %v2245_v21 = vld [vmem:[%s9217_s11] sm:$0xff]  ;;  %v2246_v13 = vld [vmem:[%s9217_s11 + $0x8] sm:$0xff] }
 0x7e6   : > { %1580 = vadd.xlane.f32.xlu1 %v1573_v4  ;;  %v1747_v4 = vld [vmem:[%s9213_s12 + $0x10] sm:$0xff] }
 0x7e7   : > { %1705 = vmatpush1.bf16.msra.mxu1 %v6787_v7  ;;  %1953 = vmatprep.subr.bf16.mxu0 %v5852_v15  ;;  %v5856_v5 = vcombine.high %v1747_v4, %v1751_v11  ;;  %v5855_v23 = vcombine.low %v1747_v4, %v1751_v11  ;;  %v5857_v7 = vcombine.low %v1748_v19, %v1752_v6  ;;  %v7959_v15 = vld [vmem:[%s9217_s11 + $0x38] sm:$0xff]  ;;  %v2253_v11 = vld [vmem:[%s9217_s11 + $0x40] sm:$0xff] }
 0x7e8   : > { %1706 = vmatprep.subr.bf16.mxu1 %v6792_v8  ;;  %1954 = vmatpush1.bf16.msra.mxu0 %v7870_v14  ;;  %v5858_v8 = vcombine.high %v1748_v19, %v1752_v6  ;;  %v5905_v16 = vcombine.low %v7954_v12, %v7959_v15  ;;  %v2257_v19 = vld [vmem:[%s9217_s11 + $0x60] sm:$0xff]  ;;  %v2258_v6 = vld [vmem:[%s9217_s11 + $0x68] sm:$0xff] }
 0x7e9   : > { %1955 = vmatprep.subr.bf16.mxu0 %v5860_v26 }
 0x7eb   : > { %1707 = vmatpush1.bf16.msra.mxu1 %v6790_v9  ;;  %v7942_v9 = vld [vmem:[%s9217_s11 + $0x10] sm:$0xff] }
 0x7ec   : > { %2026 = vmatprep.subr.bf16.mxu1 %v5854_v24  ;;  %1956 = vmatpush1.bf16.msra.mxu0 %v7888_v29  ;;  %v5903_v10 = vcombine.low %v7942_v9, %v7947_v20  ;;  %v1759_v24 = vld [vmem:[%s9213_s12 + $0x70] sm:$0xff] }
 0x7ed   : > { %1957 = vmatprep.subr.bf16.mxu0 %v5868_v30 }
 0x7f0   : > { %1958 = vmatpush1.bf16.msra.mxu0 %v7891_v31 }
 0x7f1   : > { %1959 = vmatprep.subr.bf16.mxu0 %v5876_v25  ;;  %v2249_v25 = vld [vmem:[%s9217_s11 + $0x20] sm:$0xff] }
 0x7f4   : > { %1960 = vmatpush1.bf16.msra.mxu0 %v7921_v63 }
 0x7f5   : > { %2099 = vmatprep.subr.bf16.mxu0 %v5856_v5  ;;  %v2254_v5 = vld [vmem:[%s9217_s11 + $0x48] sm:$0xff] }
 0x869   : > { %v1575_v32 = vpop.xlane.xlu0 %1574 }
 0x86a   : > { %v1582_v33 = vmul.f32 0.125, %v1575_v32 }
 0x86b   : > { %v1577_v34 = vpop.xlane.xlu1 %1576 }
 0x86c   : > { %6905 = vrsqrt.f32 %v1582_v33  ;;  %v1583_v35 = vmul.f32 0.125, %v1577_v34 }
 0x86e   : > { %6907 = vrsqrt.f32 %v1583_v35  ;;  %v5866_v35 = vcombine.high %v1756_v27, %v1760_v28 }
 0x871   : > { %v1579_v36 = vpop.xlane.xlu0 %1578 }
 0x872   : > { %v1584_v37 = vmul.f32 0.125, %v1579_v36  ;;  %v1763_v36 = vld [vmem:[%s9213_s12 + $0x90] sm:$0xff] }
 0x873   : > { %v1581_v38 = vpop.xlane.xlu1 %1580 }
 0x874   : > { %6909 = vrsqrt.f32 %v1584_v37  ;;  %v1585_v39 = vmul.f32 0.125, %v1581_v38  ;;  %v1767_v37 = vld [vmem:[%s9213_s12 + $0xb0] sm:$0xff] }
 0x876   : > { %v6906_v40 = vpop.eup %6905  ;;  %6911 = vrsqrt.f32 %v1585_v39 }
 0x877   : > { %v1590_v45 = vmul.f32 %v6906_v40, %v7838_v53  ;;  %v5865_v40 = vcombine.low %v1756_v27, %v1760_v28  ;;  %v5907_v27 = vcombine.low %v2253_v11, %v2257_v19 }
 0x878   : > { %v6908_v41 = vpop.eup %6907 }
 0x879   : > { %v1591_v46 = vmul.f32 %v6908_v41, %v7841_v55  ;;  %v5872_v41 = vcombine.high %v1763_v36, %v1767_v37 }
 0x87b   : > { %v1594_v47 = vpack.c.bf16 %v1591_v46, %v1590_v45 }
 0x87d   : > { %1725 = vmatmul.mubr.bf16.vlgmr.msra.gmra.mrb[20].mxu1 %v1594_v47  ;;  %v1771_v47 = vld [vmem:[%s9213_s12 + $0xd0] sm:$0xff] }
 0x87e   : > { %v6910_v51 = vpop.eup %6909  ;;  %1734 = vmatprep.mubr.bf16.mxu1 %v9155_v42  ;;  %2027 = vmatpush1.bf16.msra.mxu1 %v5853_v22  ;;  %v1755_v22 = vld [vmem:[%s9213_s12 + $0x50] sm:$0xff] }
 0x87f   : > { %2028 = vmatprep.subr.bf16.mxu1 %v5862_v48  ;;  %v1592_v57 = vmul.f32 %v6910_v51, %v7850_v0  ;;  %v5864_v34 = vcombine.high %v1755_v22, %v1759_v24  ;;  %v5863_v38 = vcombine.low %v1755_v22, %v1759_v24  ;;  %v1775_v48 = vld [vmem:[%s9213_s12 + $0xf0] sm:$0xff]  ;;  %v5874_v51 = vcombine.high %v1764_v43, %v1768_v44  ;;  %v2262_v24 = vld [vmem:[%s9217_s11 + $0x88] sm:$0xff] }
 0x880   : > { %v6912_v56 = vpop.eup %6911  ;;  %v5879_v61 = vcombine.low %v1771_v47, %v1775_v48  ;;  %v5910_v22 = vcombine.high %v2254_v5, %v2258_v6 }
 0x881   : > { %v1593_v58 = vmul.f32 %v6912_v56, %v7853_v1 }
 0x882   : > { %2029 = vmatpush1.bf16.msra.mxu1 %v5861_v52  ;;  %v1772_v52 = vld [vmem:[%s9213_s12 + $0xd8] sm:$0xff] }
 0x883   : > { %v1595_v60 = vpack.c.bf16 %v1593_v58, %v1592_v57  ;;  %2030 = vmatprep.subr.bf16.mxu1 %v5870_v54  ;;  %v1776_v54 = vld [vmem:[%s9213_s12 + $0xf8] sm:$0xff]  ;;  %v5871_v57 = vcombine.low %v1763_v36, %v1767_v37  ;;  %v5873_v58 = vcombine.low %v1764_v43, %v1768_v44  ;;  %v2270_v36 = vld [vmem:[%s9217_s11 + $0xc8] sm:$0xff] }
 0x884   : > { %v5881_v62 = vcombine.low %v1772_v52, %v1776_v54  ;;  %v2274_v37 = vld [vmem:[%s9217_s11 + $0xe8] sm:$0xff] }
 0x885   : > { %1735 = vmatmul.mubr.bf16.gmra.mrb[24].mxu1 %v1595_v60  ;;  %v5882_v60 = vcombine.high %v1772_v52, %v1776_v54  ;;  %v5925_v44 = vcombine.low %v2270_v36, %v2274_v37  ;;  %v6914_v54 = vld [vmem:[#allocation2 + $0x8] sm:$0xff] }
 0x886   : > { %2031 = vmatpush1.bf16.msra.mxu1 %v5869_v59  ;;  %2058 = vmatprep.mubr.bf16.mxu1 %v9155_v42  ;;  %v5880_v59 = vcombine.high %v1771_v47, %v1775_v48  ;;  %v2255_v47 = vld [vmem:[%s9217_s11 + $0x50] sm:$0xff]  ;;  %v2256_v48 = vld [vmem:[%s9217_s11 + $0x58] sm:$0xff] }
 0x887   : > { %2032 = vmatprep.subr.bf16.mxu1 %v5878_v3  ;;  %v5900_v3 = vcombine.high %v2245_v21, %v2249_v25 }
 0x88a   : > { %2033 = vmatpush1.bf16.msra.mxu1 %v5877_v2  ;;  %v2250_v2 = vld [vmem:[%s9217_s11 + $0x28] sm:$0xff] }
 0x88b   : > { %2172 = vmatprep.subr.bf16.mxu1 %v5858_v8  ;;  %v5902_v4 = vcombine.high %v2246_v13, %v2250_v2  ;;  %v5901_v8 = vcombine.low %v2246_v13, %v2250_v2  ;;  %v2268_v13 = vld [vmem:[%s9217_s11 + $0xb8] sm:$0xff] }
 0x950   : > { %v1726_v17 = vpop.f32.mrb[20].mxu1 }
 0x951   : > { %v1728_v18 = vpop.f32.mrb[21].mxu1 }
 0x952   : > { %v1730_v26 = vpop.f32.mrb[22].mxu1 }
 0x953   : > { %v7975_v30 = vpack.c.bf16 %v1730_v26, %v1726_v17  ;;  %v1732_v32 = vpop.f32.mrb[23].mxu1  ;;  %v2261_v17 = vld [vmem:[%s9217_s11 + $0x80] sm:$0xff]  ;;  %v2266_v26 = vld [vmem:[%s9217_s11 + $0xa8] sm:$0xff] }
 0x954   : > { %v7977_v33 = vpack.c.bf16 %v1732_v32, %v1728_v18  ;;  %v2265_v18 = vld [vmem:[%s9217_s11 + $0xa0] sm:$0xff]  ;;  %v5909_v32 = vcombine.low %v2254_v5, %v2258_v6  ;;  %v6915_v5 = vld [vmem:[#allocation2 + $0x10] sm:$0xff] }
 0x955   : > { %2279 = vrot.lane.b32.xlu0 %v7975_v30, %s9218_s20  ;;  %5883 = vmatmul.mubr.msk.bf16.vlgmr.msra.gmra.mrb[20].mxu0 %vm696_vm0, %v7975_v30  ;;  %v5916_v28 = vcombine.high %v2261_v17, %v2265_v18 }
 0x956   : > { %5887 = vmatmul.mubr.msk.bf16.vlgmr.msra.gmra.mrb[28].mxu1 %vm696_vm0, %v7975_v30  ;;  %1995 = vmatprep.mubr.bf16.mxu0 %v9155_v42 }
 0x957   : > { %2068 = vmatprep.mubr.bf16.mxu1 %v9155_v42  ;;  %2100 = vmatpush1.bf16.msra.mxu0 %v5855_v23  ;;  %v5899_v23 = vcombine.low %v2245_v21, %v2249_v25  ;;  %v2267_v21 = vld [vmem:[%s9217_s11 + $0xb0] sm:$0xff]  ;;  %v2264_v25 = vld [vmem:[%s9217_s11 + $0x98] sm:$0xff] }
 0x958   : > { %v1736_v39 = vpop.f32.mrb[24].mxu1  ;;  %2173 = vmatpush1.bf16.msra.mxu1 %v5857_v7  ;;  %2101 = vmatprep.subr.bf16.mxu0 %v5864_v34  ;;  %v5908_v7 = vcombine.high %v2253_v11, %v2257_v19  ;;  %v2273_v34 = vld [vmem:[%s9217_s11 + $0xe0] sm:$0xff]  ;;  %v5922_v11 = vcombine.high %v2264_v25, %v2268_v13  ;;  %v2271_v19 = vld [vmem:[%s9217_s11 + $0xd0] sm:$0xff] }
 0x959   : > { %v1738_v45 = vpop.f32.mrb[25].mxu1  ;;  %2174 = vmatprep.subr.bf16.mxu1 %v5866_v35  ;;  %v5918_v35 = vcombine.high %v2262_v24, %v2266_v26 }
 0x95a   : > { %v1740_v46 = vpop.f32.mrb[26].mxu1 }
 0x95b   : > { %v8005_v49 = vpack.c.bf16 %v1740_v46, %v1736_v39  ;;  %v1742_v50 = vpop.f32.mrb[27].mxu1  ;;  %2102 = vmatpush1.bf16.msra.mxu0 %v5863_v38  ;;  %v5915_v38 = vcombine.low %v2261_v17, %v2265_v18  ;;  %v5906_v46 = vcombine.high %v7954_v12, %v7959_v15  ;;  %v2661_v18 = vld [vmem:[%s9220_s28] sm:$0xff] }
 0x95c   : > { %v8013_v56 = vpack.c.bf16 %v1742_v50, %v1738_v45  ;;  %2175 = vmatpush1.bf16.msra.mxu1 %v5865_v40  ;;  %2103 = vmatprep.subr.bf16.mxu0 %v5872_v41  ;;  %v5917_v40 = vcombine.low %v2262_v24, %v2266_v26  ;;  %v5926_v41 = vcombine.high %v2270_v36, %v2274_v37  ;;  %v6043_v50 = vld [vmem:[%s9219_s4] ss:$0 sm:$0xff]  ;;  %v2662_v26 = vld [vmem:[%s9220_s28 + $0x8] sm:$0xff] }
 0x95d   : > { %2281 = vrot.lane.b32.xlu1 %v8005_v49, %s9218_s20  ;;  %5884 = vmatmul.mubr.msk.bf16.gmra.mrb[24].mxu0 %vm696_vm0, %v8005_v49  ;;  %v5904_v45 = vcombine.high %v7942_v9, %v7947_v20  ;;  %v3954_v6 = vmul.f32 %v6915_v5, %v6043_v50  ;;  %v2275_v9 = vld [vmem:[%s9217_s11 + $0xf0] sm:$0xff]  ;;  %v2272_v20 = vld [vmem:[%s9217_s11 + $0xd8] sm:$0xff]  ;;  %v2665_v24 = vld [vmem:[%s9220_s28 + $0x20] sm:$0xff] }
 0x95e   : > { %5888 = vmatmul.mubr.msk.bf16.gmra.mrb[32].mxu1 %vm696_vm0, %v8005_v49  ;;  %2005 = vmatprep.mubr.bf16.mxu0 %v9155_v42  ;;  %v2669_v36 = vld [vmem:[%s9220_s28 + $0x40] sm:$0xff]  ;;  %v2675_v5 = vld [vmem:[%s9220_s28 + $0x70] sm:$0xff] }
 0x95f   : > { %2078 = vmatprep.mubr.bf16.mxu1 %v9155_v42  ;;  %2176 = vmatprep.subr.bf16.mxu1 %v5874_v51  ;;  %v6913_v51 = vld [vmem:[#allocation2] sm:$0xff]  ;;  %v3962_v12 = vsel %vm696_vm0, %v3954_v6, 0.0  ;;  %v2672_v6 = vld [vmem:[%s9220_s28 + $0x58] sm:$0xff] }
 0x960   : > { %2104 = vmatpush1.bf16.msra.mxu0 %v5871_v57  ;;  %2177 = vmatpush1.bf16.msra.mxu1 %v5873_v58  ;;  %v3952_v52 = vmul.f32 %v6913_v51, %v6043_v50  ;;  %v2673_v37 = vld [vmem:[%s9220_s28 + $0x60] sm:$0xff] }
 0x961   : > { %2695 = vrot.lane.b32.xlu1 %v7977_v33, %s9218_s20  ;;  %2105 = vmatprep.subr.bf16.mxu0 %v5880_v59  ;;  %v2263_v59 = vld [vmem:[%s9217_s11 + $0x90] sm:$0xff] }
 0x962   : > { %2178 = vmatprep.subr.bf16.mxu1 %v5882_v60  ;;  %v3956_v60 = vsel %vm696_vm0, %v3952_v52, 0.0  ;;  %v5919_v15 = vcombine.low %v2263_v59, %v2267_v21  ;;  %v2685_v52 = vld [vmem:[%s9220_s28 + $0xc0] sm:$0xff] }
 0x964   : > { %2106 = vmatpush1.bf16.msra.mxu0 %v5879_v61  ;;  %2179 = vmatpush1.bf16.msra.mxu1 %v5881_v62 }
 0x965   : > { %5885 = vmatmul.mubr.msk.bf16.gmra.mrb[28].mxu0 %vm696_vm0, %v7977_v33  ;;  %2697 = vrot.lane.b32.xlu1 %v8013_v56, %s9218_s20 }
 0x966   : > { %5889 = vmatmul.mubr.msk.bf16.gmra.mrb[36].mxu1 %vm696_vm0, %v7977_v33  ;;  %2015 = vmatprep.mubr.bf16.mxu0 %v9155_v42 }
 0x967   : > { %2088 = vmatprep.mubr.bf16.mxu1 %v9155_v42  ;;  %2449 = vmatprep.subr.bf16.mxu0 %v5900_v3 }
 0x968   : > { %2502 = vmatprep.subr.bf16.mxu1 %v5902_v4  ;;  %v5920_v4 = vcombine.high %v2263_v59, %v2267_v21  ;;  %v2667_v21 = vld [vmem:[%s9220_s28 + $0x30] sm:$0xff] }
 0x96d   : > { %5886 = vmatmul.mubr.msk.bf16.gmra.mrb[32].mxu0 %vm696_vm0, %v8013_v56 }
 0x96e   : > { %5890 = vmatmul.mubr.msk.bf16.gmra.mrb[40].mxu1 %vm696_vm0, %v8013_v56  ;;  %2131 = vmatprep.mubr.bf16.mxu0 %v9155_v42 }
 0x96f   : > { %2204 = vmatprep.mubr.bf16.mxu1 %v9155_v42 }
 0x974   : > { %3957 = vadd.xlane.f32.xlu0 %v3956_v60 }
 0x975   : > { %5891 = vmatmul.mubr.msk.bf16.vlgmr.msra.gmra.mrb[36].mxu0 %vm696_vm0, %v7975_v30 }
 0x976   : > { %5895 = vmatmul.mubr.msk.bf16.vlgmr.msra.gmra.mrb[44].mxu1 %vm696_vm0, %v7975_v30  ;;  %2141 = vmatprep.mubr.bf16.mxu0 %v9155_v42  ;;  %v2269_v30 = vld [vmem:[%s9217_s11 + $0xc0] sm:$0xff] }
 0x977   : > { %2214 = vmatprep.mubr.bf16.mxu1 %v9155_v42  ;;  %2450 = vmatpush1.bf16.msra.mxu0 %v5899_v23  ;;  %v5924_v39 = vcombine.high %v2269_v30, %v2273_v34  ;;  %v5923_v43 = vcombine.low %v2269_v30, %v2273_v34  ;;  %v6916_v23 = vld [vmem:[#allocation2 + $0x18] sm:$0xff]  ;;  %v5940_v34 = vcombine.high %v2661_v18, %v2665_v24 }
 0x978   : > { %2451 = vmatprep.subr.bf16.mxu0 %v5908_v7  ;;  %2503 = vmatpush1.bf16.msra.mxu1 %v5901_v8  ;;  %v3955_v7 = vmul.f32 %v6916_v23, %v6043_v50  ;;  %v5928_v8 = vcombine.high %v2271_v19, %v2275_v9 }
 0x979   : > { %2504 = vmatprep.subr.bf16.mxu1 %v5910_v22  ;;  %3963 = vadd.xlane.f32.xlu0 %v3962_v12 }
 0x97a   : > { %v3965_v30 = vsel %vm696_vm0, %v3955_v7, 0.0  ;;  %v2683_v7 = vld [vmem:[%s9220_s28 + $0xb0] sm:$0xff] }
 0x97b   : > { %2452 = vmatpush1.bf16.msra.mxu0 %v5907_v27  ;;  %v2666_v27 = vld [vmem:[%s9220_s28 + $0x28] sm:$0xff] }
 0x97c   : > { %2453 = vmatprep.subr.bf16.mxu0 %v5916_v28  ;;  %2505 = vmatpush1.bf16.msra.mxu1 %v5909_v32  ;;  %v5927_v28 = vcombine.low %v2271_v19, %v2275_v9  ;;  %v2671_v19 = vld [vmem:[%s9220_s28 + $0x50] sm:$0xff]  ;;  %v2676_v9 = vld [vmem:[%s9220_s28 + $0x78] sm:$0xff] }
 0x97d   : > { %5892 = vmatmul.mubr.msk.bf16.gmra.mrb[40].mxu0 %vm696_vm0, %v8005_v49  ;;  %2506 = vmatprep.subr.bf16.mxu1 %v5918_v35  ;;  %v5942_v35 = vcombine.high %v2662_v26, %v2666_v27  ;;  %v5952_v12 = vcombine.high %v2671_v19, %v2675_v5 }
 0x97e   : > { %5896 = vmatmul.mubr.msk.bf16.gmra.mrb[48].mxu1 %vm696_vm0, %v8005_v49  ;;  %2151 = vmatprep.mubr.bf16.mxu0 %v9155_v42  ;;  %v2260_v49 = vld [vmem:[%s9217_s11 + $0x78] sm:$0xff] }
 0x97f   : > { %2224 = vmatprep.mubr.bf16.mxu1 %v9155_v42  ;;  %2454 = vmatpush1.bf16.msra.mxu0 %v5915_v38  ;;  %v5914_v58 = vcombine.high %v2256_v48, %v2260_v49  ;;  %v5913_v3 = vcombine.low %v2256_v48, %v2260_v49  ;;  %v2670_v38 = vld [vmem:[%s9220_s28 + $0x48] sm:$0xff]  ;;  %v5947_v48 = vcombine.low %v2669_v36, %v2673_v37 }
 0x980   : > { %2455 = vmatprep.subr.bf16.mxu0 %v5924_v39  ;;  %2507 = vmatpush1.bf16.msra.mxu1 %v5917_v40  ;;  %v2674_v39 = vld [vmem:[%s9220_s28 + $0x68] sm:$0xff]  ;;  %v5939_v40 = vcombine.low %v2661_v18, %v2665_v24  ;;  %v5951_v18 = vcombine.low %v2671_v19, %v2675_v5  ;;  %v6820_v19 = vld [vmem:[%s9221_s16 + $0xb0] sm:$0xff]   ;;  %v6821_v5 = vld [vmem:[%s9221_s16 + $0x78] sm:$0xff]  }
 0x981   : > { %2508 = vmatprep.subr.bf16.mxu1 %v5926_v41  ;;  %3966 = vadd.xlane.f32.xlu0 %v3965_v30  ;;  %v5941_v41 = vcombine.low %v2662_v26, %v2666_v27  ;;  %v5949_v49 = vcombine.low %v2670_v38, %v2674_v39  ;;  %v2687_v27 = vld [vmem:[%s9220_s28 + $0xd0] sm:$0xff]  ;;  %v2692_v30 = vld [vmem:[%s9220_s28 + $0xf8] sm:$0xff] }
 0x983   : > { %2456 = vmatpush1.bf16.msra.mxu0 %v5923_v43  ;;  %v5948_v43 = vcombine.high %v2669_v36, %v2673_v37 }
 0x984   : > { %2509 = vmatpush1.bf16.msra.mxu1 %v5925_v44  ;;  %2555 = vmatprep.subr.bf16.mxu0 %v5904_v45  ;;  %v5950_v44 = vcombine.high %v2670_v38, %v2674_v39  ;;  %v2677_v45 = vld [vmem:[%s9220_s28 + $0x80] sm:$0xff] }
 0x985   : > { %5893 = vmatmul.mubr.msk.bf16.gmra.mrb[44].mxu0 %vm696_vm0, %v7977_v33  ;;  %2608 = vmatprep.subr.bf16.mxu1 %v5906_v46  ;;  %v2681_v46 = vld [vmem:[%s9220_s28 + $0xa0] sm:$0xff] }
 0x986   : > { %5897 = vmatmul.mubr.msk.bf16.gmra.mrb[52].mxu1 %vm696_vm0, %v7977_v33  ;;  %2161 = vmatprep.mubr.bf16.mxu0 %v9155_v42  ;;  %v2259_v33 = vld [vmem:[%s9217_s11 + $0x70] sm:$0xff] }
 0x987   : > { %2234 = vmatprep.mubr.bf16.mxu1 %v9155_v42  ;;  %v5912_v57 = vcombine.high %v2255_v47, %v2259_v33  ;;  %v5911_v2 = vcombine.low %v2255_v47, %v2259_v33  ;;  %v2678_v47 = vld [vmem:[%s9220_s28 + $0x88] sm:$0xff] }
 0x988   : > { %v2682_v33 = vld [vmem:[%s9220_s28 + $0xa8] sm:$0xff] }
 0x989   : > { %v5958_v51 = vcombine.high %v2678_v47, %v2682_v33  ;;  %v5957_v59 = vcombine.low %v2678_v47, %v2682_v33  ;;  %v6798_v47 = vld [vmem:[%s9221_s16 + $0xc8] sm:$0xff]  }
 0x98a   : > { %v6799_v33 = vld [vmem:[%s9221_s16 + $0x8] sm:$0xff]  }
 0x98d   : > { %5894 = vmatmul.mubr.msk.bf16.gmra.mrb[48].mxu0 %vm696_vm0, %v8013_v56 }
 0x98e   : > { %5898 = vmatmul.mubr.msk.bf16.gmra.mrb[56].mxu1 %vm696_vm0, %v8013_v56  ;;  %2481 = vmatprep.mubr.bf16.mxu0 %v9155_v42  ;;  %v3953_v56 = vmul.f32 %v6914_v54, %v6043_v50  ;;  %v5956_v50 = vcombine.high %v2677_v45, %v2681_v46  ;;  %v2689_v54 = vld [vmem:[%s9220_s28 + $0xe0] sm:$0xff] }
 0x98f   : > { %2534 = vmatprep.mubr.bf16.mxu1 %v9155_v42  ;;  %v5964_v60 = vcombine.high %v2685_v52, %v2689_v54 }
 0x990   : > { %v3959_v61 = vsel %vm696_vm0, %v3953_v56, 0.0  ;;  %v2686_v56 = vld [vmem:[%s9220_s28 + $0xc8] sm:$0xff] }
 0x991   : > { %3960 = vadd.xlane.f32.xlu1 %v3959_v61 }
 0x9c7   : > { %v8135_v62 = vpop.permute.xlu0 %2279 }
 0x9c8   : > { %5931 = vmatmul.mubr.msk.bf16.vlgmr.msra.gmra.mrb[52].mxu0 %vm696_vm0, %v8135_v62  ;;  %5933 = vmatmul.mubr.msk.bf16.vlgmr.msra.gmra.mrb[60].mxu1 %vm696_vm0, %v8135_v62 }
 0x9c9   : > { %2556 = vmatpush1.bf16.msra.mxu0 %v5903_v10  ;;  %2609 = vmatpush1.bf16.msra.mxu1 %v5905_v16  ;;  %v2276_v10 = vld [vmem:[%s9217_s11 + $0xf8] sm:$0xff]  ;;  %v5921_v16 = vcombine.low %v2264_v25, %v2268_v13 }
 0x9ca   : > { %2557 = vmatprep.subr.bf16.mxu0 %v5912_v57  ;;  %2610 = vmatprep.subr.bf16.mxu1 %v5914_v58  ;;  %v5930_v17 = vcombine.high %v2272_v20, %v2276_v10  ;;  %v5929_v32 = vcombine.low %v2272_v20, %v2276_v10  ;;  %v2690_v57 = vld [vmem:[%s9220_s28 + $0xe8] sm:$0xff]  ;;  %v5955_v58 = vcombine.low %v2677_v45, %v2681_v46  ;;  %v2664_v25 = vld [vmem:[%s9220_s28 + $0x18] sm:$0xff]  ;;  %v6796_v45 = vld [vmem:[%s9221_s16 + $0x80] sm:$0xff]  }
 0x9cb   : > { %2491 = vmatprep.mubr.bf16.mxu0 %v9155_v42  ;;  %2544 = vmatprep.mubr.bf16.mxu1 %v9155_v42  ;;  %v5966_v61 = vcombine.high %v2686_v56, %v2690_v57  ;;  %v2668_v13 = vld [vmem:[%s9220_s28 + $0x38] sm:$0xff]  ;;  %v6797_v46 = vld [vmem:[%s9221_s16 + $0x48] sm:$0xff]  }
 0x9cc   : > { %v5945_v10 = vcombine.low %v2664_v25, %v2668_v13 }
 0x9cd   : > { %2558 = vmatpush1.bf16.msra.mxu0 %v5911_v2  ;;  %2611 = vmatpush1.bf16.msra.mxu1 %v5913_v3  ;;  %v5963_v2 = vcombine.low %v2685_v52, %v2689_v54  ;;  %v5965_v3 = vcombine.low %v2686_v56, %v2690_v57  ;;  %v6804_v52 = vld [vmem:[%s9221_s16 + $0x90] sm:$0xff]   ;;  %v6805_v54 = vld [vmem:[%s9221_s16 + $0x58] sm:$0xff]  }
 0x9ce   : > { %2559 = vmatprep.subr.bf16.mxu0 %v5920_v4  ;;  %2612 = vmatprep.subr.bf16.mxu1 %v5922_v11  ;;  %v5946_v11 = vcombine.high %v2664_v25, %v2668_v13  ;;  %v6806_v56 = vld [vmem:[%s9221_s16 + $0xd8] sm:$0xff]   ;;  %v6814_v25 = vld [vmem:[%s9221_s16 + $0xe8] sm:$0xff]  }
 0x9cf   : > { %v8174_v22 = vpop.permute.xlu1 %2281  ;;  %v6807_v57 = vld [vmem:[%s9221_s16 + $0x18] sm:$0xff]   ;;  %v6815_v13 = vld [vmem:[%s9221_s16 + $0x28] sm:$0xff]  }
 0x9d0   : > { %5932 = vmatmul.mubr.msk.bf16.gmra.mrb[56].mxu0 %vm696_vm0, %v8174_v22  ;;  %5934 = vmatmul.mubr.msk.bf16.gmra.mrb[64].mxu1 %vm696_vm0, %v8174_v22 }
 0x9d1   : > { %2560 = vmatpush1.bf16.msra.mxu0 %v5919_v15  ;;  %2613 = vmatpush1.bf16.msra.mxu1 %v5921_v16  ;;  %v5954_v15 = vcombine.high %v2672_v6, %v2676_v9  ;;  %v2679_v16 = vld [vmem:[%s9220_s28 + $0x90] sm:$0xff] }
 0x9d2   : > { %2561 = vmatprep.subr.bf16.mxu0 %v5928_v8  ;;  %2614 = vmatprep.subr.bf16.mxu1 %v5930_v17  ;;  %v2680_v8 = vld [vmem:[%s9220_s28 + $0x98] sm:$0xff]  ;;  %v5960_v24 = vcombine.high %v2679_v16, %v2683_v7 }
 0x9d3   : > { %2587 = vmatprep.mubr.bf16.mxu0 %v9155_v42  ;;  %2640 = vmatprep.mubr.bf16.mxu1 %v9155_v42  ;;  %v2696_v23 = vpop.permute.xlu1 %2695  ;;  %v2684_v17 = vld [vmem:[%s9220_s28 + $0xb8] sm:$0xff] }
 0x9d4   : > { %v5962_v26 = vcombine.high %v2680_v8, %v2684_v17 }
 0x9d5   : > { %2562 = vmatpush1.bf16.msra.mxu0 %v5927_v28  ;;  %2615 = vmatpush1.bf16.msra.mxu1 %v5929_v32  ;;  %v2691_v28 = vld [vmem:[%s9220_s28 + $0xf0] sm:$0xff]  ;;  %v2688_v32 = vld [vmem:[%s9220_s28 + $0xd8] sm:$0xff] }
 0x9d6   : > { %2865 = vmatprep.subr.bf16.mxu0 %v5940_v34  ;;  %2918 = vmatprep.subr.bf16.mxu1 %v5942_v35  ;;  %v5959_v34 = vcombine.low %v2679_v16, %v2683_v7  ;;  %v5961_v35 = vcombine.low %v2680_v8, %v2684_v17  ;;  %v5968_v36 = vcombine.high %v2687_v27, %v2691_v28 }
 0x9d7   : > { %v5970_v37 = vcombine.high %v2688_v32, %v2692_v30  ;;  %v2698_v38 = vpop.permute.xlu1 %2697  ;;  %v5967_v39 = vcombine.low %v2687_v27, %v2691_v28 }
 0x9d8   : > { %5935 = vmatmul.mubr.msk.bf16.vlgmr.msra.gmra.mrb[60].mxu0 %vm696_vm0, %v8135_v62  ;;  %5937 = vmatmul.mubr.msk.bf16.vlgmr.msra.gmra.mrb[68].mxu1 %vm696_vm0, %v8135_v62  ;;  %v2663_v62 = vld [vmem:[%s9220_s28 + $0x10] sm:$0xff] }
 0x9d9   : > { %2866 = vmatpush1.bf16.msra.mxu0 %v5939_v40  ;;  %2919 = vmatpush1.bf16.msra.mxu1 %v5941_v41  ;;  %v5944_v4 = vcombine.high %v2663_v62, %v2667_v21  ;;  %v5943_v20 = vcombine.low %v2663_v62, %v2667_v21  ;;  %v5969_v40 = vcombine.low %v2688_v32, %v2692_v30  ;;  %v6793_v41 = vld [vmem:[%s9221_s16 + $0x40] sm:$0xff]   ;;  %v6813_v21 = vld [vmem:[%s9221_s16 + $0x68] sm:$0xff]  }
 0x9da   : > { %2867 = vmatprep.subr.bf16.mxu0 %v5948_v43  ;;  %2920 = vmatprep.subr.bf16.mxu1 %v5950_v44  ;;  %v6794_v43 = vld [vmem:[%s9221_s16 + $0xc0] sm:$0xff]  }
 0x9db   : > { %2597 = vmatprep.mubr.bf16.mxu0 %v9155_v42  ;;  %2650 = vmatprep.mubr.bf16.mxu1 %v9155_v42  ;;  %v6795_v44 = vld [vmem:[%s9221_s16] sm:$0xff]  }
 0x9dc   : > { %v6812_v62 = vld [vmem:[%s9221_s16 + $0xa0] sm:$0xff]  }
 0x9dd   : > { %2868 = vmatpush1.bf16.msra.mxu0 %v5947_v48  ;;  %2921 = vmatpush1.bf16.msra.mxu1 %v5949_v49  ;;  %v6800_v48 = vld [vmem:[%s9221_s16 + $0x88] sm:$0xff]   ;;  %v6801_v49 = vld [vmem:[%s9221_s16 + $0x50] sm:$0xff]  }
 0x9de   : > { %2869 = vmatprep.subr.bf16.mxu0 %v5956_v50  ;;  %2922 = vmatprep.subr.bf16.mxu1 %v5958_v51  ;;  %v6802_v50 = vld [vmem:[%s9221_s16 + $0xd0] sm:$0xff]  }
 0x9df   : > { %v6803_v51 = vld [vmem:[%s9221_s16 + $0x10] sm:$0xff]  }
 0x9e0   : > { %5936 = vmatmul.mubr.msk.bf16.gmra.mrb[64].mxu0 %vm696_vm0, %v8174_v22  ;;  %5938 = vmatmul.mubr.msk.bf16.gmra.mrb[72].mxu1 %vm696_vm0, %v8174_v22  ;;  %v5953_v22 = vcombine.low %v2672_v6, %v2676_v9  ;;  %v6822_v6 = vld [vmem:[%s9221_s16 + $0xf8] sm:$0xff]  }
 0x9e1   : > { %2870 = vmatpush1.bf16.msra.mxu0 %v5955_v58  ;;  %2923 = vmatpush1.bf16.msra.mxu1 %v5957_v59  ;;  %v6808_v58 = vld [vmem:[%s9221_s16 + $0x98] sm:$0xff]   ;;  %v6809_v59 = vld [vmem:[%s9221_s16 + $0x60] sm:$0xff]  }
 0x9e2   : > { %2871 = vmatprep.subr.bf16.mxu0 %v5964_v60  ;;  %2924 = vmatprep.subr.bf16.mxu1 %v5966_v61  ;;  %v6810_v60 = vld [vmem:[%s9221_s16 + $0xe0] sm:$0xff]   ;;  %v6823_v9 = vld [vmem:[%s9221_s16 + $0x38] sm:$0xff]  }
 0x9e3   : > { %2897 = vmatprep.mubr.bf16.mxu0 %v9155_v42  ;;  %2950 = vmatprep.mubr.bf16.mxu1 %v9155_v42  ;;  %v6811_v61 = vld [vmem:[%s9221_s16 + $0x20] sm:$0xff]  }
 0x9e5   : > { %2872 = vmatpush1.bf16.msra.mxu0 %v5963_v2  ;;  %2925 = vmatpush1.bf16.msra.mxu1 %v5965_v3  ;;  %v6816_v2 = vld [vmem:[%s9221_s16 + $0xa8] sm:$0xff]   ;;  %v6817_v3 = vld [vmem:[%s9221_s16 + $0x70] sm:$0xff]  }
 0x9e6   : > { %2971 = vmatprep.subr.bf16.mxu0 %v5944_v4  ;;  %3024 = vmatprep.subr.bf16.mxu1 %v5946_v11  ;;  %v6818_v4 = vld [vmem:[%s9221_s16 + $0xf0] sm:$0xff]  }
 0x9e7   : > { %v6819_v11 = vld [vmem:[%s9221_s16 + $0x30] sm:$0xff]  }
 0x9e8   : > { %5971 = vmatmul.mubr.msk.bf16.vlgmr.msra.gmra.mrb[68].mxu0 %vm696_vm0, %v2696_v23  ;;  %5973 = vmatmul.mubr.msk.bf16.vlgmr.msra.gmra.mrb[76].mxu1 %vm696_vm0, %v2696_v23 }
 0x9e9   : > { %2972 = vmatpush1.bf16.msra.mxu0 %v5943_v20  ;;  %3025 = vmatpush1.bf16.msra.mxu1 %v5945_v10  ;;  %v6824_v20 = vld [vmem:[%s9221_s16 + $0xb8] sm:$0xff]  }
 0x9ea   : > { %2973 = vmatprep.subr.bf16.mxu0 %v5952_v12  ;;  %3026 = vmatprep.subr.bf16.mxu1 %v5954_v15 }
 0x9eb   : > { %2907 = vmatprep.mubr.bf16.mxu0 %v9155_v42  ;;  %2960 = vmatprep.mubr.bf16.mxu1 %v9155_v42 }
 0x9ed   : > { %2974 = vmatpush1.bf16.msra.mxu0 %v5951_v18  ;;  %3027 = vmatpush1.bf16.msra.mxu1 %v5953_v22 }
 0x9ee   : > { %2975 = vmatprep.subr.bf16.mxu0 %v5960_v24  ;;  %3028 = vmatprep.subr.bf16.mxu1 %v5962_v26 }
 0x9f0   : > { %5972 = vmatmul.mubr.msk.bf16.gmra.mrb[72].mxu0 %vm696_vm0, %v2698_v38  ;;  %5974 = vmatmul.mubr.msk.bf16.gmra.mrb[80].mxu1 %vm696_vm0, %v2698_v38 }
 0x9f1   : > { %2976 = vmatpush1.bf16.msra.mxu0 %v5959_v34  ;;  %3029 = vmatpush1.bf16.msra.mxu1 %v5961_v35  ;;  %v6825_v34 = vld [vmem:[%s9221_s16 + $0x140] sm:$0xff]  }
 0x9f2   : > { %2977 = vmatprep.subr.bf16.mxu0 %v5968_v36  ;;  %3030 = vmatprep.subr.bf16.mxu1 %v5970_v37  ;;  %v6827_v35 = vld [vmem:[%s9221_s16 + $0x1c0] sm:$0xff]  }
 0x9f3   : > { %3003 = vmatprep.mubr.bf16.mxu0 %v9155_v42  ;;  %3056 = vmatprep.mubr.bf16.mxu1 %v9155_v42 }
 0x9f5   : > { %2978 = vmatpush1.bf16.msra.mxu0 %v5967_v39  ;;  %3031 = vmatpush1.bf16.msra.mxu1 %v5969_v40 }
 0x9f6   : > { %6255 = vmatprep.subr.bf16.mxu0 %v6793_v41  ;;  %6295 = vmatprep.subr.bf16.mxu1 %v6794_v43 }
 0x9f8   : > { %5975 = vmatmul.mubr.msk.bf16.vlgmr.msra.gmra.mrb[76].mxu0 %vm696_vm0, %v2696_v23  ;;  %5977 = vmatmul.mubr.msk.bf16.vlgmr.msra.gmra.mrb[84].mxu1 %vm696_vm0, %v2696_v23 }
 0x9f9   : > { %3013 = vmatprep.mubr.bf16.mxu0 %v9155_v42  ;;  %3066 = vmatprep.mubr.bf16.mxu1 %v9155_v42 }
 0x9fa   : > { %6256 = vmatpush3.bf16.msra.mxu0 %v6795_v44  ;;  %6296 = vmatpush3.bf16.msra.mxu1 %v6796_v45 }
 0x9fb   : > { %6257 = vmatprep.subr.bf16.mxu0 %v6797_v46  ;;  %6297 = vmatprep.subr.bf16.mxu1 %v6798_v47 }
 0x9fe   : > { %6258 = vmatpush3.bf16.msra.mxu0 %v6799_v33  ;;  %6298 = vmatpush3.bf16.msra.mxu1 %v6800_v48 }
 0x9ff   : > { %6259 = vmatprep.subr.bf16.mxu0 %v6801_v49  ;;  %6299 = vmatprep.subr.bf16.mxu1 %v6802_v50 }
 0xa00   : > { %5976 = vmatmul.mubr.msk.bf16.gmra.mrb[80].mxu0 %vm696_vm0, %v2698_v38  ;;  %5978 = vmatmul.mubr.msk.bf16.gmra.mrb[88].mxu1 %vm696_vm0, %v2698_v38 }
 0xa02   : > { %6260 = vmatpush3.bf16.msra.mxu0 %v6803_v51  ;;  %6300 = vmatpush3.bf16.msra.mxu1 %v6804_v52 }
 0xa03   : > { %6261 = vmatprep.subr.bf16.mxu0 %v6805_v54  ;;  %6301 = vmatprep.subr.bf16.mxu1 %v6806_v56 }
 0xa06   : > { %6262 = vmatpush3.bf16.msra.mxu0 %v6807_v57  ;;  %6302 = vmatpush3.bf16.msra.mxu1 %v6808_v58 }
 0xa07   : > { %6263 = vmatprep.subr.bf16.mxu0 %v6809_v59  ;;  %6303 = vmatprep.subr.bf16.mxu1 %v6810_v60 }
 0xa0a   : > { %6264 = vmatpush3.bf16.msra.mxu0 %v6811_v61  ;;  %6304 = vmatpush3.bf16.msra.mxu1 %v6812_v62 }
 0xa0b   : > { %6265 = vmatprep.subr.bf16.mxu0 %v6813_v21  ;;  %6305 = vmatprep.subr.bf16.mxu1 %v6814_v25 }
 0xa0e   : > { %6266 = vmatpush3.bf16.msra.mxu0 %v6815_v13  ;;  %6306 = vmatpush3.bf16.msra.mxu1 %v6816_v2 }
 0xa0f   : > { %6267 = vmatprep.subr.bf16.mxu0 %v6817_v3  ;;  %6307 = vmatprep.subr.bf16.mxu1 %v6818_v4 }
 0xa12   : > { %6268 = vmatpush3.bf16.msra.mxu0 %v6819_v11  ;;  %6308 = vmatpush3.bf16.msra.mxu1 %v6820_v19 }
 0xa13   : > { %6269 = vmatprep.subr.bf16.mxu0 %v6821_v5  ;;  %6309 = vmatprep.subr.bf16.mxu1 %v6822_v6 }
 0xa16   : > { %6270 = vmatpush3.bf16.msra.mxu0 %v6823_v9  ;;  %6310 = vmatpush3.bf16.msra.mxu1 %v6824_v20 }
 0xa17   : > { %6335 = vmatprep.subr.bf16.mxu0 %v6825_v34  ;;  %6375 = vmatprep.subr.bf16.mxu1 %v6827_v35 }
 0xa28   : > { %v8398_v10 = vpop.f32.mrb[20].mxu0 }
 0xa29   : > { %v8400_v12 = vpop.f32.mrb[28].mxu1  ;;  %v8402_v15 = vpop.f32.mrb[21].mxu0 }
 0xa2a   : > { %v8404_v16 = vpop.f32.mrb[29].mxu1  ;;  %v8406_v23 = vpop.f32.mrb[22].mxu0 }
 0xa2b   : > { %v8408_v7 = vpop.f32.mrb[30].mxu1  ;;  %v8410_v8 = vpop.f32.mrb[23].mxu0 }
 0xa2c   : > { %v8412_v17 = vpop.f32.mrb[31].mxu1 }
 0xa30   : > { %v8414_v18 = vpop.f32.mrb[24].mxu0 }
 0xa31   : > { %v8416_v22 = vpop.f32.mrb[32].mxu1  ;;  %v8418_v24 = vpop.f32.mrb[25].mxu0 }
 0xa32   : > { %v8420_v26 = vpop.f32.mrb[33].mxu1  ;;  %v8422_v27 = vpop.f32.mrb[26].mxu0 }
 0xa33   : > { %v8424_v28 = vpop.f32.mrb[34].mxu1  ;;  %v8426_v32 = vpop.f32.mrb[27].mxu0 }
 0xa34   : > { %v8428_v30 = vpop.f32.mrb[35].mxu1 }
 0xa38   : > { %v8436_v36 = vpop.f32.mrb[28].mxu0 }
 0xa39   : > { %v8438_v37 = vpop.f32.mrb[36].mxu1  ;;  %v8440_v38 = vpop.f32.mrb[29].mxu0 }
 0xa3a   : > { %v8442_v39 = vpop.f32.mrb[37].mxu1  ;;  %v8444_v40 = vpop.f32.mrb[30].mxu0 }
 0xa3b   : > { %v8446_v41 = vpop.f32.mrb[38].mxu1  ;;  %v8448_v43 = vpop.f32.mrb[31].mxu0 }
 0xa3c   : > { %v8450_v44 = vpop.f32.mrb[39].mxu1 }
 0xa40   : > { %v8452_v45 = vpop.f32.mrb[32].mxu0 }
 0xa41   : > { %v8454_v46 = vpop.f32.mrb[40].mxu1  ;;  %v8456_v47 = vpop.f32.mrb[33].mxu0 }
 0xa42   : > { %v8458_v33 = vpop.f32.mrb[41].mxu1  ;;  %v8460_v48 = vpop.f32.mrb[34].mxu0 }
 0xa43   : > { %v8462_v49 = vpop.f32.mrb[42].mxu1  ;;  %v8464_v50 = vpop.f32.mrb[35].mxu0 }
 0xa44   : > { %v8466_v51 = vpop.f32.mrb[43].mxu1 }
 0xa45   : > { %9222 = vst [vmem:[#allocation32_spill] sm:$0xff] %v8466_v51 }
 0xa48   : > { %v8468_v52 = vpop.f32.mrb[36].mxu0 }
 0xa49   : > { %v8470_v54 = vpop.f32.mrb[44].mxu1  ;;  %v8472_v56 = vpop.f32.mrb[37].mxu0 }
 0xa4a   : > { %v8474_v57 = vpop.f32.mrb[45].mxu1  ;;  %v8476_v58 = vpop.f32.mrb[38].mxu0 }
 0xa4b   : > { %v8478_v59 = vpop.f32.mrb[46].mxu1  ;;  %v8480_v60 = vpop.f32.mrb[39].mxu0 }
 0xa4c   : > { %v8482_v61 = vpop.f32.mrb[47].mxu1 }
 0xa50   : > { %v8484_v62 = vpop.f32.mrb[40].mxu0 }
 0xa51   : > { %v8486_v21 = vpop.f32.mrb[48].mxu1  ;;  %v8488_v25 = vpop.f32.mrb[41].mxu0 }
 0xa52   : > { %v8490_v13 = vpop.f32.mrb[49].mxu1  ;;  %v8492_v2 = vpop.f32.mrb[42].mxu0 }
 0xa53   : > { %v8494_v3 = vpop.f32.mrb[50].mxu1  ;;  %v8496_v4 = vpop.f32.mrb[43].mxu0 }
 0xa54   : > { %v8498_v11 = vpop.f32.mrb[51].mxu1 }
 0xa58   : > { %v8500_v19 = vpop.f32.mrb[44].mxu0 }
 0xa59   : > { %9223 = vst [vmem:[#allocation33_spill] sm:$0xff] %v8500_v19  ;;  %v8502_v5 = vpop.f32.mrb[52].mxu1  ;;  %v8504_v6 = vpop.f32.mrb[45].mxu0 }
 0xa5a   : > { %9224 = vst [vmem:[#allocation34_spill] sm:$0xff] %v8502_v5  ;;  %9225 = vst [vmem:[#allocation35_spill] sm:$0xff] %v8504_v6  ;;  %v8506_v9 = vpop.f32.mrb[53].mxu1  ;;  %v8508_v20 = vpop.f32.mrb[46].mxu0 }
 0xa5b   : > { %9226 = vst [vmem:[#allocation36_spill] sm:$0xff] %v8506_v9  ;;  %9227 = vst [vmem:[#allocation37_spill] sm:$0xff] %v8508_v20  ;;  %v8510_v34 = vpop.f32.mrb[54].mxu1  ;;  %v8512_v35 = vpop.f32.mrb[47].mxu0 }
 0xa5c   : > { %9228 = vst [vmem:[#allocation38_spill] sm:$0xff] %v8510_v34  ;;  %9229 = vst [vmem:[#allocation39_spill] sm:$0xff] %v8512_v35  ;;  %v8514_v42 = vpop.f32.mrb[55].mxu1 }
 0xa5d   : > { %9230 = vst [vmem:[#allocation40_spill] sm:$0xff] %v8514_v42 }
 0xa60   : > { %v8516_v55 = vpop.f32.mrb[48].mxu0 }
 0xa61   : > { %9231 = vst [vmem:[#allocation41_spill] sm:$0xff] %v8516_v55  ;;  %v8518_v53 = vpop.f32.mrb[56].mxu1  ;;  %v8520_v1 = vpop.f32.mrb[49].mxu0 }
 0xa62   : > { %9232 = vst [vmem:[#allocation42_spill] sm:$0xff] %v8518_v53  ;;  %9233 = vst [vmem:[#allocation43_spill] sm:$0xff] %v8520_v1  ;;  %v8522_v0 = vpop.f32.mrb[57].mxu1  ;;  %v8524_v63 = vpop.f32.mrb[50].mxu0 }
 0xa63   : > { %9234 = vst [vmem:[#allocation44_spill] sm:$0xff] %v8522_v0  ;;  %9235 = vst [vmem:[#allocation45_spill] sm:$0xff] %v8524_v63  ;;  %v8526_v31 = vpop.f32.mrb[58].mxu1  ;;  %v8528_v29 = vpop.f32.mrb[51].mxu0 }
 0xa64   : > { %9236 = vst [vmem:[#allocation46_spill] sm:$0xff] %v8526_v31  ;;  %9237 = vst [vmem:[#allocation47_spill] sm:$0xff] %v8528_v29  ;;  %v8530_v20 = vpop.f32.mrb[59].mxu1 }
 0xa65   : > { %9238 = vst [vmem:[#allocation48_spill] sm:$0xff] %v8530_v20 }
 0xa9b   : > { %v2483_v34 = vpop.f32.mrb[52].mxu0  ;;  %v2536_v35 = vpop.f32.mrb[60].mxu1 }
 0xa9c   : > { %v3077_v42 = vmul.f32 %v2483_v34, %v8398_v10  ;;  %v3079_v55 = vmul.f32 %v2536_v35, %v8400_v12  ;;  %v2485_v9 = vpop.f32.mrb[53].mxu0  ;;  %v2538_v53 = vpop.f32.mrb[61].mxu1 }
 0xa9d   : > { %v3078_v1 = vmul.f32 %v2485_v9, %v8402_v15  ;;  %v3080_v0 = vmul.f32 %v2538_v53, %v8404_v16  ;;  %v2487_v6 = vpop.f32.mrb[54].mxu0  ;;  %v2540_v63 = vpop.f32.mrb[62].mxu1  ;;  %v6826_v53 = vld [vmem:[%s9221_s16 + $0x100] sm:$0xff]   ;;  %v6831_v16 = vld [vmem:[%s9221_s16 + $0x1c8] sm:$0xff]  }
 0xa9e   : > { %v3085_v31 = vmul.f32 %v2487_v6, %v8406_v23  ;;  %v3087_v29 = vmul.f32 %v2540_v63, %v8408_v7  ;;  %v2489_v5 = vpop.f32.mrb[55].mxu0  ;;  %v2542_v20 = vpop.f32.mrb[63].mxu1  ;;  %v6828_v15 = vld [vmem:[%s9221_s16 + $0x180] sm:$0xff]   ;;  %v6829_v63 = vld [vmem:[%s9221_s16 + $0x148] sm:$0xff]   ;;  %v6835_v6 = vld [vmem:[%s9221_s16 + $0x1d0] sm:$0xff]  }
 0xa9f   : > { %v3086_v19 = vmul.f32 %v2489_v5, %v8410_v8  ;;  %v3088_v10 = vmul.f32 %v2542_v20, %v8412_v17 }
 0xaa0   : > { %v3141_v34 = vpack.c.bf16 %v3085_v31, %v3077_v42  ;;  %v3143_v12 = vpack.c.bf16 %v3087_v29, %v3079_v55 }
 0xaa1   : > { %v3142_v35 = vpack.c.bf16 %v3086_v19, %v3078_v1  ;;  %v3144_v51 = vpack.c.bf16 %v3088_v10, %v3080_v0 }
 0xaa3   : > { %v2493_v42 = vpop.f32.mrb[56].mxu0  ;;  %v2546_v55 = vpop.f32.mrb[64].mxu1  ;;  %3717 = vmatprep.mubr.bf16.mxu0 %v3142_v35  ;;  %3782 = vmatprep.mubr.bf16.mxu1 %v3144_v51  ;;  %v6830_v51 = vld [vmem:[%s9221_s16 + $0x108] sm:$0xff]   ;;  %v6836_v35 = vld [vmem:[%s9221_s16 + $0x190] sm:$0xff]  }
 0xaa4   : > { %v3093_v0 = vmul.f32 %v2493_v42, %v8414_v18  ;;  %v3095_v1 = vmul.f32 %v2546_v55, %v8416_v22  ;;  %v2495_v29 = vpop.f32.mrb[57].mxu0  ;;  %v2548_v31 = vpop.f32.mrb[65].mxu1  ;;  %3718 = vmatmul.mubr.bf16.vlgmr.msra.gmra.mrb[84].mxu0 %v3141_v34  ;;  %3783 = vmatmul.mubr.bf16.vlgmr.msra.gmra.mrb[92].mxu1 %v3143_v12  ;;  %v6832_v18 = vld [vmem:[%s9221_s16 + $0x188] sm:$0xff]   ;;  %v6834_v12 = vld [vmem:[%s9221_s16 + $0x110] sm:$0xff]  }
 0xaa5   : > { %v3094_v23 = vmul.f32 %v2495_v29, %v8418_v24  ;;  %v3096_v7 = vmul.f32 %v2548_v31, %v8420_v26  ;;  %v2497_v8 = vpop.f32.mrb[58].mxu0  ;;  %v2550_v17 = vpop.f32.mrb[66].mxu1  ;;  %6336 = vmatpush3.bf16.msra.mxu0 %v6826_v53  ;;  %6376 = vmatpush3.bf16.msra.mxu1 %v6828_v15  ;;  %v6833_v26 = vld [vmem:[%s9221_s16 + $0x150] sm:$0xff]  }
 0xaa6   : > { %v3101_v22 = vmul.f32 %v2497_v8, %v8422_v27  ;;  %v3103_v19 = vmul.f32 %v2550_v17, %v8424_v28  ;;  %v2499_v5 = vpop.f32.mrb[59].mxu0  ;;  %v2552_v24 = vpop.f32.mrb[67].mxu1  ;;  %6337 = vmatprep.subr.bf16.mxu0 %v6829_v63  ;;  %6377 = vmatprep.subr.bf16.mxu1 %v6831_v16  ;;  %v6841_v8 = vld [vmem:[%s9221_s16 + $0x160] sm:$0xff]  }
 0xaa7   : > { %v3102_v9 = vmul.f32 %v2499_v5, %v8426_v32  ;;  %v3104_v20 = vmul.f32 %v2552_v24, %v8428_v30  ;;  %v6837_v32 = vld [vmem:[%s9221_s16 + $0x158] sm:$0xff]   ;;  %v6843_v17 = vld [vmem:[%s9221_s16 + $0x1e0] sm:$0xff]   ;;  %v6845_v5 = vld [vmem:[%s9221_s16 + $0x168] sm:$0xff]  }
 0xaa8   : > { %v3149_v10 = vpack.c.bf16 %v3101_v22, %v3093_v0  ;;  %v3151_v27 = vpack.c.bf16 %v3103_v19, %v3095_v1  ;;  %v6839_v30 = vld [vmem:[%s9221_s16 + $0x1d8] sm:$0xff]   ;;  %v6847_v24 = vld [vmem:[%s9221_s16 + $0x1e8] sm:$0xff]  }
 0xaa9   : > { %v3150_v34 = vpack.c.bf16 %v3102_v9, %v3094_v23  ;;  %v3152_v28 = vpack.c.bf16 %v3104_v20, %v3096_v7  ;;  %6338 = vmatpush3.bf16.msra.mxu0 %v6830_v51  ;;  %6378 = vmatpush3.bf16.msra.mxu1 %v6832_v18 }
 0xaaa   : > { %6339 = vmatprep.subr.bf16.mxu0 %v6833_v26  ;;  %6379 = vmatprep.subr.bf16.mxu1 %v6835_v6 }
 0xaab   : > { %v2589_v53 = vpop.f32.mrb[60].mxu0  ;;  %v2642_v15 = vpop.f32.mrb[68].mxu1  ;;  %3725 = vmatprep.mubr.bf16.mxu0 %v3150_v34  ;;  %3790 = vmatprep.mubr.bf16.mxu1 %v3152_v28 }
 0xaac   : > { %v8585_v63 = vmul.f32 %v2589_v53, %v8468_v52  ;;  %v8588_v16 = vmul.f32 %v2642_v15, %v8470_v54  ;;  %v2591_v42 = vpop.f32.mrb[61].mxu0  ;;  %v2644_v55 = vpop.f32.mrb[69].mxu1  ;;  %3726 = vmatmul.mubr.bf16.gmra.mrb[88].mxu0 %v3149_v10  ;;  %3791 = vmatmul.mubr.bf16.gmra.mrb[96].mxu1 %v3151_v27  ;;  %v6838_v52 = vld [vmem:[%s9221_s16 + $0x118] sm:$0xff]   ;;  %v6849_v53 = vld [vmem:[%s9221_s16 + $0x170] sm:$0xff]  }
 0xaad   : > { %v8591_v0 = vmul.f32 %v2591_v42, %v8472_v56  ;;  %v8594_v1 = vmul.f32 %v2644_v55, %v8474_v57  ;;  %v2593_v29 = vpop.f32.mrb[62].mxu0  ;;  %v2646_v31 = vpop.f32.mrb[70].mxu1  ;;  %6340 = vmatpush3.bf16.msra.mxu0 %v6834_v12  ;;  %6380 = vmatpush3.bf16.msra.mxu1 %v6836_v35  ;;  %v6840_v54 = vld [vmem:[%s9221_s16 + $0x198] sm:$0xff]   ;;  %v6851_v15 = vld [vmem:[%s9221_s16 + $0x1f0] sm:$0xff]  }
 0xaae   : > { %v8603_v23 = vmul.f32 %v2593_v29, %v8476_v58  ;;  %v8606_v56 = vmul.f32 %v2646_v31, %v8478_v59  ;;  %v2595_v57 = vpop.f32.mrb[63].mxu0  ;;  %v2648_v7 = vpop.f32.mrb[71].mxu1  ;;  %6341 = vmatprep.subr.bf16.mxu0 %v6837_v32  ;;  %6381 = vmatprep.subr.bf16.mxu1 %v6839_v30 }
 0xaaf   : > { %v8615_v51 = vmul.f32 %v2595_v57, %v8480_v60  ;;  %v8618_v58 = vmul.f32 %v2648_v7, %v8482_v61  ;;  %v6842_v60 = vld [vmem:[%s9221_s16 + $0x120] sm:$0xff]   ;;  %v6855_v57 = vld [vmem:[%s9221_s16 + $0x1f8] sm:$0xff]   ;;  %v3958_v7 = vpop.xlane.xlu0 %3957 }
 0xab0   : > { %v3145_v59 = vpack.c.bf16 %v8603_v23, %v8585_v63  ;;  %v3147_v18 = vpack.c.bf16 %v8606_v56, %v8588_v16  ;;  %v6844_v61 = vld [vmem:[%s9221_s16 + $0x1a0] sm:$0xff]   ;;  %v9253_v63 = vld [vmem:[#allocation46_spill] sm:$0xff] }
 0xab1   : > { %v3146_v22 = vpack.c.bf16 %v8615_v51, %v8591_v0  ;;  %v3148_v19 = vpack.c.bf16 %v8618_v58, %v8594_v1  ;;  %6342 = vmatpush3.bf16.msra.mxu0 %v6838_v52  ;;  %6382 = vmatpush3.bf16.msra.mxu1 %v6840_v54  ;;  %v6853_v52 = vld [vmem:[%s9221_s16 + $0x178] sm:$0xff]   ;;  %v3961_v54 = vpop.xlane.xlu1 %3960  ;;  %v9248_v1 = vld [vmem:[#allocation41_spill] sm:$0xff] }
 0xab2   : > { %6343 = vmatprep.subr.bf16.mxu0 %v6841_v8  ;;  %6383 = vmatprep.subr.bf16.mxu1 %v6843_v17 }
 0xab3   : > { %v2599_v26 = vpop.f32.mrb[64].mxu0  ;;  %v2652_v6 = vpop.f32.mrb[72].mxu1 }
 0xab4   : > { %v8641_v9 = vmul.f32 %v2599_v26, %v8484_v62  ;;  %v8644_v20 = vmul.f32 %v2652_v6, %v8486_v21  ;;  %v2601_v10 = vpop.f32.mrb[65].mxu0  ;;  %v2654_v27 = vpop.f32.mrb[73].mxu1  ;;  %v6846_v62 = vld [vmem:[%s9221_s16 + $0x128] sm:$0xff]  }
 0xab5   : > { %v8647_v34 = vmul.f32 %v2601_v10, %v8488_v25  ;;  %v8650_v28 = vmul.f32 %v2654_v27, %v8490_v13  ;;  %v2603_v12 = vpop.f32.mrb[66].mxu0  ;;  %v2656_v35 = vpop.f32.mrb[74].mxu1  ;;  %6344 = vmatpush3.bf16.msra.mxu0 %v6842_v60  ;;  %6384 = vmatpush3.bf16.msra.mxu1 %v6844_v61  ;;  %v6848_v21 = vld [vmem:[%s9221_s16 + $0x1a8] sm:$0xff]  }
 0xab6   : > { %v8659_v32 = vmul.f32 %v2603_v12, %v8492_v2  ;;  %v8662_v25 = vmul.f32 %v2656_v35, %v8494_v3  ;;  %v2605_v13 = vpop.f32.mrb[67].mxu0  ;;  %v2658_v30 = vpop.f32.mrb[75].mxu1  ;;  %6345 = vmatprep.subr.bf16.mxu0 %v6845_v5  ;;  %6385 = vmatprep.subr.bf16.mxu1 %v6847_v24  ;;  %v6854_v12 = vld [vmem:[%s9221_s16 + $0x138] sm:$0xff]  }
 0xab7   : > { %v8671_v42 = vmul.f32 %v2605_v13, %v8496_v4  ;;  %v8674_v2 = vmul.f32 %v2658_v30, %v8498_v11  ;;  %v6850_v4 = vld [vmem:[%s9221_s16 + $0x130] sm:$0xff]  }
 0xab8   : > { %v3153_v3 = vpack.c.bf16 %v8659_v32, %v8641_v9  ;;  %v3155_v55 = vpack.c.bf16 %v8662_v25, %v8644_v20  ;;  %v6852_v11 = vld [vmem:[%s9221_s16 + $0x1b0] sm:$0xff]   ;;  %v3968_v9 = vld [vmem:[#allocation14] sm:$0xff]  ;;  %v3969_v20 = vld [vmem:[#allocation14 + $0x8] sm:$0xff] }
 0xab9   : > { %v3154_v29 = vpack.c.bf16 %v8671_v42, %v8647_v34  ;;  %v3156_v31 = vpack.c.bf16 %v8674_v2, %v8650_v28  ;;  %6346 = vmatpush3.bf16.msra.mxu0 %v6846_v62  ;;  %6386 = vmatpush3.bf16.msra.mxu1 %v6848_v21  ;;  %v9256_v42 = vld [vmem:[#allocation29_spill] sm:$0xff]  ;;  %v9258_v28 = vld [vmem:[#allocation31_spill] sm:$0xff]  ;;  %v3971_v25 = vld [vmem:[#allocation14 + $0x18] sm:$0xff] }
 0xaba   : > { %6347 = vmatprep.subr.bf16.mxu0 %v6849_v53  ;;  %6387 = vmatprep.subr.bf16.mxu1 %v6851_v15  ;;  %v3970_v32 = vld [vmem:[#allocation14 + $0x10] sm:$0xff] }
 0xabb   : > { %v2899_v8 = vpop.f32.mrb[68].mxu0  ;;  %v2952_v17 = vpop.f32.mrb[76].mxu1 }
 0xabc   : > { %v3109_v60 = vmul.f32 %v2899_v8, %v8436_v36  ;;  %v3111_v61 = vmul.f32 %v2952_v17, %v8438_v37  ;;  %v2901_v5 = vpop.f32.mrb[69].mxu0  ;;  %v2954_v24 = vpop.f32.mrb[77].mxu1  ;;  %v6856_v36 = vld [vmem:[%s9221_s16 + $0x1b8] sm:$0xff]  }
 0xabd   : > { %v3110_v26 = vmul.f32 %v2901_v5, %v8440_v38  ;;  %v3112_v6 = vmul.f32 %v2954_v24, %v8442_v39  ;;  %v2903_v10 = vpop.f32.mrb[70].mxu0  ;;  %v2956_v27 = vpop.f32.mrb[78].mxu1  ;;  %6348 = vmatpush3.bf16.msra.mxu0 %v6850_v4  ;;  %6388 = vmatpush3.bf16.msra.mxu1 %v6852_v11  ;;  %v8708_v39 = vpack.c.bf16 %v3961_v54, %v3958_v7  ;;  %v9239_v24 = vld [vmem:[#allocation32_spill] sm:$0xff] }
 0xabe   : > { %v3117_v37 = vmul.f32 %v2903_v10, %v8444_v40  ;;  %v3119_v35 = vmul.f32 %v2956_v27, %v8446_v41  ;;  %v2905_v62 = vpop.f32.mrb[71].mxu0  ;;  %v2958_v38 = vpop.f32.mrb[79].mxu1  ;;  %6349 = vmatprep.subr.bf16.mxu0 %v6853_v52  ;;  %6389 = vmatprep.subr.bf16.mxu1 %v6855_v57 }
 0xabf   : > { %v3118_v21 = vmul.f32 %v2905_v62, %v8448_v43  ;;  %v3120_v13 = vmul.f32 %v2958_v38, %v8450_v44 }
 0xac0   : > { %v3157_v30 = vpack.c.bf16 %v3117_v37, %v3109_v60  ;;  %v3159_v53 = vpack.c.bf16 %v3119_v35, %v3111_v61 }
 0xac1   : > { %v3158_v15 = vpack.c.bf16 %v3118_v21, %v3110_v26  ;;  %v3160_v4 = vpack.c.bf16 %v3120_v13, %v3112_v6  ;;  %6350 = vmatpush3.bf16.msra.mxu0 %v6854_v12  ;;  %6390 = vmatpush3.bf16.msra.mxu1 %v6856_v36  ;;  %v3964_v12 = vpop.xlane.xlu0 %3963  ;;  %v9243_v21 = vld [vmem:[#allocation36_spill] sm:$0xff] }
 0xac2   : > { %6556 = vmatprep.subr.bf16.mxu0 %v8708_v39  ;;  %6519 = vmatprep.subr.bf16.mxu1 %v7870_v14 }
 0xac3   : > { %v2909_v40 = vpop.f32.mrb[72].mxu0  ;;  %v2962_v41 = vpop.f32.mrb[80].mxu1  ;;  %3733 = vmatprep.mubr.bf16.mxu0 %v3158_v15  ;;  %3798 = vmatprep.mubr.bf16.mxu1 %v3160_v4  ;;  %v9244_v15 = vld [vmem:[#allocation37_spill] sm:$0xff] }
 0xac4   : > { %v3125_v11 = vmul.f32 %v2909_v40, %v8452_v45  ;;  %v3127_v43 = vmul.f32 %v2962_v41, %v8454_v46  ;;  %v2911_v52 = vpop.f32.mrb[73].mxu0  ;;  %v2964_v44 = vpop.f32.mrb[81].mxu1  ;;  %3734 = vmatmul.mubr.bf16.gmra.mrb[92].mxu0 %v3157_v30  ;;  %3799 = vmatmul.mubr.bf16.gmra.mrb[100].mxu1 %v3159_v53  ;;  %v9245_v40 = vld [vmem:[#allocation38_spill] sm:$0xff] }
 0xac5   : > { %v3126_v54 = vmul.f32 %v2911_v52, %v8456_v47  ;;  %v3128_v57 = vmul.f32 %v2964_v44, %v8458_v33  ;;  %v2913_v7 = vpop.f32.mrb[74].mxu0  ;;  %v2966_v8 = vpop.f32.mrb[82].mxu1  ;;  %v9240_v33 = vld [vmem:[#allocation33_spill] sm:$0xff]  ;;  %v9246_v52 = vld [vmem:[#allocation39_spill] sm:$0xff] }
 0xac6   : > { %v3133_v17 = vmul.f32 %v2913_v7, %v8460_v48  ;;  %v3135_v60 = vmul.f32 %v2966_v8, %v8462_v49  ;;  %v2915_v61 = vpop.f32.mrb[75].mxu0  ;;  %v2968_v5 = vpop.f32.mrb[83].mxu1  ;;  %v9241_v48 = vld [vmem:[#allocation34_spill] sm:$0xff] }
 0xac7   : > { %v3134_v45 = vmul.f32 %v2915_v61, %v8464_v50  ;;  %v3136_v46 = vmul.f32 %v2968_v5, %v9239_v24  ;;  %v9242_v50 = vld [vmem:[#allocation35_spill] sm:$0xff]  ;;  %v3967_v7 = vpop.xlane.xlu0 %3966 }
 0xac8   : > { %v3165_v26 = vpack.c.bf16 %v3133_v17, %v3125_v11  ;;  %v3167_v6 = vpack.c.bf16 %v3135_v60, %v3127_v43  ;;  %v6559_v51 = vpack.c.bf16 %v3967_v7, %v3964_v12 }
 0xac9   : > { %v3166_v10 = vpack.c.bf16 %v3134_v45, %v3126_v54  ;;  %v3168_v27 = vpack.c.bf16 %v3136_v46, %v3128_v57  ;;  %v9247_v54 = vld [vmem:[#allocation40_spill] sm:$0xff]  ;;  %v9250_v46 = vld [vmem:[#allocation43_spill] sm:$0xff] }
 0xacb   : > { %v3005_v47 = vpop.f32.mrb[76].mxu0  ;;  %v3058_v36 = vpop.f32.mrb[84].mxu1  ;;  %3741 = vmatprep.mubr.bf16.mxu0 %v3166_v10  ;;  %3806 = vmatprep.mubr.bf16.mxu1 %v3168_v27 }
 0xacc   : > { %v3113_v37 = vmul.f32 %v3005_v47, %v9240_v33  ;;  %v3115_v35 = vmul.f32 %v3058_v36, %v9241_v48  ;;  %v3007_v49 = vpop.f32.mrb[77].mxu0  ;;  %v3060_v62 = vpop.f32.mrb[85].mxu1  ;;  %3742 = vmatmul.mubr.bf16.gmra.mrb[96].mxu0 %v3165_v26  ;;  %3807 = vmatmul.mubr.bf16.gmra.mrb[104].mxu1 %v3167_v6  ;;  %v9251_v6 = vld [vmem:[#allocation44_spill] sm:$0xff]  ;;  %v9252_v47 = vld [vmem:[#allocation45_spill] sm:$0xff] }
 0xacd   : > { %v3114_v38 = vmul.f32 %v3007_v49, %v9242_v50  ;;  %v3116_v13 = vmul.f32 %v3060_v62, %v9243_v21  ;;  %v3009_v30 = vpop.f32.mrb[78].mxu0  ;;  %v3062_v53 = vpop.f32.mrb[86].mxu1  ;;  %3847 = vmatprep.mubr.bf16.mxu0 %v3146_v22  ;;  %3912 = vmatprep.mubr.bf16.mxu1 %v3148_v19  ;;  %v9249_v19 = vld [vmem:[#allocation42_spill] sm:$0xff] }
 0xace   : > { %v3121_v4 = vmul.f32 %v3009_v30, %v9244_v15  ;;  %v3123_v41 = vmul.f32 %v3062_v53, %v9245_v40  ;;  %v3011_v11 = vpop.f32.mrb[79].mxu0  ;;  %v3064_v43 = vpop.f32.mrb[87].mxu1 }
 0xacf   : > { %v3122_v44 = vmul.f32 %v3011_v11, %v9246_v52  ;;  %v3124_v57 = vmul.f32 %v3064_v43, %v9247_v54 }
 0xad0   : > { %v3161_v8 = vpack.c.bf16 %v3121_v4, %v3113_v37  ;;  %v3163_v17 = vpack.c.bf16 %v3123_v41, %v3115_v35 }
 0xad1   : > { %v3162_v60 = vpack.c.bf16 %v3122_v44, %v3114_v38  ;;  %v3164_v0 = vpack.c.bf16 %v3124_v57, %v3116_v13 }
 0xad3   : > { %v3015_v22 = vpop.f32.mrb[80].mxu0  ;;  %v3068_v61 = vpop.f32.mrb[88].mxu1 }
 0xad4   : > { %v3129_v58 = vmul.f32 %v3015_v22, %v9248_v1  ;;  %v3131_v5 = vmul.f32 %v3068_v61, %v9249_v19  ;;  %v3017_v45 = vpop.f32.mrb[81].mxu0  ;;  %v3070_v24 = vpop.f32.mrb[89].mxu1  ;;  %3848 = vmatmul.mubr.bf16.vlgmr.msra.gmra.mrb[100].mxu0 %v3145_v59  ;;  %3913 = vmatmul.mubr.bf16.vlgmr.msra.gmra.mrb[108].mxu1 %v3147_v18  ;;  %v9254_v59 = vld [vmem:[#allocation47_spill] sm:$0xff] }
 0xad5   : > { %v3130_v26 = vmul.f32 %v3017_v45, %v9250_v46  ;;  %v3132_v10 = vmul.f32 %v3070_v24, %v9251_v6  ;;  %6558 = vmatpush3.bf16.msra.mxu0 %v8708_v39  ;;  %v3019_v27 = vpop.f32.mrb[82].mxu0  ;;  %v3072_v12 = vpop.f32.mrb[90].mxu1  ;;  %3855 = vmatprep.mubr.bf16.mxu0 %v3154_v29  ;;  %v9255_v39 = vld [vmem:[#allocation48_spill] sm:$0xff] }
 0xad6   : > { %v3137_v36 = vmul.f32 %v3019_v27, %v9252_v47  ;;  %v3139_v23 = vmul.f32 %v3072_v12, %v9253_v63  ;;  %3920 = vmatprep.mubr.bf16.mxu1 %v3156_v31  ;;  %v3021_v16 = vpop.f32.mrb[83].mxu0  ;;  %v3074_v56 = vpop.f32.mrb[91].mxu1  ;;  %6560 = vmatprep.subr.bf16.mxu0 %v6559_v51 }
 0xad7   : > { %v3138_v18 = vmul.f32 %v3021_v16, %v9254_v59  ;;  %v3140_v33 = vmul.f32 %v3074_v56, %v9255_v39  ;;  %6520 = vmatpush3.bf16.msra.mxu1 %v7870_v14  ;;  %v9257_v14 = vld [vmem:[#allocation30_spill] sm:$0xff] }
 0xad8   : > { %v3169_v37 = vpack.c.bf16 %v3137_v36, %v3129_v58  ;;  %v3171_v34 = vpack.c.bf16 %v3139_v23, %v3131_v5  ;;  %6521 = vmatprep.subr.bf16.mxu1 %v9256_v42 }
 0xad9   : > { %v3170_v29 = vpack.c.bf16 %v3138_v18, %v3130_v26  ;;  %v3172_v48 = vpack.c.bf16 %v3140_v33, %v3132_v10  ;;  %6562 = vmatpush3.bf16.msra.mxu0 %v6559_v51 }
 0xadb   : > { %6522 = vmatpush3.bf16.msra.mxu1 %v9256_v42 }
 0xadc   : > { %3856 = vmatmul.mubr.bf16.gmra.mrb[104].mxu0 %v3153_v3  ;;  %3921 = vmatmul.mubr.bf16.gmra.mrb[112].mxu1 %v3155_v55 }
 0xadd   : > { %3863 = vmatprep.mubr.bf16.mxu0 %v3162_v60  ;;  %3928 = vmatprep.mubr.bf16.mxu1 %v3164_v0 }
 0xade   : > { %6523 = vmatprep.subr.bf16.mxu1 %v9257_v14 }
 0xadf   : > { %6524 = vmatpush3.bf16.msra.mxu1 %v9257_v14 }
 0xae0   : > { %6525 = vmatprep.subr.bf16.mxu1 %v9258_v28 }
 0xae3   : > { %6526 = vmatpush3.bf16.msra.mxu1 %v9258_v28 }
 0xae4   : > { %3864 = vmatmul.mubr.bf16.gmra.mrb[108].mxu0 %v3161_v8  ;;  %3929 = vmatmul.mubr.bf16.gmra.mrb[116].mxu1 %v3163_v17 }
 0xae5   : > { %3871 = vmatprep.mubr.bf16.mxu0 %v3170_v29  ;;  %3936 = vmatprep.mubr.bf16.mxu1 %v3172_v48 }
 0xaec   : > { %3872 = vmatmul.mubr.bf16.gmra.mrb[112].mxu0 %v3169_v37  ;;  %3937 = vmatmul.mubr.bf16.gmra.mrb[120].mxu1 %v3171_v34 }
 0xaed   : > { %6513 = vmatprep.mubr.msk.f32.mxu0 %vm1121_vm1, %v3968_v9 }
 0xaf4   : > { %6514 = vmatmul.mubr.msk.f32.vlgmr.msra.gmra.mrb[116].mxu0 %vm1121_vm1, %v3969_v20 }
 0xaf5   : > { %6516 = vmatprep.mubr.msk.f32.mxu0 %vm1121_vm1, %v3970_v32 }
 0xaf8   : > { %6517 = vmatmul.mubr.msk.f32.gmra.mrb[118].mxu0 %vm1121_vm1, %v3971_v25 }
 0xb77   : > { %v6271_v2 = vpop.f32.mrb[84].mxu0  ;;  %v6311_v3 = vpop.f32.mrb[92].mxu1 }
 0xb78   : > { %v6272_v55 = vpop.f32.mrb[85].mxu0  ;;  %v6312_v31 = vpop.f32.mrb[93].mxu1 }
 0xb79   : > { %v6273_v35 = vadd.f32 %v6272_v55, %v6271_v2  ;;  %v6313_v49 = vadd.f32 %v6312_v31, %v6311_v3  ;;  %v6274_v62 = vpop.f32.mrb[86].mxu0  ;;  %v6314_v50 = vpop.f32.mrb[94].mxu1 }
 0xb7a   : > { %v6275_v38 = vpop.f32.mrb[87].mxu0  ;;  %v6315_v21 = vpop.f32.mrb[95].mxu1 }
 0xb7b   : > { %v3785_v13 = vadd.f32 %v6313_v49, %v6273_v35  ;;  %v6276_v30 = vadd.f32 %v6275_v38, %v6274_v62  ;;  %v6316_v53 = vadd.f32 %v6315_v21, %v6314_v50 }
 0xb7d   : > { %v3788_v15 = vadd.f32 %v6316_v53, %v6276_v30 }
 0xb7f   : > { %v6277_v4 = vpop.f32.mrb[88].mxu0  ;;  %v6317_v40 = vpop.f32.mrb[96].mxu1 }
 0xb80   : > { %v6278_v41 = vpop.f32.mrb[89].mxu0  ;;  %v6318_v11 = vpop.f32.mrb[97].mxu1 }
 0xb81   : > { %v6279_v43 = vadd.f32 %v6278_v41, %v6277_v4  ;;  %v6319_v52 = vadd.f32 %v6318_v11, %v6317_v40  ;;  %v6280_v44 = vpop.f32.mrb[90].mxu0  ;;  %v6320_v54 = vpop.f32.mrb[98].mxu1 }
 0xb82   : > { %v6281_v57 = vpop.f32.mrb[91].mxu0  ;;  %v6321_v7 = vpop.f32.mrb[99].mxu1 }
 0xb83   : > { %v3793_v8 = vadd.f32 %v6319_v52, %v6279_v43  ;;  %v6282_v17 = vadd.f32 %v6281_v57, %v6280_v44  ;;  %v6322_v60 = vadd.f32 %v6321_v7, %v6320_v54 }
 0xb85   : > { %v3796_v0 = vadd.f32 %v6322_v60, %v6282_v17 }
 0xb97   : > { %v6283_v51 = vpop.f32.mrb[92].mxu0  ;;  %v6323_v22 = vpop.f32.mrb[100].mxu1 }
 0xb98   : > { %v6284_v61 = vpop.f32.mrb[93].mxu0  ;;  %v6324_v1 = vpop.f32.mrb[101].mxu1 }
 0xb99   : > { %v6285_v58 = vadd.f32 %v6284_v61, %v6283_v51  ;;  %v6325_v19 = vadd.f32 %v6324_v1, %v6323_v22  ;;  %v6286_v5 = vpop.f32.mrb[94].mxu0  ;;  %v6326_v45 = vpop.f32.mrb[102].mxu1 }
 0xb9a   : > { %v6287_v24 = vpop.f32.mrb[95].mxu0  ;;  %v6327_v46 = vpop.f32.mrb[103].mxu1 }
 0xb9b   : > { %v8774_v26 = vadd.f32 %v6325_v19, %v6285_v58  ;;  %v6288_v6 = vadd.f32 %v6287_v24, %v6286_v5  ;;  %v6328_v10 = vadd.f32 %v6327_v46, %v6326_v45 }
 0xb9d   : > { %v8776_v27 = vadd.f32 %v6328_v10, %v6288_v6 }
 0xb9f   : > { %v6289_v12 = vpop.f32.mrb[96].mxu0  ;;  %v6329_v47 = vpop.f32.mrb[104].mxu1 }
 0xba0   : > { %v6290_v36 = vpop.f32.mrb[97].mxu0  ;;  %v6330_v63 = vpop.f32.mrb[105].mxu1 }
 0xba1   : > { %v6291_v23 = vadd.f32 %v6290_v36, %v6289_v12  ;;  %v6331_v16 = vadd.f32 %v6330_v63, %v6329_v47  ;;  %v6292_v56 = vpop.f32.mrb[98].mxu0  ;;  %v6332_v59 = vpop.f32.mrb[106].mxu1 }
 0xba2   : > { %v6293_v18 = vpop.f32.mrb[99].mxu0  ;;  %v6333_v39 = vpop.f32.mrb[107].mxu1 }
 0xba3   : > { %v8778_v33 = vadd.f32 %v6331_v16, %v6291_v23  ;;  %v6294_v37 = vadd.f32 %v6293_v18, %v6292_v56  ;;  %v6334_v34 = vadd.f32 %v6333_v39, %v6332_v59 }
 0xba5   : > { %v8780_v42 = vadd.f32 %v6334_v34, %v6294_v37 }
 0xba7   : > { %v6351_v29 = vpop.f32.mrb[100].mxu0  ;;  %v6391_v48 = vpop.f32.mrb[108].mxu1 }
 0xba8   : > { %v6352_v14 = vpop.f32.mrb[101].mxu0  ;;  %v6392_v28 = vpop.f32.mrb[109].mxu1 }
 0xba9   : > { %v6353_v9 = vadd.f32 %v6352_v14, %v6351_v29  ;;  %v6393_v20 = vadd.f32 %v6392_v28, %v6391_v48  ;;  %v6354_v32 = vpop.f32.mrb[102].mxu0  ;;  %v6394_v25 = vpop.f32.mrb[110].mxu1 }
 0xbaa   : > { %v6355_v2 = vpop.f32.mrb[103].mxu0  ;;  %v6395_v3 = vpop.f32.mrb[111].mxu1 }
 0xbab   : > { %v3850_v55 = vadd.f32 %v6353_v9, %v3785_v13  ;;  %v6356_v31 = vadd.f32 %v6355_v2, %v6354_v32  ;;  %v6396_v35 = vadd.f32 %v6395_v3, %v6394_v25 }
 0xbad   : > { %v8782_v49 = vadd.f32 %v6393_v20, %v3850_v55  ;;  %v3853_v62 = vadd.f32 %v6356_v31, %v3788_v15 }
 0xbaf   : > { %v8784_v50 = vadd.f32 %v6396_v35, %v3853_v62  ;;  %v6357_v38 = vpop.f32.mrb[104].mxu0  ;;  %v6397_v21 = vpop.f32.mrb[112].mxu1 }
 0xbb0   : > { %v6358_v30 = vpop.f32.mrb[105].mxu0  ;;  %v6398_v53 = vpop.f32.mrb[113].mxu1 }
 0xbb1   : > { %v4102_v4 = vpack.c.bf16 %v8784_v50, %v8782_v49  ;;  %v6359_v40 = vadd.f32 %v6358_v30, %v6357_v38  ;;  %v6399_v41 = vadd.f32 %v6398_v53, %v6397_v21  ;;  %v6360_v11 = vpop.f32.mrb[106].mxu0  ;;  %v6400_v43 = vpop.f32.mrb[114].mxu1  ;;  %v9259_v30 = vmov 0  }
 0xbb2   : > { %v6361_v52 = vpop.f32.mrb[107].mxu0  ;;  %v6401_v13 = vpop.f32.mrb[115].mxu1 }
 0xbb3   : > { %v3858_v44 = vadd.f32 %v6359_v40, %v3793_v8  ;;  %v6362_v54 = vadd.f32 %v6361_v52, %v6360_v11  ;;  %v6402_v57 = vadd.f32 %v6401_v13, %v6400_v43  ;;  %6527 = vmatprep.mubr.msk.bf16.mxu1 %vm696_vm0, %v4102_v4  ;;  %v6857_v11 = vld [vmem:[#allocation11] sm:$0xff]   ;;  %v6858_v43 = vld [vmem:[#allocation11 + $0x8] sm:$0xff]   ;;  %v6859_v52 = vld [vmem:[#allocation11 + $0x10] sm:$0xff]  }
 0xbb4   : > { %6535 = vmatprep.subr.bf16.mxu0 %v6857_v11  ;;  %v6860_v13 = vld [vmem:[#allocation11 + $0x18] sm:$0xff]  }
 0xbb5   : > { %v8789_v15 = vadd.f32 %v6399_v41, %v3858_v44  ;;  %v3861_v7 = vadd.f32 %v6362_v54, %v3796_v0  ;;  %6536 = vmatpush3.bf16.msra.mxu0 %v6857_v11  ;;  %v6861_v44 = vld [vmem:[#allocation11 + $0x20] sm:$0xff]   ;;  %v6862_v54 = vld [vmem:[#allocation11 + $0x28] sm:$0xff]  }
 0xbb6   : > { %6537 = vmatprep.subr.bf16.mxu0 %v6858_v43 }
 0xbb7   : > { %v8791_v17 = vadd.f32 %v6402_v57, %v3861_v7  ;;  %v6363_v60 = vpop.f32.mrb[108].mxu0  ;;  %v6403_v51 = vpop.f32.mrb[116].mxu1  ;;  %v6863_v57 = vld [vmem:[#allocation11 + $0x30] sm:$0xff]  }
 0xbb8   : > { %v6364_v22 = vpop.f32.mrb[109].mxu0  ;;  %v6404_v61 = vpop.f32.mrb[117].mxu1 }
 0xbb9   : > { %v4103_v1 = vpack.c.bf16 %v8791_v17, %v8789_v15  ;;  %v6365_v58 = vadd.f32 %v6364_v22, %v6363_v60  ;;  %v6405_v19 = vadd.f32 %v6404_v61, %v6403_v51  ;;  %v6366_v5 = vpop.f32.mrb[110].mxu0  ;;  %v6406_v8 = vpop.f32.mrb[118].mxu1  ;;  %6538 = vmatpush3.bf16.msra.mxu0 %v6858_v43 }
 0xbba   : > { %v6367_v45 = vpop.f32.mrb[111].mxu0  ;;  %v6407_v24 = vpop.f32.mrb[119].mxu1  ;;  %6539 = vmatprep.subr.bf16.mxu0 %v6859_v52 }
 0xbbb   : > { %v3866_v46 = vadd.f32 %v6365_v58, %v8774_v26  ;;  %v6368_v6 = vadd.f32 %v6367_v45, %v6366_v5  ;;  %v6408_v10 = vadd.f32 %v6407_v24, %v6406_v8  ;;  %6528 = vmatmul.mubr.msk.bf16.vlgmr.msra.gmra.mrb[124].mxu1 %vm696_vm0, %v4103_v1  ;;  %v6864_v1 = vld [vmem:[#allocation11 + $0x38] sm:$0xff]  }
 0xbbd   : > { %v3869_v0 = vadd.f32 %v6368_v6, %v8776_v27  ;;  %v3931_v12 = vadd.f32 %v6405_v19, %v3866_v46  ;;  %6540 = vmatpush3.bf16.msra.mxu0 %v6859_v52  ;;  %v4336_v6 = vld [vmem:[%s7702_s17] sm:$0xff] }
 0xbbe   : > { %6541 = vmatprep.subr.bf16.mxu0 %v6860_v13 }
 0xbbf   : > { %v6369_v47 = vpop.f32.mrb[112].mxu0  ;;  %v6409_v36 = vpop.f32.mrb[120].mxu1  ;;  %v3934_v63 = vadd.f32 %v6408_v10, %v3869_v0  ;;  %v4344_v10 = vld [vmem:[%s7702_s17 + $0x40] sm:$0xff]  ;;  %v8814_v0 = vld [vmem:[%s7702_s17 + $0x8] sm:$0xff] }
 0xbc0   : > { %v6370_v23 = vpop.f32.mrb[113].mxu0  ;;  %v6410_v16 = vpop.f32.mrb[121].mxu1 }
 0xbc1   : > { %v6371_v56 = vadd.f32 %v6370_v23, %v6369_v47  ;;  %v6411_v59 = vadd.f32 %v6410_v16, %v6409_v36  ;;  %v6372_v18 = vpop.f32.mrb[114].mxu0  ;;  %v6412_v39 = vpop.f32.mrb[122].mxu1  ;;  %6542 = vmatpush3.bf16.msra.mxu0 %v6860_v13  ;;  %v6060_v47 = vcombine.low %v4336_v6, %v4344_v10  ;;  %v6061_v36 = vcombine.high %v4336_v6, %v4344_v10  ;;  %v4352_v23 = vld [vmem:[%s7702_s17 + $0x80] sm:$0xff] }
 0xbc2   : > { %v6373_v37 = vpop.f32.mrb[115].mxu0  ;;  %v6413_v34 = vpop.f32.mrb[123].mxu1  ;;  %6543 = vmatprep.subr.bf16.mxu0 %v6861_v44  ;;  %v4360_v16 = vld [vmem:[%s7702_s17 + $0xc0] sm:$0xff] }
 0xbc3   : > { %v3874_v26 = vadd.f32 %v6371_v56, %v8778_v33  ;;  %v6374_v29 = vadd.f32 %v6373_v37, %v6372_v18  ;;  %v6414_v48 = vadd.f32 %v6413_v34, %v6412_v39  ;;  %5104 = vmatprep.subr.bf16.mxu1 %v6061_v36  ;;  %v6077_v39 = vcombine.high %v4352_v23, %v4360_v16  ;;  %v4368_v34 = vld [vmem:[%s7702_s17 + $0x100] sm:$0xff] }
 0xbc4   : > { %5105 = vmatpush1.bf16.msra.mxu1 %v6060_v47  ;;  %v6076_v37 = vcombine.low %v4352_v23, %v4360_v16  ;;  %v4409_v47 = vld [vmem:[%s7702_s17 + $0x248] sm:$0xff] }
 0xbc5   : > { %v3877_v14 = vadd.f32 %v6374_v29, %v8780_v42  ;;  %v3939_v28 = vadd.f32 %v6411_v59, %v3874_v26  ;;  %6544 = vmatpush3.bf16.msra.mxu0 %v6861_v44  ;;  %v4376_v26 = vld [vmem:[%s7702_s17 + $0x140] sm:$0xff]  ;;  %5106 = vmatprep.subr.bf16.mxu1 %v6077_v39  ;;  %v4425_v23 = vld [vmem:[%s7702_s17 + $0x2c8] sm:$0xff] }
 0xbc6   : > { %6545 = vmatprep.subr.bf16.mxu0 %v6862_v54  ;;  %v6093_v29 = vcombine.high %v4368_v34, %v4376_v26 }
 0xbc7   : > { %v6515_v27 = vpop.f32.mrb[116].mxu0  ;;  %v3942_v9 = vadd.f32 %v6414_v48, %v3877_v14  ;;  %v6092_v48 = vcombine.low %v4368_v34, %v4376_v26  ;;  %v4384_v14 = vld [vmem:[%s7702_s17 + $0x180] sm:$0xff] }
 0xbc8   : > { %4081 = vperm.xlu1 %6706, %v6515_v27   ;;  %v4050_v20 = vpop.f32.mrb[117].mxu0  ;;  %5107 = vmatpush1.bf16.msra.mxu1 %v6076_v37  ;;  %v4448_v26 = vld [vmem:[%s7702_s17 + $0x380] sm:$0xff] }
 0xbc9   : > { %4076 = vperm.xlu0 %6705, %v4050_v20   ;;  %6546 = vmatpush3.bf16.msra.mxu0 %v6862_v54  ;;  %v4400_v20 = vld [vmem:[%s7702_s17 + $0x200] sm:$0xff] }
 0xbca   : > { %6547 = vmatprep.subr.bf16.mxu0 %v6863_v57  ;;  %5108 = vmatprep.subr.bf16.mxu1 %v6093_v29  ;;  %v4456_v29 = vld [vmem:[%s7702_s17 + $0x3c0] sm:$0xff] }
 0xbcb   : > { %v6518_v32 = vpop.f32.mrb[118].mxu0 }
 0xbcc   : > { %v4060_v25 = vpop.f32.mrb[119].mxu0  ;;  %5109 = vmatpush1.bf16.msra.mxu1 %v6092_v48  ;;  %v4449_v48 = vld [vmem:[%s7702_s17 + $0x388] sm:$0xff] }
 0xbcd   : > { %4086 = vperm.xlu1 %6706, %v4060_v25   ;;  %6548 = vmatpush3.bf16.msra.mxu0 %v6863_v57 }
 0xbce   : > { %6549 = vmatprep.subr.bf16.mxu0 %v6864_v1 }
 0xbd1   : > { %4091 = vperm.xlu1 %6706, %v6518_v32   ;;  %6550 = vmatpush3.bf16.msra.mxu0 %v6864_v1  ;;  %v4408_v32 = vld [vmem:[%s7702_s17 + $0x240] sm:$0xff] }
 0xbd2   : > { %v6125_v25 = vcombine.high %v4400_v20, %v4408_v32 }
 0xc47   : > { %v4082_v2 = vpop.permute.xlu1 %4081 }
 0xc48   : > { %v4099_v3 = vmul.f32 %v4082_v2, %v3934_v63  ;;  %v4077_v55 = vpop.permute.xlu0 %4076  ;;  %v8817_v63 = vld [vmem:[%s7702_s17 + $0x48] sm:$0xff]  ;;  %v6124_v2 = vcombine.low %v4400_v20, %v4408_v32  ;;  %v4338_v32 = vld [vmem:[%s7702_s17 + $0x10] sm:$0xff] }
 0xc49   : > { %v4098_v31 = vmul.f32 %v4077_v55, %v3931_v12  ;;  %v6062_v59 = vcombine.low %v8814_v0, %v8817_v63  ;;  %v6063_v18 = vcombine.high %v8814_v0, %v8817_v63  ;;  %v4424_v55 = vld [vmem:[%s7702_s17 + $0x2c0] sm:$0xff]  ;;  %v4417_v63 = vld [vmem:[%s7702_s17 + $0x288] sm:$0xff] }
 0xc4a   : > { %v6142_v39 = vcombine.low %v4417_v63, %v4425_v23 }
 0xc4b   : > { %v4104_v35 = vpack.c.bf16 %v4099_v3, %v4098_v31  ;;  %5157 = vmatprep.subr.bf16.mxu0 %v6063_v18  ;;  %v4441_v18 = vld [vmem:[%s7702_s17 + $0x348] sm:$0xff] }
 0xc4c   : > { %v4087_v33 = vpop.permute.xlu1 %4086 }
 0xc4d   : > { %6531 = vmatprep.mubr.msk.bf16.mxu1 %vm696_vm0, %v4104_v35  ;;  %v4100_v42 = vmul.f32 %v4087_v33, %v3939_v28  ;;  %v4392_v28 = vld [vmem:[%s7702_s17 + $0x1c0] sm:$0xff] }
 0xc4e   : > { %v6109_v27 = vcombine.high %v4384_v14, %v4392_v28  ;;  %v4432_v33 = vld [vmem:[%s7702_s17 + $0x300] sm:$0xff] }
 0xc50   : > { %v4092_v62 = vpop.permute.xlu1 %4091  ;;  %5110 = vmatprep.subr.bf16.mxu1 %v6109_v27  ;;  %v6172_v27 = vcombine.low %v4448_v26, %v4456_v29 }
 0xc51   : > { %v4101_v38 = vmul.f32 %v4092_v62, %v3942_v9  ;;  %v6108_v9 = vcombine.low %v4384_v14, %v4392_v28  ;;  %v4440_v62 = vld [vmem:[%s7702_s17 + $0x340] sm:$0xff]  ;;  %v6173_v14 = vcombine.high %v4448_v26, %v4456_v29  ;;  %v4457_v28 = vld [vmem:[%s7702_s17 + $0x3c8] sm:$0xff]  ;;  %v4427_v26 = vld [vmem:[%s7702_s17 + $0x2d8] sm:$0xff] }
 0xc52   : > { %v6175_v20 = vcombine.high %v4449_v48, %v4457_v28 }
 0xc53   : > { %v4105_v21 = vpack.c.bf16 %v4101_v38, %v4100_v42  ;;  %5111 = vmatpush1.bf16.msra.mxu1 %v6108_v9  ;;  %v6174_v9 = vcombine.low %v4449_v48, %v4457_v28 }
 0xc54   : > { %5112 = vmatprep.subr.bf16.mxu1 %v6125_v25  ;;  %v4346_v25 = vld [vmem:[%s7702_s17 + $0x50] sm:$0xff] }
 0xc55   : > { %6532 = vmatmul.mubr.msk.bf16.gmra.mrb[128].mxu1 %vm696_vm0, %v4105_v21 }
 0xc56   : > { %5136 = vmatprep.mubr.bf16.mxu1 %v9259_v30 }
 0xc57   : > { %5113 = vmatpush1.bf16.msra.mxu1 %v6124_v2  ;;  %v4339_v2 = vld [vmem:[%s7702_s17 + $0x18] sm:$0xff] }
 0xc8e   : > { %v8803_v53 = vpop.f32.mrb[124].mxu1 }
 0xc8f   : > { %v8805_v4 = vpop.f32.mrb[125].mxu1  ;;  %v4185_v43 = vmax.f32 %v8803_v53, 0.0 }
 0xc90   : > { %v8807_v40 = vpop.f32.mrb[126].mxu1  ;;  %v4183_v21 = vmax.f32 %v8805_v4, 0.0 }
 0xc91   : > { %v8809_v41 = vpop.f32.mrb[127].mxu1  ;;  %v4186_v52 = vmax.f32 %v8807_v40, 0.0  ;;  %v4193_v53 = vmul.f32 %v4185_v43, %v8789_v15 }
 0xc92   : > { %v4184_v11 = vmax.f32 %v8809_v41, 0.0  ;;  %v4191_v44 = vmul.f32 %v4183_v21, %v8782_v49  ;;  %v4353_v49 = vld [vmem:[%s7702_s17 + $0x88] sm:$0xff]  ;;  %v4354_v21 = vld [vmem:[%s7702_s17 + $0x90] sm:$0xff] }
 0xc94   : > { %v4192_v54 = vmul.f32 %v4184_v11, %v8784_v50  ;;  %v4361_v50 = vld [vmem:[%s7702_s17 + $0xc8] sm:$0xff]  ;;  %v9260_v11 = vld [vmem:[#allocation27_spill] sm:$0xff] }
 0xc95   : > { %v6078_v15 = vcombine.low %v4353_v49, %v4361_v50 }
 0xd28   : > { %v6533_v7 = vpop.f32.mrb[128].mxu1 }
 0xd29   : > { %v4189_v60 = vmax.f32 %v6533_v7, 0.0  ;;  %v4168_v51 = vpop.f32.mrb[129].mxu1 }
 0xd2a   : > { %v4187_v22 = vmax.f32 %v4168_v51, 0.0  ;;  %v6534_v61 = vpop.f32.mrb[130].mxu1 }
 0xd2b   : > { %v4190_v58 = vmax.f32 %v6534_v61, 0.0  ;;  %v4171_v19 = vpop.f32.mrb[131].mxu1  ;;  %v4197_v8 = vmul.f32 %v4189_v60, %v4100_v42  ;;  %v6157_v42 = vcombine.high %v4432_v33, %v4440_v62 }
 0xd2c   : > { %v4188_v5 = vmax.f32 %v4171_v19, 0.0  ;;  %v4195_v24 = vmul.f32 %v4187_v22, %v4098_v31  ;;  %v4194_v22 = vmul.f32 %v4186_v52, %v8791_v17  ;;  %v9261_v52 = vld [vmem:[#allocation28_spill] sm:$0xff] }
 0xd2d   : > { %v4198_v45 = vmul.f32 %v4190_v58, %v4101_v38  ;;  %v6156_v38 = vcombine.low %v4432_v33, %v4440_v62 }
 0xd2e   : > { %v4196_v46 = vmul.f32 %v4188_v5, %v4099_v3  ;;  %v4416_v3 = vld [vmem:[%s7702_s17 + $0x280] sm:$0xff]  ;;  %v6079_v5 = vcombine.high %v4353_v49, %v4361_v50  ;;  %v4370_v49 = vld [vmem:[%s7702_s17 + $0x110] sm:$0xff] }
 0xd2f   : > { %v6712_v12 = vpack.i.bf16 %v4198_v45, %v4197_v8  ;;  %v6141_v31 = vcombine.high %v4416_v3, %v4424_v55  ;;  %v6140_v35 = vcombine.low %v4416_v3, %v4424_v55  ;;  %v4369_v8 = vld [vmem:[%s7702_s17 + $0x108] sm:$0xff]  ;;  %v6064_v3 = vcombine.low %v4338_v32, %v4346_v25  ;;  %v4378_v50 = vld [vmem:[%s7702_s17 + $0x150] sm:$0xff] }
 0xd30   : > { %v6707_v56 = vpack.i.bf16 %v4196_v46, %v4195_v24  ;;  %v4377_v45 = vld [vmem:[%s7702_s17 + $0x148] sm:$0xff]  ;;  %v6065_v55 = vcombine.high %v4338_v32, %v4346_v25  ;;  %v4443_v32 = vld [vmem:[%s7702_s17 + $0x358] sm:$0xff] }
 0xd31   : > { %5114 = vmatprep.subr.bf16.mxu1 %v6141_v31  ;;  %v6095_v17 = vcombine.high %v4369_v8, %v4377_v45  ;;  %v4385_v24 = vld [vmem:[%s7702_s17 + $0x188] sm:$0xff]  ;;  %v6094_v6 = vcombine.low %v4369_v8, %v4377_v45  ;;  %v4347_v31 = vld [vmem:[%s7702_s17 + $0x58] sm:$0xff]  ;;  %v6097_v8 = vcombine.high %v4370_v49, %v4378_v50 }
 0xd32   : > { %6708 = vrot.lane.b32.xlu1 %v6707_v56, %s9218_s20  ;;  %5115 = vmatpush1.bf16.msra.mxu1 %v6140_v35  ;;  %v4393_v46 = vld [vmem:[%s7702_s17 + $0x1c8] sm:$0xff]  ;;  %v6143_v56 = vcombine.high %v4417_v63, %v4425_v23  ;;  %v6066_v35 = vcombine.low %v4339_v2, %v4347_v31  ;;  %v6067_v33 = vcombine.high %v4339_v2, %v4347_v31  ;;  %v4403_v63 = vld [vmem:[%s7702_s17 + $0x218] sm:$0xff]  ;;  %v4450_v31 = vld [vmem:[%s7702_s17 + $0x390] sm:$0xff] }
 0xd33   : > { %5116 = vmatprep.subr.bf16.mxu1 %v6157_v42  ;;  %v6111_v10 = vcombine.high %v4385_v24, %v4393_v46  ;;  %v6110_v0 = vcombine.low %v4385_v24, %v4393_v46  ;;  %v4387_v24 = vld [vmem:[%s7702_s17 + $0x198] sm:$0xff] }
 0xd34   : > { %v4395_v46 = vld [vmem:[%s7702_s17 + $0x1d8] sm:$0xff] }
 0xd35   : > { %v4411_v23 = vld [vmem:[%s7702_s17 + $0x258] sm:$0xff] }
 0xd36   : > { %6713 = vrot.lane.b32.xlu1 %v6712_v12, %s9218_s20  ;;  %5117 = vmatpush1.bf16.msra.mxu1 %v6156_v38  ;;  %v4401_v12 = vld [vmem:[%s7702_s17 + $0x208] sm:$0xff]  ;;  %v6130_v48 = vcombine.low %v4403_v63, %v4411_v23 }
 0xd37   : > { %v6127_v36 = vcombine.high %v4401_v12, %v4409_v47  ;;  %v6126_v16 = vcombine.low %v4401_v12, %v4409_v47  ;;  %5118 = vmatprep.subr.bf16.mxu1 %v6173_v14  ;;  %v6115_v47 = vcombine.high %v4387_v24, %v4395_v46 }
 0xd3a   : > { %5119 = vmatpush1.bf16.msra.mxu1 %v6172_v27  ;;  %v4434_v27 = vld [vmem:[%s7702_s17 + $0x310] sm:$0xff] }
 0xd3b   : > { %5210 = vmatprep.subr.bf16.mxu1 %v6065_v55 }
 0xda4   : > { %v6709_v13 = vpop.permute.xlu1 %6708 }
 0xda5   : > { %v6711_v57 = vunpack.i.h.bf16 %v6709_v13  ;;  %v6710_v7 = vunpack.i.l.bf16 %v6709_v13 }
 0xda7   : > { %v4215_v60 = vsel %vm696_vm0, %v4191_v44, %v6710_v7  ;;  %v4216_v4 = vsel %vm696_vm0, %v4192_v54, %v6711_v57  ;;  %v4362_v54 = vld [vmem:[%s7702_s17 + $0xd0] sm:$0xff]  ;;  %v4355_v57 = vld [vmem:[%s7702_s17 + $0x98] sm:$0xff] }
 0xda8   : > { %v6714_v41 = vpop.permute.xlu1 %6713  ;;  %v4219_v51 = vpack.c.bf16 %v4216_v4, %v4215_v60  ;;  %v4363_v7 = vld [vmem:[%s7702_s17 + $0xd8] sm:$0xff]  ;;  %v9262_v60 = vld [vmem:[#allocation25_spill] sm:$0xff] }
 0xda9   : > { %v6716_v40 = vunpack.i.h.bf16 %v6714_v41  ;;  %v6715_v61 = vunpack.i.l.bf16 %v6714_v41  ;;  %v9263_v41 = vld [vmem:[#allocation26_spill] sm:$0xff] }
 0xdaa   : > { %6551 = vmatprep.mubr.bf16.mxu0 %v4219_v51 }
 0xdab   : > { %v4218_v1 = vsel %vm696_vm0, %v4194_v22, %v6716_v40  ;;  %v4217_v58 = vsel %vm696_vm0, %v4193_v53, %v6715_v61  ;;  %v6081_v40 = vcombine.high %v4354_v21, %v4362_v54  ;;  %v6083_v61 = vcombine.high %v4355_v57, %v4363_v7 }
 0xdac   : > { %v4220_v19 = vpack.c.bf16 %v4218_v1, %v4217_v58  ;;  %v4371_v1 = vld [vmem:[%s7702_s17 + $0x118] sm:$0xff] }
 0xdad   : > { %v4379_v58 = vld [vmem:[%s7702_s17 + $0x158] sm:$0xff] }
 0xdae   : > { %6552 = vmatmul.mubr.bf16.vlgmr.msra.gmra.mrb[120].mxu0 %v4220_v19  ;;  %v6080_v19 = vcombine.low %v4354_v21, %v4362_v54  ;;  %v6099_v45 = vcombine.high %v4371_v1, %v4379_v58 }
 0xdaf   : > { %5158 = vmatpush1.bf16.msra.mxu0 %v6062_v59  ;;  %5189 = vmatprep.mubr.bf16.mxu0 %v9259_v30  ;;  %v4433_v59 = vld [vmem:[%s7702_s17 + $0x308] sm:$0xff] }
 0xdb0   : > { %5159 = vmatprep.subr.bf16.mxu0 %v6079_v5  ;;  %v6159_v37 = vcombine.high %v4433_v59, %v4441_v18  ;;  %v6158_v34 = vcombine.low %v4433_v59, %v4441_v18  ;;  %v6082_v5 = vcombine.low %v4355_v57, %v4363_v7  ;;  %v6131_v18 = vcombine.high %v4403_v63, %v4411_v23  ;;  %v4404_v23 = vld [vmem:[%s7702_s17 + $0x220] sm:$0xff] }
 0xdb3   : > { %5160 = vmatpush1.bf16.msra.mxu0 %v6078_v15  ;;  %v4386_v15 = vld [vmem:[%s7702_s17 + $0x190] sm:$0xff] }
 0xdb4   : > { %5161 = vmatprep.subr.bf16.mxu0 %v6095_v17  ;;  %v4394_v17 = vld [vmem:[%s7702_s17 + $0x1d0] sm:$0xff] }
 0xdb5   : > { %v6113_v12 = vcombine.high %v4386_v15, %v4394_v17 }
 0xdb7   : > { %5162 = vmatpush1.bf16.msra.mxu0 %v6094_v6  ;;  %v6096_v6 = vcombine.low %v4370_v49, %v4378_v50 }
 0xdb8   : > { %5163 = vmatprep.subr.bf16.mxu0 %v6111_v10  ;;  %v6098_v10 = vcombine.low %v4371_v1, %v4379_v58  ;;  %v4372_v58 = vld [vmem:[%s7702_s17 + $0x120] sm:$0xff] }
 0xdbb   : > { %5164 = vmatpush1.bf16.msra.mxu0 %v6110_v0  ;;  %v4402_v0 = vld [vmem:[%s7702_s17 + $0x210] sm:$0xff] }
 0xdbc   : > { %5165 = vmatprep.subr.bf16.mxu0 %v6127_v36  ;;  %v4410_v36 = vld [vmem:[%s7702_s17 + $0x250] sm:$0xff] }
 0xdbd   : > { %v6129_v59 = vcombine.high %v4402_v0, %v4410_v36  ;;  %v6128_v29 = vcombine.low %v4402_v0, %v4410_v36 }
 0xdbf   : > { %5166 = vmatpush1.bf16.msra.mxu0 %v6126_v16  ;;  %v6112_v16 = vcombine.low %v4386_v15, %v4394_v17 }
 0xdc0   : > { %5167 = vmatprep.subr.bf16.mxu0 %v6143_v56  ;;  %v6114_v56 = vcombine.low %v4387_v24, %v4395_v46  ;;  %v4388_v46 = vld [vmem:[%s7702_s17 + $0x1a0] sm:$0xff] }
 0xdc3   : > { %5168 = vmatpush1.bf16.msra.mxu0 %v6142_v39  ;;  %v4418_v39 = vld [vmem:[%s7702_s17 + $0x290] sm:$0xff] }
 0xdc4   : > { %5169 = vmatprep.subr.bf16.mxu0 %v6159_v37  ;;  %v4426_v37 = vld [vmem:[%s7702_s17 + $0x2d0] sm:$0xff] }
 0xdc5   : > { %v6145_v14 = vcombine.high %v4418_v39, %v4426_v37  ;;  %v6144_v25 = vcombine.low %v4418_v39, %v4426_v37 }
 0xdc7   : > { %5170 = vmatpush1.bf16.msra.mxu0 %v6158_v34  ;;  %v4419_v34 = vld [vmem:[%s7702_s17 + $0x298] sm:$0xff] }
 0xdc8   : > { %5171 = vmatprep.subr.bf16.mxu0 %v6175_v20  ;;  %v6147_v28 = vcombine.high %v4419_v34, %v4427_v26  ;;  %v4435_v20 = vld [vmem:[%s7702_s17 + $0x318] sm:$0xff]  ;;  %v6146_v2 = vcombine.low %v4419_v34, %v4427_v26  ;;  %v4420_v26 = vld [vmem:[%s7702_s17 + $0x2a0] sm:$0xff] }
 0xdc9   : > { %v6163_v55 = vcombine.high %v4435_v20, %v4443_v32 }
 0xdcb   : > { %5172 = vmatpush1.bf16.msra.mxu0 %v6174_v9  ;;  %v4442_v9 = vld [vmem:[%s7702_s17 + $0x350] sm:$0xff] }
 0xdcc   : > { %5263 = vmatprep.subr.bf16.mxu0 %v6067_v33  ;;  %v4451_v33 = vld [vmem:[%s7702_s17 + $0x398] sm:$0xff] }
 0xe81   : > { %v6553_v62 = vpop.f32.mrb[120].mxu0 }
 0xe82   : > { %v4319_v42 = vpop.f32.mrb[121].mxu0  ;;  %v4328_v43 = vadd.f32 %v6553_v62, %v9260_v11  ;;  %v4459_v62 = vld [vmem:[%s7702_s17 + $0x3d8] sm:$0xff] }
 0xe83   : > { %v6554_v38 = vpop.f32.mrb[122].mxu0  ;;  %v4320_v4 = vadd.f32 %v4319_v42, %v9262_v60  ;;  %v6160_v42 = vcombine.low %v4434_v27, %v4442_v9  ;;  %v6179_v11 = vcombine.high %v4451_v33, %v4459_v62  ;;  %v6178_v57 = vcombine.low %v4451_v33, %v4459_v62  ;;  %v4452_v62 = vld [vmem:[%s7702_s17 + $0x3a0] sm:$0xff] }
 0xe84   : > { %v4331_v13 = vadd.f32 %v6554_v38, %v9261_v52  ;;  %v4322_v44 = vpop.f32.mrb[123].mxu0  ;;  %v6162_v38 = vcombine.low %v4435_v20, %v4443_v32  ;;  %v4348_v52 = vld [vmem:[%s7702_s17 + $0x60] sm:$0xff] }
 0xe85   : > { %v4323_v51 = vadd.f32 %v4322_v44, %v9263_v41  ;;  %v4349_v44 = vld [vmem:[%s7702_s17 + $0x68] sm:$0xff]  ;;  %v4364_v41 = vld [vmem:[%s7702_s17 + $0xe0] sm:$0xff] }
 0xe86   : > { %v8881_v53 = vpack.c.bf16 %v4331_v13, %v4328_v43  ;;  %v4340_v43 = vld [vmem:[%s7702_s17 + $0x20] sm:$0xff]  ;;  %v4341_v13 = vld [vmem:[%s7702_s17 + $0x28] sm:$0xff] }
 0xe87   : > { %v8883_v22 = vpack.c.bf16 %v4323_v51, %v4320_v4  ;;  %v6069_v7 = vcombine.high %v4340_v43, %v4348_v52  ;;  %v6071_v60 = vcombine.high %v4341_v13, %v4349_v44  ;;  %v4356_v4 = vld [vmem:[%s7702_s17 + $0xa0] sm:$0xff]  ;;  %v4357_v51 = vld [vmem:[%s7702_s17 + $0xa8] sm:$0xff]  ;;  %v6070_v49 = vcombine.low %v4341_v13, %v4349_v44  ;;  %v4342_v44 = vld [vmem:[%s7702_s17 + $0x30] sm:$0xff] }
 0xe88   : > { %v6085_v50 = vcombine.high %v4356_v4, %v4364_v41  ;;  %v4436_v32 = vld [vmem:[%s7702_s17 + $0x320] sm:$0xff] }
 0xe89   : > { %5137 = vmatmul.mubr.bf16.vlgmr.msra.gmra.mrb[132].mxu1 %v8883_v22  ;;  %5190 = vmatmul.mubr.bf16.vlgmr.msra.gmra.mrb[124].mxu0 %v8883_v22 }
 0xe8a   : > { %5211 = vmatpush1.bf16.msra.mxu1 %v6064_v3  ;;  %5264 = vmatpush1.bf16.msra.mxu0 %v6066_v35  ;;  %v6161_v3 = vcombine.high %v4434_v27, %v4442_v9  ;;  %v4458_v35 = vld [vmem:[%s7702_s17 + $0x3d0] sm:$0xff] }
 0xe8b   : > { %5212 = vmatprep.subr.bf16.mxu1 %v6081_v40  ;;  %5265 = vmatprep.subr.bf16.mxu0 %v6083_v61  ;;  %v6177_v21 = vcombine.high %v4450_v31, %v4458_v35  ;;  %v6176_v54 = vcombine.low %v4450_v31, %v4458_v35  ;;  %v4365_v40 = vld [vmem:[%s7702_s17 + $0xe8] sm:$0xff]  ;;  %v6068_v61 = vcombine.low %v4340_v43, %v4348_v52 }
 0xe8c   : > { %5146 = vmatprep.mubr.bf16.mxu1 %v9259_v30  ;;  %5199 = vmatprep.mubr.bf16.mxu0 %v9259_v30  ;;  %v6087_v1 = vcombine.high %v4357_v51, %v4365_v40  ;;  %v6086_v15 = vcombine.low %v4357_v51, %v4365_v40  ;;  %v4358_v40 = vld [vmem:[%s7702_s17 + $0xb0] sm:$0xff] }
 0xe8e   : > { %5213 = vmatpush1.bf16.msra.mxu1 %v6080_v19  ;;  %5266 = vmatpush1.bf16.msra.mxu0 %v6082_v5  ;;  %v4380_v19 = vld [vmem:[%s7702_s17 + $0x160] sm:$0xff]  ;;  %v4373_v5 = vld [vmem:[%s7702_s17 + $0x128] sm:$0xff] }
 0xe8f   : > { %5214 = vmatprep.subr.bf16.mxu1 %v6097_v8  ;;  %5267 = vmatprep.subr.bf16.mxu0 %v6099_v45  ;;  %v4381_v8 = vld [vmem:[%s7702_s17 + $0x168] sm:$0xff]  ;;  %v6084_v45 = vcombine.low %v4356_v4, %v4364_v41  ;;  %v6101_v17 = vcombine.high %v4372_v58, %v4380_v19 }
 0xe90   : > { %v6103_v24 = vcombine.high %v4373_v5, %v4381_v8  ;;  %v6102_v0 = vcombine.low %v4373_v5, %v4381_v8  ;;  %v4374_v8 = vld [vmem:[%s7702_s17 + $0x130] sm:$0xff] }
 0xe91   : > { %5147 = vmatmul.mubr.bf16.gmra.mrb[136].mxu1 %v8881_v53  ;;  %5200 = vmatmul.mubr.bf16.gmra.mrb[128].mxu0 %v8881_v53 }
 0xe92   : > { %5215 = vmatpush1.bf16.msra.mxu1 %v6096_v6  ;;  %5268 = vmatpush1.bf16.msra.mxu0 %v6098_v10  ;;  %v4396_v6 = vld [vmem:[%s7702_s17 + $0x1e0] sm:$0xff]  ;;  %v4389_v10 = vld [vmem:[%s7702_s17 + $0x1a8] sm:$0xff] }
 0xe93   : > { %5216 = vmatprep.subr.bf16.mxu1 %v6113_v12  ;;  %5269 = vmatprep.subr.bf16.mxu0 %v6115_v47  ;;  %v4397_v12 = vld [vmem:[%s7702_s17 + $0x1e8] sm:$0xff]  ;;  %v6100_v47 = vcombine.low %v4372_v58, %v4380_v19  ;;  %v6117_v36 = vcombine.high %v4388_v46, %v4396_v6 }
 0xe94   : > { %5242 = vmatprep.mubr.bf16.mxu1 %v9259_v30  ;;  %5295 = vmatprep.mubr.bf16.mxu0 %v9259_v30  ;;  %v6119_v63 = vcombine.high %v4389_v10, %v4397_v12  ;;  %v6118_v39 = vcombine.low %v4389_v10, %v4397_v12  ;;  %v4390_v12 = vld [vmem:[%s7702_s17 + $0x1b0] sm:$0xff] }
 0xe96   : > { %5217 = vmatpush1.bf16.msra.mxu1 %v6112_v16  ;;  %5270 = vmatpush1.bf16.msra.mxu0 %v6114_v56  ;;  %v4412_v16 = vld [vmem:[%s7702_s17 + $0x260] sm:$0xff]  ;;  %v4405_v56 = vld [vmem:[%s7702_s17 + $0x228] sm:$0xff] }
 0xe97   : > { %5218 = vmatprep.subr.bf16.mxu1 %v6129_v59  ;;  %5271 = vmatprep.subr.bf16.mxu0 %v6131_v18  ;;  %v4413_v59 = vld [vmem:[%s7702_s17 + $0x268] sm:$0xff]  ;;  %v6116_v18 = vcombine.low %v4388_v46, %v4396_v6  ;;  %v6133_v37 = vcombine.high %v4404_v23, %v4412_v16 }
 0xe98   : > { %v6135_v34 = vcombine.high %v4405_v56, %v4413_v59  ;;  %v6134_v27 = vcombine.low %v4405_v56, %v4413_v59  ;;  %v4406_v59 = vld [vmem:[%s7702_s17 + $0x230] sm:$0xff] }
 0xe9a   : > { %5219 = vmatpush1.bf16.msra.mxu1 %v6128_v29  ;;  %5272 = vmatpush1.bf16.msra.mxu0 %v6130_v48  ;;  %v4428_v29 = vld [vmem:[%s7702_s17 + $0x2e0] sm:$0xff]  ;;  %v4421_v48 = vld [vmem:[%s7702_s17 + $0x2a8] sm:$0xff] }
 0xe9b   : > { %5220 = vmatprep.subr.bf16.mxu1 %v6145_v14  ;;  %5273 = vmatprep.subr.bf16.mxu0 %v6147_v28  ;;  %v4429_v14 = vld [vmem:[%s7702_s17 + $0x2e8] sm:$0xff]  ;;  %v6132_v28 = vcombine.low %v4404_v23, %v4412_v16  ;;  %v6149_v9 = vcombine.high %v4420_v26, %v4428_v29 }
 0xe9c   : > { %v6151_v20 = vcombine.high %v4421_v48, %v4429_v14  ;;  %v6150_v31 = vcombine.low %v4421_v48, %v4429_v14  ;;  %v4422_v14 = vld [vmem:[%s7702_s17 + $0x2b0] sm:$0xff] }
 0xe9e   : > { %5221 = vmatpush1.bf16.msra.mxu1 %v6144_v25  ;;  %5274 = vmatpush1.bf16.msra.mxu0 %v6146_v2  ;;  %v4444_v25 = vld [vmem:[%s7702_s17 + $0x360] sm:$0xff]  ;;  %v4437_v2 = vld [vmem:[%s7702_s17 + $0x328] sm:$0xff] }
 0xe9f   : > { %5222 = vmatprep.subr.bf16.mxu1 %v6161_v3  ;;  %5275 = vmatprep.subr.bf16.mxu0 %v6163_v55  ;;  %v4445_v3 = vld [vmem:[%s7702_s17 + $0x368] sm:$0xff]  ;;  %v6148_v55 = vcombine.low %v4420_v26, %v4428_v29  ;;  %v6165_v35 = vcombine.high %v4436_v32, %v4444_v25 }
 0xea0   : > { %v6167_v33 = vcombine.high %v4437_v2, %v4445_v3  ;;  %v6166_v43 = vcombine.low %v4437_v2, %v4445_v3  ;;  %v4438_v3 = vld [vmem:[%s7702_s17 + $0x330] sm:$0xff] }
 0xea2   : > { %5223 = vmatpush1.bf16.msra.mxu1 %v6160_v42  ;;  %5276 = vmatpush1.bf16.msra.mxu0 %v6162_v38  ;;  %v4460_v42 = vld [vmem:[%s7702_s17 + $0x3e0] sm:$0xff]  ;;  %v4453_v38 = vld [vmem:[%s7702_s17 + $0x3a8] sm:$0xff] }
 0xea3   : > { %5224 = vmatprep.subr.bf16.mxu1 %v6177_v21  ;;  %5277 = vmatprep.subr.bf16.mxu0 %v6179_v11  ;;  %v4461_v21 = vld [vmem:[%s7702_s17 + $0x3e8] sm:$0xff]  ;;  %v6164_v11 = vcombine.low %v4436_v32, %v4444_v25  ;;  %v6181_v52 = vcombine.high %v4452_v62, %v4460_v42 }
 0xea4   : > { %v6183_v13 = vcombine.high %v4453_v38, %v4461_v21  ;;  %v6182_v4 = vcombine.low %v4453_v38, %v4461_v21  ;;  %v4454_v21 = vld [vmem:[%s7702_s17 + $0x3b0] sm:$0xff] }
 0xea6   : > { %5225 = vmatpush1.bf16.msra.mxu1 %v6176_v54  ;;  %5278 = vmatpush1.bf16.msra.mxu0 %v6178_v57  ;;  %v4350_v54 = vld [vmem:[%s7702_s17 + $0x70] sm:$0xff]  ;;  %v4343_v57 = vld [vmem:[%s7702_s17 + $0x38] sm:$0xff] }
 0xea7   : > { %5316 = vmatprep.subr.bf16.mxu1 %v6069_v7  ;;  %5369 = vmatprep.subr.bf16.mxu0 %v6071_v60  ;;  %v4351_v7 = vld [vmem:[%s7702_s17 + $0x78] sm:$0xff]  ;;  %v6180_v60 = vcombine.low %v4452_v62, %v4460_v42  ;;  %v6073_v41 = vcombine.high %v4342_v44, %v4350_v54 }
 0xea8   : > { %v6075_v51 = vcombine.high %v4343_v57, %v4351_v7  ;;  %v6074_v58 = vcombine.low %v4343_v57, %v4351_v7 }
 0xea9   : > { %5243 = vmatmul.mubr.bf16.vlgmr.msra.gmra.mrb[140].mxu1 %v8883_v22  ;;  %5296 = vmatmul.mubr.bf16.vlgmr.msra.gmra.mrb[132].mxu0 %v8883_v22 }
 0xeaa   : > { %5317 = vmatpush1.bf16.msra.mxu1 %v6068_v61  ;;  %5370 = vmatpush1.bf16.msra.mxu0 %v6070_v49  ;;  %v4366_v61 = vld [vmem:[%s7702_s17 + $0xf0] sm:$0xff]  ;;  %v4359_v49 = vld [vmem:[%s7702_s17 + $0xb8] sm:$0xff] }
 0xeab   : > { %5318 = vmatprep.subr.bf16.mxu1 %v6085_v50  ;;  %5371 = vmatprep.subr.bf16.mxu0 %v6087_v1  ;;  %v4367_v50 = vld [vmem:[%s7702_s17 + $0xf8] sm:$0xff]  ;;  %v6072_v1 = vcombine.low %v4342_v44, %v4350_v54  ;;  %v6089_v19 = vcombine.high %v4358_v40, %v4366_v61 }
 0xeac   : > { %5252 = vmatprep.mubr.bf16.mxu1 %v9259_v30  ;;  %5305 = vmatprep.mubr.bf16.mxu0 %v9259_v30  ;;  %v6091_v5 = vcombine.high %v4359_v49, %v4367_v50  ;;  %v6090_v46 = vcombine.low %v4359_v49, %v4367_v50 }
 0xeae   : > { %5319 = vmatpush1.bf16.msra.mxu1 %v6084_v45  ;;  %5372 = vmatpush1.bf16.msra.mxu0 %v6086_v15  ;;  %v4382_v45 = vld [vmem:[%s7702_s17 + $0x170] sm:$0xff]  ;;  %v4375_v15 = vld [vmem:[%s7702_s17 + $0x138] sm:$0xff] }
 0xeaf   : > { %5320 = vmatprep.subr.bf16.mxu1 %v6101_v17  ;;  %5373 = vmatprep.subr.bf16.mxu0 %v6103_v24  ;;  %v4383_v17 = vld [vmem:[%s7702_s17 + $0x178] sm:$0xff]  ;;  %v6088_v24 = vcombine.low %v4358_v40, %v4366_v61  ;;  %v6105_v6 = vcombine.high %v4374_v8, %v4382_v45 }
 0xeb0   : > { %v6107_v10 = vcombine.high %v4375_v15, %v4383_v17  ;;  %v6106_v23 = vcombine.low %v4375_v15, %v4383_v17 }
 0xeb1   : > { %5253 = vmatmul.mubr.bf16.gmra.mrb[144].mxu1 %v8881_v53  ;;  %5306 = vmatmul.mubr.bf16.gmra.mrb[136].mxu0 %v8881_v53 }
 0xeb2   : > { %5321 = vmatpush1.bf16.msra.mxu1 %v6100_v47  ;;  %5374 = vmatpush1.bf16.msra.mxu0 %v6102_v0  ;;  %v4398_v47 = vld [vmem:[%s7702_s17 + $0x1f0] sm:$0xff]  ;;  %v4391_v0 = vld [vmem:[%s7702_s17 + $0x1b8] sm:$0xff] }
 0xeb3   : > { %5322 = vmatprep.subr.bf16.mxu1 %v6117_v36  ;;  %5375 = vmatprep.subr.bf16.mxu0 %v6119_v63  ;;  %v4399_v36 = vld [vmem:[%s7702_s17 + $0x1f8] sm:$0xff]  ;;  %v6104_v63 = vcombine.low %v4374_v8, %v4382_v45  ;;  %v6121_v16 = vcombine.high %v4390_v12, %v4398_v47 }
 0xeb4   : > { %5348 = vmatprep.mubr.bf16.mxu1 %v9259_v30  ;;  %5401 = vmatprep.mubr.bf16.mxu0 %v9259_v30  ;;  %v6123_v56 = vcombine.high %v4391_v0, %v4399_v36  ;;  %v6122_v26 = vcombine.low %v4391_v0, %v4399_v36 }
 0xeb6   : > { %5323 = vmatpush1.bf16.msra.mxu1 %v6116_v18  ;;  %5376 = vmatpush1.bf16.msra.mxu0 %v6118_v39  ;;  %v4414_v18 = vld [vmem:[%s7702_s17 + $0x270] sm:$0xff]  ;;  %v4407_v39 = vld [vmem:[%s7702_s17 + $0x238] sm:$0xff] }
 0xeb7   : > { %5324 = vmatprep.subr.bf16.mxu1 %v6133_v37  ;;  %5377 = vmatprep.subr.bf16.mxu0 %v6135_v34  ;;  %v4415_v37 = vld [vmem:[%s7702_s17 + $0x278] sm:$0xff]  ;;  %v6120_v34 = vcombine.low %v4390_v12, %v4398_v47  ;;  %v6137_v29 = vcombine.high %v4406_v59, %v4414_v18 }
 0xeb8   : > { %v6139_v48 = vcombine.high %v4407_v39, %v4415_v37  ;;  %v6138_v32 = vcombine.low %v4407_v39, %v4415_v37 }
 0xeba   : > { %5325 = vmatpush1.bf16.msra.mxu1 %v6132_v28  ;;  %5378 = vmatpush1.bf16.msra.mxu0 %v6134_v27  ;;  %v4430_v28 = vld [vmem:[%s7702_s17 + $0x2f0] sm:$0xff]  ;;  %v4423_v27 = vld [vmem:[%s7702_s17 + $0x2b8] sm:$0xff] }
 0xebb   : > { %5326 = vmatprep.subr.bf16.mxu1 %v6149_v9  ;;  %5379 = vmatprep.subr.bf16.mxu0 %v6151_v20  ;;  %v4431_v9 = vld [vmem:[%s7702_s17 + $0x2f8] sm:$0xff]  ;;  %v6136_v20 = vcombine.low %v4406_v59, %v4414_v18  ;;  %v6153_v25 = vcombine.high %v4422_v14, %v4430_v28 }
 0xebc   : > { %v6155_v2 = vcombine.high %v4423_v27, %v4431_v9  ;;  %v6154_v62 = vcombine.low %v4423_v27, %v4431_v9 }
 0xebe   : > { %5327 = vmatpush1.bf16.msra.mxu1 %v6148_v55  ;;  %5380 = vmatpush1.bf16.msra.mxu0 %v6150_v31  ;;  %v4446_v55 = vld [vmem:[%s7702_s17 + $0x370] sm:$0xff]  ;;  %v4439_v31 = vld [vmem:[%s7702_s17 + $0x338] sm:$0xff] }
 0xebf   : > { %5328 = vmatprep.subr.bf16.mxu1 %v6165_v35  ;;  %5381 = vmatprep.subr.bf16.mxu0 %v6167_v33  ;;  %v4447_v35 = vld [vmem:[%s7702_s17 + $0x378] sm:$0xff]  ;;  %v6152_v33 = vcombine.low %v4422_v14, %v4430_v28  ;;  %v6169_v42 = vcombine.high %v4438_v3, %v4446_v55 }
 0xec0   : > { %v6171_v38 = vcombine.high %v4439_v31, %v4447_v35  ;;  %v6170_v44 = vcombine.low %v4439_v31, %v4447_v35 }
 0xec2   : > { %5329 = vmatpush1.bf16.msra.mxu1 %v6164_v11  ;;  %5382 = vmatpush1.bf16.msra.mxu0 %v6166_v43  ;;  %v4462_v11 = vld [vmem:[%s7702_s17 + $0x3f0] sm:$0xff]  ;;  %v4455_v43 = vld [vmem:[%s7702_s17 + $0x3b8] sm:$0xff] }
 0xec3   : > { %5330 = vmatprep.subr.bf16.mxu1 %v6181_v52  ;;  %5383 = vmatprep.subr.bf16.mxu0 %v6183_v13  ;;  %v4463_v52 = vld [vmem:[%s7702_s17 + $0x3f8] sm:$0xff]  ;;  %v6168_v13 = vcombine.low %v4438_v3, %v4446_v55  ;;  %v6185_v54 = vcombine.high %v4454_v21, %v4462_v11  ;;  %v6184_v7 = vcombine.low %v4454_v21, %v4462_v11  ;;  %s5779_s17 = sshll.u32 %s7699_s6, 9 }
 0xec4   : > { %v6187_v57 = vcombine.high %v4455_v43, %v4463_v52  ;;  %s9004_s20 = scalar_lea.vmem [#allocation17], %s5779_s17 }
 0xec5   : > { %s5606_s9 = sshll.u32 %s9004_s20, 4  ;;  %s9071_s9 = int_to_ptr.vmem [resolvable:$true] %s5606_s9 }
 0xec6   : > { %5331 = vmatpush1.bf16.msra.mxu1 %v6180_v60  ;;  %5384 = vmatpush1.bf16.msra.mxu0 %v6182_v4  ;;  %v6186_v60 = vcombine.low %v4455_v43, %v4463_v52  ;;  %s7171_s4 = scalar_lea.vmem %s9071_s9, 8192  ;;  %p7178_p3 = scmp.lt.s32.totalorder %s9071_s9, %s7176_s1 }
 0xec7   : > { %5422 = vmatprep.subr.bf16.mxu1 %v6073_v41  ;;  %5475 = vmatprep.subr.bf16.mxu0 %v6075_v51  ;;  %p7172_p6 = scmp.ne.s32.totalorder %s9071_s9, %s7171_s4  ;;  %p7179_p0 = scmp.lt.s32.totalorder %s7177_s18, %s7171_s4 }
 0xec9   : > { %5349 = vmatmul.mubr.bf16.vlgmr.msra.gmra.mrb[148].mxu1 %v8883_v22  ;;  %5402 = vmatmul.mubr.bf16.vlgmr.msra.gmra.mrb[140].mxu0 %v8883_v22  ;;  %p7173_p13 = pnand %p7172_p6, %p9265_p12  ;;  %p7180_p7 = por %p7179_p0, %p7178_p3 }
 0xeca   : > { %5423 = vmatpush1.bf16.msra.mxu1 %v6072_v1  ;;  %5476 = vmatpush1.bf16.msra.mxu0 %v6074_v58 }
 0xecb   : > { %5424 = vmatprep.subr.bf16.mxu1 %v6089_v19  ;;  %5477 = vmatprep.subr.bf16.mxu0 %v6091_v5  ;;  %p7174_p8 = pneg %p7173_p13 }
 0xecc   : > { %5358 = vmatprep.mubr.bf16.mxu1 %v9259_v30  ;;  %5411 = vmatprep.mubr.bf16.mxu0 %v9259_v30 }
 0xecd   : > { %p7181_p9 = pnand %p7180_p7, %p7174_p8 }
 0xece   : > { %5425 = vmatpush1.bf16.msra.mxu1 %v6088_v24  ;;  %5478 = vmatpush1.bf16.msra.mxu0 %v6090_v46 }
 0xecf   : > { %5426 = vmatprep.subr.bf16.mxu1 %v6105_v6  ;;  %5479 = vmatprep.subr.bf16.mxu0 %v6107_v10 }
 0xed1   : > { %5359 = vmatmul.mubr.bf16.gmra.mrb[152].mxu1 %v8881_v53  ;;  %5412 = vmatmul.mubr.bf16.gmra.mrb[144].mxu0 %v8881_v53 }
 0xed2   : > { %5427 = vmatpush1.bf16.msra.mxu1 %v6104_v63  ;;  %5480 = vmatpush1.bf16.msra.mxu0 %v6106_v23 }
 0xed3   : > { %5428 = vmatprep.subr.bf16.mxu1 %v6121_v16  ;;  %5481 = vmatprep.subr.bf16.mxu0 %v6123_v56 }
 0xed4   : > { %5454 = vmatprep.mubr.bf16.mxu1 %v9259_v30  ;;  %5507 = vmatprep.mubr.bf16.mxu0 %v9259_v30 }
 0xed6   : > { %5429 = vmatpush1.bf16.msra.mxu1 %v6120_v34  ;;  %5482 = vmatpush1.bf16.msra.mxu0 %v6122_v26 }
 0xed7   : > { %5430 = vmatprep.subr.bf16.mxu1 %v6137_v29  ;;  %5483 = vmatprep.subr.bf16.mxu0 %v6139_v48 }
 0xeda   : > { %5431 = vmatpush1.bf16.msra.mxu1 %v6136_v20  ;;  %5484 = vmatpush1.bf16.msra.mxu0 %v6138_v32 }
 0xedb   : > { %5432 = vmatprep.subr.bf16.mxu1 %v6153_v25  ;;  %5485 = vmatprep.subr.bf16.mxu0 %v6155_v2 }
 0xede   : > { %5433 = vmatpush1.bf16.msra.mxu1 %v6152_v33  ;;  %5486 = vmatpush1.bf16.msra.mxu0 %v6154_v62 }
 0xedf   : > { %5434 = vmatprep.subr.bf16.mxu1 %v6169_v42  ;;  %5487 = vmatprep.subr.bf16.mxu0 %v6171_v38 }
 0xee2   : > { %5435 = vmatpush1.bf16.msra.mxu1 %v6168_v13  ;;  %5488 = vmatpush1.bf16.msra.mxu0 %v6170_v44 }
 0xee3   : > { %5436 = vmatprep.subr.bf16.mxu1 %v6185_v54  ;;  %5489 = vmatprep.subr.bf16.mxu0 %v6187_v57 }
 0xee6   : > { %5437 = vmatpush1.bf16.msra.mxu1 %v6184_v7  ;;  %5490 = vmatpush1.bf16.msra.mxu0 %v6186_v60 }
 0xee9   : > { %5455 = vmatmul.mubr.bf16.vlgmr.msra.gmra.mrb[156].mxu1 %v8883_v22  ;;  %5508 = vmatmul.mubr.bf16.vlgmr.msra.gmra.mrb[148].mxu0 %v8883_v22 }
 0xeea   : > { %5464 = vmatprep.mubr.bf16.mxu1 %v9259_v30  ;;  %5517 = vmatprep.mubr.bf16.mxu0 %v9259_v30 }
 0xef1   : > { %5465 = vmatmul.mubr.bf16.gmra.mrb[160].mxu1 %v8881_v53  ;;  %5518 = vmatmul.mubr.bf16.gmra.mrb[152].mxu0 %v8881_v53 }
 0xf5c   : > { %v5138_v4 = vpop.f32.mrb[132].mxu1  ;;  %v5191_v41 = vpop.f32.mrb[124].mxu0 }
 0xf5d   : > { %5528 = vst [vmem:[%s9004_s20] sm:$0xff] %v5138_v4  ;;  %5530 = vst [vmem:[%s9004_s20 + $0x10] sm:$0xff] %v5191_v41  ;;  %v5140_v30 = vpop.f32.mrb[133].mxu1  ;;  %v5193_v22 = vpop.f32.mrb[125].mxu0 }
 0xf5e   : > { %5529 = vst [vmem:[%s9004_s20 + $0x8] sm:$0xff] %v5140_v30  ;;  %5531 = vst [vmem:[%s9004_s20 + $0x18] sm:$0xff] %v5193_v22  ;;  %v5142_v53 = vpop.f32.mrb[134].mxu1  ;;  %v5195_v51 = vpop.f32.mrb[126].mxu0 }
 0xf5f   : > { %5544 = vst [vmem:[%s9004_s20 + $0x80] sm:$0xff] %v5142_v53  ;;  %5546 = vst [vmem:[%s9004_s20 + $0x90] sm:$0xff] %v5195_v51  ;;  %v5144_v40 = vpop.f32.mrb[135].mxu1  ;;  %v5197_v61 = vpop.f32.mrb[127].mxu0 }
 0xf60   : > { %5545 = vst [vmem:[%s9004_s20 + $0x88] sm:$0xff] %v5144_v40  ;;  %5547 = vst [vmem:[%s9004_s20 + $0x98] sm:$0xff] %v5197_v61 }
 0xf64   : > { %v5148_v49 = vpop.f32.mrb[136].mxu1  ;;  %v5201_v50 = vpop.f32.mrb[128].mxu0 }
 0xf65   : > { %5560 = vst [vmem:[%s9004_s20 + $0x100] sm:$0xff] %v5148_v49  ;;  %5562 = vst [vmem:[%s9004_s20 + $0x110] sm:$0xff] %v5201_v50  ;;  %v5150_v1 = vpop.f32.mrb[137].mxu1  ;;  %v5203_v58 = vpop.f32.mrb[129].mxu0 }
 0xf66   : > { %5561 = vst [vmem:[%s9004_s20 + $0x108] sm:$0xff] %v5150_v1  ;;  %5563 = vst [vmem:[%s9004_s20 + $0x118] sm:$0xff] %v5203_v58  ;;  %v5152_v19 = vpop.f32.mrb[138].mxu1  ;;  %v5205_v5 = vpop.f32.mrb[130].mxu0 }
 0xf67   : > { %5576 = vst [vmem:[%s9004_s20 + $0x180] sm:$0xff] %v5152_v19  ;;  %5578 = vst [vmem:[%s9004_s20 + $0x190] sm:$0xff] %v5205_v5  ;;  %v5154_v8 = vpop.f32.mrb[139].mxu1  ;;  %v5207_v45 = vpop.f32.mrb[131].mxu0 }
 0xf68   : > { %5577 = vst [vmem:[%s9004_s20 + $0x188] sm:$0xff] %v5154_v8  ;;  %5579 = vst [vmem:[%s9004_s20 + $0x198] sm:$0xff] %v5207_v45 }
 0xf7c   : > { %v5244_v15 = vpop.f32.mrb[140].mxu1  ;;  %v5297_v17 = vpop.f32.mrb[132].mxu0 }
 0xf7d   : > { %5532 = vst [vmem:[%s9004_s20 + $0x20] sm:$0xff] %v5244_v15  ;;  %5534 = vst [vmem:[%s9004_s20 + $0x30] sm:$0xff] %v5297_v17  ;;  %v5246_v24 = vpop.f32.mrb[141].mxu1  ;;  %v5299_v46 = vpop.f32.mrb[133].mxu0 }
 0xf7e   : > { %5533 = vst [vmem:[%s9004_s20 + $0x28] sm:$0xff] %v5246_v24  ;;  %5535 = vst [vmem:[%s9004_s20 + $0x38] sm:$0xff] %v5299_v46  ;;  %v5248_v6 = vpop.f32.mrb[142].mxu1  ;;  %v5301_v10 = vpop.f32.mrb[134].mxu0 }
 0xf7f   : > { %5548 = vst [vmem:[%s9004_s20 + $0xa0] sm:$0xff] %v5248_v6  ;;  %5550 = vst [vmem:[%s9004_s20 + $0xb0] sm:$0xff] %v5301_v10  ;;  %v5250_v12 = vpop.f32.mrb[143].mxu1  ;;  %v5303_v47 = vpop.f32.mrb[135].mxu0 }
 0xf80   : > { %5549 = vst [vmem:[%s9004_s20 + $0xa8] sm:$0xff] %v5250_v12  ;;  %5551 = vst [vmem:[%s9004_s20 + $0xb8] sm:$0xff] %v5303_v47 }
 0xf84   : > { %v5254_v0 = vpop.f32.mrb[144].mxu1  ;;  %v5307_v36 = vpop.f32.mrb[136].mxu0 }
 0xf85   : > { %5564 = vst [vmem:[%s9004_s20 + $0x120] sm:$0xff] %v5254_v0  ;;  %5566 = vst [vmem:[%s9004_s20 + $0x130] sm:$0xff] %v5307_v36  ;;  %v5256_v63 = vpop.f32.mrb[145].mxu1  ;;  %v5309_v23 = vpop.f32.mrb[137].mxu0 }
 0xf86   : > { %5565 = vst [vmem:[%s9004_s20 + $0x128] sm:$0xff] %v5256_v63  ;;  %5567 = vst [vmem:[%s9004_s20 + $0x138] sm:$0xff] %v5309_v23  ;;  %v5258_v16 = vpop.f32.mrb[146].mxu1  ;;  %v5311_v56 = vpop.f32.mrb[138].mxu0 }
 0xf87   : > { %5580 = vst [vmem:[%s9004_s20 + $0x1a0] sm:$0xff] %v5258_v16  ;;  %5582 = vst [vmem:[%s9004_s20 + $0x1b0] sm:$0xff] %v5311_v56  ;;  %v5260_v59 = vpop.f32.mrb[147].mxu1  ;;  %v5313_v18 = vpop.f32.mrb[139].mxu0 }
 0xf88   : > { %5581 = vst [vmem:[%s9004_s20 + $0x1a8] sm:$0xff] %v5260_v59  ;;  %5583 = vst [vmem:[%s9004_s20 + $0x1b8] sm:$0xff] %v5313_v18 }
 0xf9c   : > { %v5350_v39 = vpop.f32.mrb[148].mxu1  ;;  %v5403_v37 = vpop.f32.mrb[140].mxu0 }
 0xf9d   : > { %5536 = vst [vmem:[%s9004_s20 + $0x40] sm:$0xff] %v5350_v39  ;;  %5538 = vst [vmem:[%s9004_s20 + $0x50] sm:$0xff] %v5403_v37  ;;  %v5352_v34 = vpop.f32.mrb[149].mxu1  ;;  %v5405_v26 = vpop.f32.mrb[141].mxu0 }
 0xf9e   : > { %5537 = vst [vmem:[%s9004_s20 + $0x48] sm:$0xff] %v5352_v34  ;;  %5539 = vst [vmem:[%s9004_s20 + $0x58] sm:$0xff] %v5405_v26  ;;  %v5354_v29 = vpop.f32.mrb[150].mxu1  ;;  %v5407_v48 = vpop.f32.mrb[142].mxu0 }
 0xf9f   : > { %5552 = vst [vmem:[%s9004_s20 + $0xc0] sm:$0xff] %v5354_v29  ;;  %5554 = vst [vmem:[%s9004_s20 + $0xd0] sm:$0xff] %v5407_v48  ;;  %v5356_v14 = vpop.f32.mrb[151].mxu1  ;;  %v5409_v28 = vpop.f32.mrb[143].mxu0 }
 0xfa0   : > { %5553 = vst [vmem:[%s9004_s20 + $0xc8] sm:$0xff] %v5356_v14  ;;  %5555 = vst [vmem:[%s9004_s20 + $0xd8] sm:$0xff] %v5409_v28 }
 0xfa4   : > { %v5360_v27 = vpop.f32.mrb[152].mxu1  ;;  %v5413_v9 = vpop.f32.mrb[144].mxu0 }
 0xfa5   : > { %5568 = vst [vmem:[%s9004_s20 + $0x140] sm:$0xff] %v5360_v27  ;;  %5570 = vst [vmem:[%s9004_s20 + $0x150] sm:$0xff] %v5413_v9  ;;  %v5362_v20 = vpop.f32.mrb[153].mxu1  ;;  %v5415_v32 = vpop.f32.mrb[145].mxu0 }
 0xfa6   : > { %5569 = vst [vmem:[%s9004_s20 + $0x148] sm:$0xff] %v5362_v20  ;;  %5571 = vst [vmem:[%s9004_s20 + $0x158] sm:$0xff] %v5415_v32  ;;  %v5364_v25 = vpop.f32.mrb[154].mxu1  ;;  %v5417_v2 = vpop.f32.mrb[146].mxu0 }
 0xfa7   : > { %5584 = vst [vmem:[%s9004_s20 + $0x1c0] sm:$0xff] %v5364_v25  ;;  %5586 = vst [vmem:[%s9004_s20 + $0x1d0] sm:$0xff] %v5417_v2  ;;  %v5366_v3 = vpop.f32.mrb[155].mxu1  ;;  %v5419_v55 = vpop.f32.mrb[147].mxu0 }
 0xfa8   : > { %5585 = vst [vmem:[%s9004_s20 + $0x1c8] sm:$0xff] %v5366_v3  ;;  %5587 = vst [vmem:[%s9004_s20 + $0x1d8] sm:$0xff] %v5419_v55 }
 0xfbc   : > { %v5456_v31 = vpop.f32.mrb[156].mxu1  ;;  %v5509_v35 = vpop.f32.mrb[148].mxu0 }
 0xfbd   : > { %5540 = vst [vmem:[%s9004_s20 + $0x60] sm:$0xff] %v5456_v31  ;;  %5542 = vst [vmem:[%s9004_s20 + $0x70] sm:$0xff] %v5509_v35  ;;  %v5458_v33 = vpop.f32.mrb[157].mxu1  ;;  %v5511_v62 = vpop.f32.mrb[149].mxu0 }
 0xfbe   : > { %5541 = vst [vmem:[%s9004_s20 + $0x68] sm:$0xff] %v5458_v33  ;;  %5543 = vst [vmem:[%s9004_s20 + $0x78] sm:$0xff] %v5511_v62  ;;  %v5460_v42 = vpop.f32.mrb[158].mxu1  ;;  %v5513_v38 = vpop.f32.mrb[150].mxu0 }
 0xfbf   : > { %5556 = vst [vmem:[%s9004_s20 + $0xe0] sm:$0xff] %v5460_v42  ;;  %5558 = vst [vmem:[%s9004_s20 + $0xf0] sm:$0xff] %v5513_v38  ;;  %v5462_v21 = vpop.f32.mrb[159].mxu1  ;;  %v5515_v11 = vpop.f32.mrb[151].mxu0 }
 0xfc0   : > { %5557 = vst [vmem:[%s9004_s20 + $0xe8] sm:$0xff] %v5462_v21  ;;  %5559 = vst [vmem:[%s9004_s20 + $0xf8] sm:$0xff] %v5515_v11 }
 0xfc4   : > { %v5466_v43 = vpop.f32.mrb[160].mxu1  ;;  %v5519_v52 = vpop.f32.mrb[152].mxu0 }
 0xfc5   : > { %5572 = vst [vmem:[%s9004_s20 + $0x160] sm:$0xff] %v5466_v43  ;;  %5574 = vst [vmem:[%s9004_s20 + $0x170] sm:$0xff] %v5519_v52  ;;  %v5468_v13 = vpop.f32.mrb[161].mxu1  ;;  %v5521_v44 = vpop.f32.mrb[153].mxu0 }
 0xfc6   : > { %5573 = vst [vmem:[%s9004_s20 + $0x168] sm:$0xff] %v5468_v13  ;;  %5575 = vst [vmem:[%s9004_s20 + $0x178] sm:$0xff] %v5521_v44  ;;  %v5470_v54 = vpop.f32.mrb[162].mxu1  ;;  %v5523_v57 = vpop.f32.mrb[154].mxu0 }
 0xfc7   : > { %5588 = vst [vmem:[%s9004_s20 + $0x1e0] sm:$0xff] %v5470_v54  ;;  %5590 = vst [vmem:[%s9004_s20 + $0x1f0] sm:$0xff] %v5523_v57  ;;  %v5472_v7 = vpop.f32.mrb[163].mxu1  ;;  %v5525_v60 = vpop.f32.mrb[155].mxu0 }
 0xfc8   : > { %5589 = vst [vmem:[%s9004_s20 + $0x1e8] sm:$0xff] %v5472_v7  ;;  %5591 = vst [vmem:[%s9004_s20 + $0x1f8] sm:$0xff] %v5525_v60 }
 0xfc9   : > { %7184 = shalt.err (!%p7181_p9)
}
 0xfca   : > { %s7185_s17 = scalar_lea.hbm %s9067_s3, 8192  ;;  %s7189_s30 = scalar_lea.hbm %s9264_s2, 16384 }
 0xfcb   : > { %p7186_p2 = scmp.ne.s32.totalorder %s9067_s3, %s7185_s17  ;;  %p7190_p10 = scmp.lt.u32.totalorder %s9067_s3, %s9264_s2 }
 0xfcc   : > { %p7191_p1 = scmp.lt.u32.totalorder %s7189_s30, %s7185_s17  ;;  %p7193_p6 = scmp.lt.u32.totalorder %s7185_s17, %s9067_s3 }
 0xfcd   : > { %p7187_p4 = pnand %p7186_p2, %p9265_p12 }
 0xfce   : > { %p7192_p11 = por %p7191_p1, %p7190_p10 }
 0xfcf   : > { %p7188_p5 = pneg %p7187_p4 }
 0xfd0   : > { %p7194_p13 = por %p7193_p6, %p7192_p11 }
 0xfd2   : > { %p7195_p8 = pnand %p7194_p13, %p7188_p5 }
 0xfd4   : > { %7198 = shalt.err (!%p7195_p8)
}
 0xfd5   : > { %s7277_s4 = smov 2048   ;;  %s7278_s1 = smov 4096  }
 0xfd6   : > { %s7279_s18 = smov 128  }
 0xfd7   : > { %6601 = dma.vmem_to_hbm [thread:$0]  (%p9265_p12), %s9071_s9, 8192, %s9067_s3, %s5593_s27, %s7277_s4, %s7278_s1, %s7279_s18  }
 0xfd8 PF: > { %s5621_s20 = sand.u32 1, %s7245_s21   ;;  %p9266_p3 = scmp.ne.s32.totalorder %s9194_s7, 0 }
 0xfd9   : > { %p9267_p0 = scmp.ge.s32.totalorder %s7257_s24, 2  ;;  %s5622_s17 = scalar_lea.sflag [#allocation4], %s5621_s20 }
 0xfdb   : > { %p6633_p7 = pnand %p9267_p0, %p9266_p3 }
 0xfdd   : > { %7240 = dma.done.wait (!%p6633_p7), %s5622_s17, 8192  }
 0xfde   : > { %7242 = vsyncadd (!%p6633_p7), %s5622_s17, 4294959104  ;;  %p31_p9 = scmp.ge.s32.totalorder %s7597_s29, 4   ;;  %s9268_s21 = smov %s7249_s22 }
 0xfdf   : > { %s9269_s22 = smov %s7253_s23  ;;  %s9270_s23 = smov %s7608_s8 }
 0xfe0   : > { %s9271_s24 = smov %s7597_s29  ;;  %33 = sbr.rel (!%p31_p9) target bundleno = 22 (0x16), region = 160 }
 0xfe7   :  { %5627 = vsyncpa [#allocation3], 1 }
 0xfe8   :  { %5629 = vsyncpa [#allocation3 + $0x1], 1 }
 0xfe9   :  { %5630 = vsyncpa [#allocation6], 1 }
 0xfea   :  { %5631 = vsyncpa [#allocation9], 1 }
 0xfeb   :  { %5632 = vsyncpa [#allocation12], 1 }
 0xfec   :  { %5633 = vsyncpa [#allocation15], 1 }
 0xfed   :  { %5634 = vsyncpa [#allocation4], 1 }
 0xfee   :  { %5636 = vsyncpa [#allocation4 + $0x1], 1 }

</bundles_post_ra>
